<compile_context>
chip_gen: v7x
topology: tpu7x:2x2x1
jax: 0.10.0
libtpu: 0.0.40
codegen_flags: <defaults>
</compile_context>

<pallas_src>
import functools

import jax
import jax.numpy as jnp
from jax.experimental import pallas as pl
from jax.experimental.pallas import tpu as pltpu


_VMEM_LIMIT_BYTES = 32 * 1024 * 1024


# ---------------------------------------------------------------------------
# LSTM cell step (single direction, PyTorch i,f,g,o gate order)
# ---------------------------------------------------------------------------
def _dir_step(h, c, xp, whh, hidden):
    """h, c: (B,H) f32; xp: (B,4H) f32 (x@W_ih + b_ih + b_hh); whh: (H,4H) bf16."""
    gates = xp + jnp.dot(h.astype(jnp.bfloat16), whh,
                         preferred_element_type=jnp.float32)          # (B, 4H)
    i = jax.nn.sigmoid(gates[:, 0 * hidden:1 * hidden])
    f = jax.nn.sigmoid(gates[:, 1 * hidden:2 * hidden])
    g = jnp.tanh(gates[:, 2 * hidden:3 * hidden])
    o = jax.nn.sigmoid(gates[:, 3 * hidden:4 * hidden])
    c_new = f * c + i * g
    h_new = o * jnp.tanh(c_new)
    return h_new, c_new


def _input_projection(x_ref, wih_ref, b_ref, *, hidden, split_input):
    """Hoisted input projection for all timesteps & both directions.

    Returns (T*B, 8H) f32 with (b_ih + b_hh) folded in; columns [0:4H] feed the forward
    direction, [4H:8H] the backward direction.
    """
    if split_input:
        # x_ref: (2, T*B, H) bf16 direction-major output of the previous layer.
        H = x_ref.shape[2]
        wih = wih_ref[...]                                            # (2H, 8H) bf16
        return (jnp.dot(x_ref[0], wih[0:H], preferred_element_type=jnp.float32)
                + jnp.dot(x_ref[1], wih[H:2 * H], preferred_element_type=jnp.float32)
                + b_ref[...])
    # x_ref: (T*B, Din) bf16
    return (jnp.dot(x_ref[...], wih_ref[...], preferred_element_type=jnp.float32)
            + b_ref[...])


# ---------------------------------------------------------------------------
# Pallas kernels
# ---------------------------------------------------------------------------
def _bilstm_seq_kernel(x_ref, wih_ref, whh_f_ref, whh_b_ref, b_ref, hseq_ref,
                       *, hidden, batch, seq, split_input):
    """Fused bidirectional LSTM layer; emits (2, T*B, H) bf16.

    hseq[0, t*B:(t+1)*B] = forward hidden at time t,
    hseq[1, t*B:(t+1)*B] = backward hidden at time t (written when processed).
    """
    G = 4 * hidden
    xproj = _input_projection(x_ref, wih_ref, b_ref,
                              hidden=hidden, split_input=split_input)  # (T*B, 8H) f32
    whh_f = whh_f_ref[...]
    whh_b = whh_b_ref[...]
    h_f = jnp.zeros((batch, hidden), jnp.float32)
    c_f = jnp.zeros((batch, hidden), jnp.float32)
    h_b = jnp.zeros((batch, hidden), jnp.float32)
    c_b = jnp.zeros((batch, hidden), jnp.float32)

    # Full unroll (T is small & static); see module TODO for the chunked-grid variant.
    for t in range(seq):
        t_rev = seq - 1 - t
        xp_f = xproj[t * batch:(t + 1) * batch, 0:G]
        xp_b = xproj[t_rev * batch:(t_rev + 1) * batch, G:2 * G]
        h_f, c_f = _dir_step(h_f, c_f, xp_f, whh_f, hidden)
        h_b, c_b = _dir_step(h_b, c_b, xp_b, whh_b, hidden)
        hseq_ref[0, t * batch:(t + 1) * batch, :] = h_f.astype(hseq_ref.dtype)
        hseq_ref[1, t_rev * batch:(t_rev + 1) * batch, :] = h_b.astype(hseq_ref.dtype)


def _bilstm_last_fc_kernel(x_ref, wih_ref, whh_f_ref, whh_b_ref, b_ref,
                           fcw_ref, fcb_ref, out_ref,
                           *, hidden, batch, seq, split_input):
    """Last bidirectional LSTM layer fused with the FC head.

    Never materializes the hidden sequence: only h_fwd(T-1) (final carry) and
    h_bwd(T-1) (produced at unrolled step 0) feed the Linear head.
    """
    G = 4 * hidden
    xproj = _input_projection(x_ref, wih_ref, b_ref,
                              hidden=hidden, split_input=split_input)
    whh_f = whh_f_ref[...]
    whh_b = whh_b_ref[...]
    h_f = jnp.zeros((batch, hidden), jnp.float32)
    c_f = jnp.zeros((batch, hidden), jnp.float32)
    h_b = jnp.zeros((batch, hidden), jnp.float32)
    c_b = jnp.zeros((batch, hidden), jnp.float32)
    hb_last = h_b

    for t in range(seq):
        t_rev = seq - 1 - t
        xp_f = xproj[t * batch:(t + 1) * batch, 0:G]
        xp_b = xproj[t_rev * batch:(t_rev + 1) * batch, G:2 * G]
        h_f, c_f = _dir_step(h_f, c_f, xp_f, whh_f, hidden)
        h_b, c_b = _dir_step(h_b, c_b, xp_b, whh_b, hidden)
        if t == 0:
            hb_last = h_b            # backward hidden at time T-1; no per-step select

    fcw = fcw_ref[...]                                                 # (2H, O) bf16
    out_ref[...] = (
        jnp.dot(h_f.astype(jnp.bfloat16), fcw[0:hidden],
                preferred_element_type=jnp.float32)
        + jnp.dot(hb_last.astype(jnp.bfloat16), fcw[hidden:2 * hidden],
                  preferred_element_type=jnp.float32)
        + fcb_ref[...])


# ---------------------------------------------------------------------------
# pallas_call wrappers
# ---------------------------------------------------------------------------
def _full_spec(shape):
    ndim = len(shape)
    return pl.BlockSpec(tuple(shape), lambda *_: (0,) * ndim)


def bilstm_layer_seq(x, w_ih, w_hh_f, w_hh_b, b, *, hidden, batch, seq, split_input):
    G8 = 8 * hidden
    din = w_ih.shape[0]
    kernel = functools.partial(_bilstm_seq_kernel, hidden=hidden, batch=batch,
                               seq=seq, split_input=split_input)
    return pl.pallas_call(
        kernel,
        out_shape=jax.ShapeDtypeStruct((2, seq * batch, hidden), jnp.bfloat16),
        in_specs=[
            _full_spec(x.shape),
            _full_spec((din, G8)),
            _full_spec((hidden, 4 * hidden)),
            _full_spec((hidden, 4 * hidden)),
            _full_spec((1, G8)),
        ],
        out_specs=_full_spec((2, seq * batch, hidden)),
        compiler_params=pltpu.CompilerParams(vmem_limit_bytes=_VMEM_LIMIT_BYTES),
    )(x, w_ih, w_hh_f, w_hh_b, b)


def bilstm_layer_last_fc(x, w_ih, w_hh_f, w_hh_b, b, fc_w, fc_b,
                         *, hidden, batch, seq, split_input):
    G8 = 8 * hidden
    din = w_ih.shape[0]
    out_dim = fc_w.shape[1]
    kernel = functools.partial(_bilstm_last_fc_kernel, hidden=hidden, batch=batch,
                               seq=seq, split_input=split_input)
    return pl.pallas_call(
        kernel,
        out_shape=jax.ShapeDtypeStruct((batch, out_dim), jnp.float32),
        in_specs=[
            _full_spec(x.shape),
            _full_spec((din, G8)),
            _full_spec((hidden, 4 * hidden)),
            _full_spec((hidden, 4 * hidden)),
            _full_spec((1, G8)),
            _full_spec((2 * hidden, out_dim)),
            _full_spec((1, out_dim)),
        ],
        out_specs=_full_spec((batch, out_dim)),
        compiler_params=pltpu.CompilerParams(vmem_limit_bytes=_VMEM_LIMIT_BYTES),
    )(x, w_ih, w_hh_f, w_hh_b, b, fc_w, fc_b)


def bidirectional_lstm_forward(x, params, hidden_dim, num_layers):
    """x: (B, T, D) batch_first, like the PyTorch module. Returns (B, output_dim)."""
    B, T, D = x.shape
    cast = lambda w: w.astype(jnp.bfloat16)      # bf16 MXU operands, f32 accumulation
    # Time-major, flattened rows, bf16 (halves the layer-0 HBM->VMEM DMA).
    inp = jnp.transpose(x, (1, 0, 2)).reshape(T * B, D).astype(jnp.bfloat16)
    split = False
    for layer in range(num_layers - 1):
        p = params["layers"][layer]
        inp = bilstm_layer_seq(inp, cast(p["w_ih"]), cast(p["w_hh_f"]), cast(p["w_hh_b"]),
                               p["b"], hidden=hidden_dim, batch=B, seq=T,
                               split_input=split)
        split = True
        # inter-layer LSTM dropout: identity at eval time
    p = params["layers"][num_layers - 1]
    return bilstm_layer_last_fc(inp, cast(p["w_ih"]), cast(p["w_hh_f"]), cast(p["w_hh_b"]),
                                p["b"], cast(params["fc_w"]), params["fc_b"],
                                hidden=hidden_dim, batch=B, seq=T, split_input=split)


# ---------------------------------------------------------------------------
# Parameters (nn.LSTM / nn.Linear shapes, pre-transposed & direction-packed):
#   w_ih  : (Din, 8H) = [W_ih_f^T | W_ih_b^T]   (gate order i,f,g,o per direction)
#   w_hh_f: (H, 4H)   = W_hh_f^T ;  w_hh_b: (H, 4H) = W_hh_b^T
#   b     : (1, 8H)   = [b_ih_f+b_hh_f | b_ih_b+b_hh_b]
# ---------------------------------------------------------------------------
def init_params(key, input_dim, hidden_dim, num_layers, output_dim):
    params = {"layers": []}
    scale = 1.0 / jnp.sqrt(hidden_dim)

    def u(k, shape, s):
        return jax.random.uniform(k, shape, jnp.float32, -s, s)

    for layer in range(num_layers):
        layer_in = input_dim if layer == 0 else 2 * hidden_dim
        key, kf1, kf2, kf3, kf4, kb1, kb2, kb3, kb4 = jax.random.split(key, 9)
        w_ih_f = u(kf1, (layer_in, 4 * hidden_dim), scale)
        w_hh_f = u(kf2, (hidden_dim, 4 * hidden_dim), scale)
        b_f = u(kf3, (1, 4 * hidden_dim), scale) + u(kf4, (1, 4 * hidden_dim), scale)
        w_ih_b = u(kb1, (layer_in, 4 * hidden_dim), scale)
        w_hh_b = u(kb2, (hidden_dim, 4 * hidden_dim), scale)
        b_b = u(kb3, (1, 4 * hidden_dim), scale) + u(kb4, (1, 4 * hidden_dim), scale)
        params["layers"].append({
            "w_ih": jnp.concatenate([w_ih_f, w_ih_b], axis=1),
            "w_hh_f": w_hh_f,
            "w_hh_b": w_hh_b,
            "b": jnp.concatenate([b_f, b_b], axis=1),
        })

    key, k1, k2 = jax.random.split(key, 3)
    fc_scale = 1.0 / jnp.sqrt(2 * hidden_dim)
    params["fc_w"] = u(k1, (2 * hidden_dim, output_dim), fc_scale)
    params["fc_b"] = u(k2, (1, output_dim), fc_scale)
    return params


# ---------------------------------------------------------------------------
# Pure-JAX f32 reference (matches nn.LSTM bidirectional + out[:, -1, :] @ fc)
# ---------------------------------------------------------------------------
def bidirectional_lstm_reference(x, params, hidden_dim, num_layers):
    B, T, _ = x.shape
    H = hidden_dim
    inp = x
    for layer in range(num_layers):
        p = params["layers"][layer]
        wih_f, wih_b = p["w_ih"][:, :4 * H], p["w_ih"][:, 4 * H:]
        b_f, b_b = p["b"][:, :4 * H], p["b"][:, 4 * H:]
        whh_f, whh_b = p["w_hh_f"], p["w_hh_b"]

        def cell(h, c, x_t, wih, whh, bias):
            gates = x_t @ wih + h @ whh + bias
            i = jax.nn.sigmoid(gates[:, 0 * H:1 * H])
            f = jax.nn.sigmoid(gates[:, 1 * H:2 * H])
            g = jnp.tanh(gates[:, 2 * H:3 * H])
            o = jax.nn.sigmoid(gates[:, 3 * H:4 * H])
            c = f * c + i * g
            return o * jnp.tanh(c), c

        h_f = jnp.zeros((B, H)); c_f = jnp.zeros((B, H))
        h_b = jnp.zeros((B, H)); c_b = jnp.zeros((B, H))
        outs_f = [None] * T
        outs_b = [None] * T
        for t in range(T):
            h_f, c_f = cell(h_f, c_f, inp[:, t], wih_f, whh_f, b_f)
            outs_f[t] = h_f
            tr = T - 1 - t
            h_b, c_b = cell(h_b, c_b, inp[:, tr], wih_b, whh_b, b_b)
            outs_b[tr] = h_b
        inp = jnp.stack(
            [jnp.concatenate([outs_f[t], outs_b[t]], axis=1) for t in range(T)], axis=1)
    return inp[:, -1, :] @ params["fc_w"] + params["fc_b"]


# ---------------------------------------------------------------------------
if __name__ == "__main__":
    input_dim, hidden_dim, num_layers, output_dim = 16, 32, 2, 4
    dropout_rate = 0.2  # identity at eval time
    batch, seq = 2, 8

    key = jax.random.PRNGKey(0)
    key, xk = jax.random.split(key)
    x = jax.random.normal(xk, (batch, seq, input_dim), jnp.float32)
    params = init_params(key, input_dim, hidden_dim, num_layers, output_dim)

    fwd = jax.jit(functools.partial(
        bidirectional_lstm_forward, hidden_dim=hidden_dim, num_layers=num_layers))
    out = fwd(x, params)
    jax.block_until_ready(out)
    assert out.shape == (batch, output_dim)

    ref = bidirectional_lstm_reference(x, params, hidden_dim, num_layers)
    max_err = float(jnp.max(jnp.abs(out - ref)))
    assert max_err < 5e-2, f"mismatch vs f32 reference: {max_err}"
    print("KERNEL_OK")
</pallas_src>

<mosaic_0001>
module attributes {stable_mosaic.version = 11 : i64} {
  func.func @_bilstm_last_fc_kernel(%arg0: memref<2x16x32xbf16, #tpu.memory_space<vmem>>, %arg1: memref<64x256xbf16, #tpu.memory_space<vmem>>, %arg2: memref<32x128xbf16, #tpu.memory_space<vmem>>, %arg3: memref<32x128xbf16, #tpu.memory_space<vmem>>, %arg4: memref<1x256xf32, #tpu.memory_space<vmem>>, %arg5: memref<64x4xbf16, #tpu.memory_space<vmem>>, %arg6: memref<1x4xf32, #tpu.memory_space<vmem>>, %arg7: memref<2x4xf32, #tpu.memory_space<vmem>>) attributes {dimension_semantics = [], scalar_prefetch = 0 : i64, scratch_operands = 0 : i64, tpu.core_type = #tpu.core_type<tc>} {
    %c0 = arith.constant 0 : index
    %c0_0 = arith.constant 0 : index
    %0 = vector.load %arg1[%c0, %c0_0] : memref<64x256xbf16, #tpu.memory_space<vmem>>, vector<64x256xbf16>
    %c0_1 = arith.constant 0 : index
    %c0_2 = arith.constant 0 : index
    %c0_3 = arith.constant 0 : index
    %1 = vector.load %arg0[%c0_1, %c0_2, %c0_3] : memref<2x16x32xbf16, #tpu.memory_space<vmem>>, vector<1x16x32xbf16>
    %2 = vector.shape_cast %1 : vector<1x16x32xbf16> to vector<16x32xbf16>
    %3 = vector.extract_strided_slice %0 {offsets = [0, 0], sizes = [32, 256], strides = [1, 1]} : vector<64x256xbf16> to vector<32x256xbf16>
    %cst = arith.constant dense<0.000000e+00> : vector<16x256xf32>
    %4 = tpu.matmul %2, %3, %cst {dimension_numbers = #tpu.dot_dimension_numbers<[1], [0], [0], [1], [0, 0, 1, 1], [], []>} : vector<16x32xbf16>, vector<32x256xbf16>, vector<16x256xf32> -> vector<16x256xf32>
    %c1 = arith.constant 1 : index
    %c0_4 = arith.constant 0 : index
    %c0_5 = arith.constant 0 : index
    %5 = vector.load %arg0[%c1, %c0_4, %c0_5] : memref<2x16x32xbf16, #tpu.memory_space<vmem>>, vector<1x16x32xbf16>
    %6 = vector.shape_cast %5 : vector<1x16x32xbf16> to vector<16x32xbf16>
    %7 = vector.extract_strided_slice %0 {offsets = [32, 0], sizes = [32, 256], strides = [1, 1]} : vector<64x256xbf16> to vector<32x256xbf16>
    %cst_6 = arith.constant dense<0.000000e+00> : vector<16x256xf32>
    %8 = tpu.matmul %6, %7, %cst_6 {dimension_numbers = #tpu.dot_dimension_numbers<[1], [0], [0], [1], [0, 0, 1, 1], [], []>} : vector<16x32xbf16>, vector<32x256xbf16>, vector<16x256xf32> -> vector<16x256xf32>
    %9 = arith.addf %4, %8 : vector<16x256xf32>
    %c0_7 = arith.constant 0 : index
    %c0_8 = arith.constant 0 : index
    %10 = vector.load %arg4[%c0_7, %c0_8] : memref<1x256xf32, #tpu.memory_space<vmem>>, vector<1x256xf32>
    %11 = vector.broadcast %10 : vector<1x256xf32> to vector<16x256xf32>
    %12 = arith.addf %9, %11 : vector<16x256xf32>
    %c0_9 = arith.constant 0 : index
    %c0_10 = arith.constant 0 : index
    %13 = vector.load %arg2[%c0_9, %c0_10] : memref<32x128xbf16, #tpu.memory_space<vmem>>, vector<32x128xbf16>
    %c0_11 = arith.constant 0 : index
    %c0_12 = arith.constant 0 : index
    %14 = vector.load %arg3[%c0_11, %c0_12] : memref<32x128xbf16, #tpu.memory_space<vmem>>, vector<32x128xbf16>
    %cst_13 = arith.constant 0.000000e+00 : f32
    %15 = vector.broadcast %cst_13 : f32 to vector<2x32xf32>
    %cst_14 = arith.constant 0.000000e+00 : f32
    %16 = vector.broadcast %cst_14 : f32 to vector<2x32xf32>
    %cst_15 = arith.constant 0.000000e+00 : f32
    %17 = vector.broadcast %cst_15 : f32 to vector<2x32xf32>
    %cst_16 = arith.constant 0.000000e+00 : f32
    %18 = vector.broadcast %cst_16 : f32 to vector<2x32xf32>
    %19 = vector.extract_strided_slice %12 {offsets = [0, 0], sizes = [2, 128], strides = [1, 1]} : vector<16x256xf32> to vector<2x128xf32>
    %20 = vector.extract_strided_slice %12 {offsets = [14, 128], sizes = [2, 128], strides = [1, 1]} : vector<16x256xf32> to vector<2x128xf32>
    %21 = arith.truncf %15 : vector<2x32xf32> to vector<2x32xbf16>
    %cst_17 = arith.constant dense<0.000000e+00> : vector<2x128xf32>
    %22 = tpu.matmul %21, %13, %cst_17 {dimension_numbers = #tpu.dot_dimension_numbers<[1], [0], [0], [1], [0, 0, 1, 1], [], []>} : vector<2x32xbf16>, vector<32x128xbf16>, vector<2x128xf32> -> vector<2x128xf32>
    %23 = arith.addf %19, %22 : vector<2x128xf32>
    %24 = vector.extract_strided_slice %23 {offsets = [0, 0], sizes = [2, 32], strides = [1, 1]} : vector<2x128xf32> to vector<2x32xf32>
    %25 = arith.negf %24 : vector<2x32xf32>
    %26 = math.exp %25 : vector<2x32xf32>
    %cst_18 = arith.constant 1.000000e+00 : f32
    %27 = vector.broadcast %cst_18 : f32 to vector<2x32xf32>
    %28 = arith.addf %27, %26 : vector<2x32xf32>
    %29 = arith.divf %27, %28 : vector<2x32xf32>
    %30 = vector.extract_strided_slice %23 {offsets = [0, 32], sizes = [2, 32], strides = [1, 1]} : vector<2x128xf32> to vector<2x32xf32>
    %31 = arith.negf %30 : vector<2x32xf32>
    %32 = math.exp %31 : vector<2x32xf32>
    %cst_19 = arith.constant 1.000000e+00 : f32
    %33 = vector.broadcast %cst_19 : f32 to vector<2x32xf32>
    %34 = arith.addf %33, %32 : vector<2x32xf32>
    %35 = arith.divf %33, %34 : vector<2x32xf32>
    %36 = vector.extract_strided_slice %23 {offsets = [0, 64], sizes = [2, 32], strides = [1, 1]} : vector<2x128xf32> to vector<2x32xf32>
    %37 = math.tanh %36 : vector<2x32xf32>
    %38 = vector.extract_strided_slice %23 {offsets = [0, 96], sizes = [2, 32], strides = [1, 1]} : vector<2x128xf32> to vector<2x32xf32>
    %39 = arith.negf %38 : vector<2x32xf32>
    %40 = math.exp %39 : vector<2x32xf32>
    %cst_20 = arith.constant 1.000000e+00 : f32
    %41 = vector.broadcast %cst_20 : f32 to vector<2x32xf32>
    %42 = arith.addf %41, %40 : vector<2x32xf32>
    %43 = arith.divf %41, %42 : vector<2x32xf32>
    %44 = arith.mulf %35, %16 : vector<2x32xf32>
    %45 = arith.mulf %29, %37 : vector<2x32xf32>
    %46 = arith.addf %44, %45 : vector<2x32xf32>
    %47 = math.tanh %46 : vector<2x32xf32>
    %48 = arith.mulf %43, %47 : vector<2x32xf32>
    %49 = arith.truncf %17 : vector<2x32xf32> to vector<2x32xbf16>
    %cst_21 = arith.constant dense<0.000000e+00> : vector<2x128xf32>
    %50 = tpu.matmul %49, %14, %cst_21 {dimension_numbers = #tpu.dot_dimension_numbers<[1], [0], [0], [1], [0, 0, 1, 1], [], []>} : vector<2x32xbf16>, vector<32x128xbf16>, vector<2x128xf32> -> vector<2x128xf32>
    %51 = arith.addf %20, %50 : vector<2x128xf32>
    %52 = vector.extract_strided_slice %51 {offsets = [0, 0], sizes = [2, 32], strides = [1, 1]} : vector<2x128xf32> to vector<2x32xf32>
    %53 = arith.negf %52 : vector<2x32xf32>
    %54 = math.exp %53 : vector<2x32xf32>
    %cst_22 = arith.constant 1.000000e+00 : f32
    %55 = vector.broadcast %cst_22 : f32 to vector<2x32xf32>
    %56 = arith.addf %55, %54 : vector<2x32xf32>
    %57 = arith.divf %55, %56 : vector<2x32xf32>
    %58 = vector.extract_strided_slice %51 {offsets = [0, 32], sizes = [2, 32], strides = [1, 1]} : vector<2x128xf32> to vector<2x32xf32>
    %59 = arith.negf %58 : vector<2x32xf32>
    %60 = math.exp %59 : vector<2x32xf32>
    %cst_23 = arith.constant 1.000000e+00 : f32
    %61 = vector.broadcast %cst_23 : f32 to vector<2x32xf32>
    %62 = arith.addf %61, %60 : vector<2x32xf32>
    %63 = arith.divf %61, %62 : vector<2x32xf32>
    %64 = vector.extract_strided_slice %51 {offsets = [0, 64], sizes = [2, 32], strides = [1, 1]} : vector<2x128xf32> to vector<2x32xf32>
    %65 = math.tanh %64 : vector<2x32xf32>
    %66 = vector.extract_strided_slice %51 {offsets = [0, 96], sizes = [2, 32], strides = [1, 1]} : vector<2x128xf32> to vector<2x32xf32>
    %67 = arith.negf %66 : vector<2x32xf32>
    %68 = math.exp %67 : vector<2x32xf32>
    %cst_24 = arith.constant 1.000000e+00 : f32
    %69 = vector.broadcast %cst_24 : f32 to vector<2x32xf32>
    %70 = arith.addf %69, %68 : vector<2x32xf32>
    %71 = arith.divf %69, %70 : vector<2x32xf32>
    %72 = arith.mulf %63, %18 : vector<2x32xf32>
    %73 = arith.mulf %57, %65 : vector<2x32xf32>
    %74 = arith.addf %72, %73 : vector<2x32xf32>
    %75 = math.tanh %74 : vector<2x32xf32>
    %76 = arith.mulf %71, %75 : vector<2x32xf32>
    %77 = vector.extract_strided_slice %12 {offsets = [2, 0], sizes = [2, 128], strides = [1, 1]} : vector<16x256xf32> to vector<2x128xf32>
    %78 = arith.truncf %48 : vector<2x32xf32> to vector<2x32xbf16>
    %cst_25 = arith.constant dense<0.000000e+00> : vector<2x128xf32>
    %79 = tpu.matmul %78, %13, %cst_25 {dimension_numbers = #tpu.dot_dimension_numbers<[1], [0], [0], [1], [0, 0, 1, 1], [], []>} : vector<2x32xbf16>, vector<32x128xbf16>, vector<2x128xf32> -> vector<2x128xf32>
    %80 = arith.addf %77, %79 : vector<2x128xf32>
    %81 = vector.extract_strided_slice %80 {offsets = [0, 0], sizes = [2, 32], strides = [1, 1]} : vector<2x128xf32> to vector<2x32xf32>
    %82 = arith.negf %81 : vector<2x32xf32>
    %83 = math.exp %82 : vector<2x32xf32>
    %cst_26 = arith.constant 1.000000e+00 : f32
    %84 = vector.broadcast %cst_26 : f32 to vector<2x32xf32>
    %85 = arith.addf %84, %83 : vector<2x32xf32>
    %86 = arith.divf %84, %85 : vector<2x32xf32>
    %87 = vector.extract_strided_slice %80 {offsets = [0, 32], sizes = [2, 32], strides = [1, 1]} : vector<2x128xf32> to vector<2x32xf32>
    %88 = arith.negf %87 : vector<2x32xf32>
    %89 = math.exp %88 : vector<2x32xf32>
    %cst_27 = arith.constant 1.000000e+00 : f32
    %90 = vector.broadcast %cst_27 : f32 to vector<2x32xf32>
    %91 = arith.addf %90, %89 : vector<2x32xf32>
    %92 = arith.divf %90, %91 : vector<2x32xf32>
    %93 = vector.extract_strided_slice %80 {offsets = [0, 64], sizes = [2, 32], strides = [1, 1]} : vector<2x128xf32> to vector<2x32xf32>
    %94 = math.tanh %93 : vector<2x32xf32>
    %95 = vector.extract_strided_slice %80 {offsets = [0, 96], sizes = [2, 32], strides = [1, 1]} : vector<2x128xf32> to vector<2x32xf32>
    %96 = arith.negf %95 : vector<2x32xf32>
    %97 = math.exp %96 : vector<2x32xf32>
    %cst_28 = arith.constant 1.000000e+00 : f32
    %98 = vector.broadcast %cst_28 : f32 to vector<2x32xf32>
    %99 = arith.addf %98, %97 : vector<2x32xf32>
    %100 = arith.divf %98, %99 : vector<2x32xf32>
    %101 = arith.mulf %92, %46 : vector<2x32xf32>
    %102 = arith.mulf %86, %94 : vector<2x32xf32>
    %103 = arith.addf %101, %102 : vector<2x32xf32>
    %104 = math.tanh %103 : vector<2x32xf32>
    %105 = arith.mulf %100, %104 : vector<2x32xf32>
    %106 = vector.extract_strided_slice %12 {offsets = [4, 0], sizes = [2, 128], strides = [1, 1]} : vector<16x256xf32> to vector<2x128xf32>
    %107 = arith.truncf %105 : vector<2x32xf32> to vector<2x32xbf16>
    %cst_29 = arith.constant dense<0.000000e+00> : vector<2x128xf32>
    %108 = tpu.matmul %107, %13, %cst_29 {dimension_numbers = #tpu.dot_dimension_numbers<[1], [0], [0], [1], [0, 0, 1, 1], [], []>} : vector<2x32xbf16>, vector<32x128xbf16>, vector<2x128xf32> -> vector<2x128xf32>
    %109 = arith.addf %106, %108 : vector<2x128xf32>
    %110 = vector.extract_strided_slice %109 {offsets = [0, 0], sizes = [2, 32], strides = [1, 1]} : vector<2x128xf32> to vector<2x32xf32>
    %111 = arith.negf %110 : vector<2x32xf32>
    %112 = math.exp %111 : vector<2x32xf32>
    %cst_30 = arith.constant 1.000000e+00 : f32
    %113 = vector.broadcast %cst_30 : f32 to vector<2x32xf32>
    %114 = arith.addf %113, %112 : vector<2x32xf32>
    %115 = arith.divf %113, %114 : vector<2x32xf32>
    %116 = vector.extract_strided_slice %109 {offsets = [0, 32], sizes = [2, 32], strides = [1, 1]} : vector<2x128xf32> to vector<2x32xf32>
    %117 = arith.negf %116 : vector<2x32xf32>
    %118 = math.exp %117 : vector<2x32xf32>
    %cst_31 = arith.constant 1.000000e+00 : f32
    %119 = vector.broadcast %cst_31 : f32 to vector<2x32xf32>
    %120 = arith.addf %119, %118 : vector<2x32xf32>
    %121 = arith.divf %119, %120 : vector<2x32xf32>
    %122 = vector.extract_strided_slice %109 {offsets = [0, 64], sizes = [2, 32], strides = [1, 1]} : vector<2x128xf32> to vector<2x32xf32>
    %123 = math.tanh %122 : vector<2x32xf32>
    %124 = vector.extract_strided_slice %109 {offsets = [0, 96], sizes = [2, 32], strides = [1, 1]} : vector<2x128xf32> to vector<2x32xf32>
    %125 = arith.negf %124 : vector<2x32xf32>
    %126 = math.exp %125 : vector<2x32xf32>
    %cst_32 = arith.constant 1.000000e+00 : f32
    %127 = vector.broadcast %cst_32 : f32 to vector<2x32xf32>
    %128 = arith.addf %127, %126 : vector<2x32xf32>
    %129 = arith.divf %127, %128 : vector<2x32xf32>
    %130 = arith.mulf %121, %103 : vector<2x32xf32>
    %131 = arith.mulf %115, %123 : vector<2x32xf32>
    %132 = arith.addf %130, %131 : vector<2x32xf32>
    %133 = math.tanh %132 : vector<2x32xf32>
    %134 = arith.mulf %129, %133 : vector<2x32xf32>
    %135 = vector.extract_strided_slice %12 {offsets = [6, 0], sizes = [2, 128], strides = [1, 1]} : vector<16x256xf32> to vector<2x128xf32>
    %136 = arith.truncf %134 : vector<2x32xf32> to vector<2x32xbf16>
    %cst_33 = arith.constant dense<0.000000e+00> : vector<2x128xf32>
    %137 = tpu.matmul %136, %13, %cst_33 {dimension_numbers = #tpu.dot_dimension_numbers<[1], [0], [0], [1], [0, 0, 1, 1], [], []>} : vector<2x32xbf16>, vector<32x128xbf16>, vector<2x128xf32> -> vector<2x128xf32>
    %138 = arith.addf %135, %137 : vector<2x128xf32>
    %139 = vector.extract_strided_slice %138 {offsets = [0, 0], sizes = [2, 32], strides = [1, 1]} : vector<2x128xf32> to vector<2x32xf32>
    %140 = arith.negf %139 : vector<2x32xf32>
    %141 = math.exp %140 : vector<2x32xf32>
    %cst_34 = arith.constant 1.000000e+00 : f32
    %142 = vector.broadcast %cst_34 : f32 to vector<2x32xf32>
    %143 = arith.addf %142, %141 : vector<2x32xf32>
    %144 = arith.divf %142, %143 : vector<2x32xf32>
    %145 = vector.extract_strided_slice %138 {offsets = [0, 32], sizes = [2, 32], strides = [1, 1]} : vector<2x128xf32> to vector<2x32xf32>
    %146 = arith.negf %145 : vector<2x32xf32>
    %147 = math.exp %146 : vector<2x32xf32>
    %cst_35 = arith.constant 1.000000e+00 : f32
    %148 = vector.broadcast %cst_35 : f32 to vector<2x32xf32>
    %149 = arith.addf %148, %147 : vector<2x32xf32>
    %150 = arith.divf %148, %149 : vector<2x32xf32>
    %151 = vector.extract_strided_slice %138 {offsets = [0, 64], sizes = [2, 32], strides = [1, 1]} : vector<2x128xf32> to vector<2x32xf32>
    %152 = math.tanh %151 : vector<2x32xf32>
    %153 = vector.extract_strided_slice %138 {offsets = [0, 96], sizes = [2, 32], strides = [1, 1]} : vector<2x128xf32> to vector<2x32xf32>
    %154 = arith.negf %153 : vector<2x32xf32>
    %155 = math.exp %154 : vector<2x32xf32>
    %cst_36 = arith.constant 1.000000e+00 : f32
    %156 = vector.broadcast %cst_36 : f32 to vector<2x32xf32>
    %157 = arith.addf %156, %155 : vector<2x32xf32>
    %158 = arith.divf %156, %157 : vector<2x32xf32>
    %159 = arith.mulf %150, %132 : vector<2x32xf32>
    %160 = arith.mulf %144, %152 : vector<2x32xf32>
    %161 = arith.addf %159, %160 : vector<2x32xf32>
    %162 = math.tanh %161 : vector<2x32xf32>
    %163 = arith.mulf %158, %162 : vector<2x32xf32>
    %164 = vector.extract_strided_slice %12 {offsets = [8, 0], sizes = [2, 128], strides = [1, 1]} : vector<16x256xf32> to vector<2x128xf32>
    %165 = arith.truncf %163 : vector<2x32xf32> to vector<2x32xbf16>
    %cst_37 = arith.constant dense<0.000000e+00> : vector<2x128xf32>
    %166 = tpu.matmul %165, %13, %cst_37 {dimension_numbers = #tpu.dot_dimension_numbers<[1], [0], [0], [1], [0, 0, 1, 1], [], []>} : vector<2x32xbf16>, vector<32x128xbf16>, vector<2x128xf32> -> vector<2x128xf32>
    %167 = arith.addf %164, %166 : vector<2x128xf32>
    %168 = vector.extract_strided_slice %167 {offsets = [0, 0], sizes = [2, 32], strides = [1, 1]} : vector<2x128xf32> to vector<2x32xf32>
    %169 = arith.negf %168 : vector<2x32xf32>
    %170 = math.exp %169 : vector<2x32xf32>
    %cst_38 = arith.constant 1.000000e+00 : f32
    %171 = vector.broadcast %cst_38 : f32 to vector<2x32xf32>
    %172 = arith.addf %171, %170 : vector<2x32xf32>
    %173 = arith.divf %171, %172 : vector<2x32xf32>
    %174 = vector.extract_strided_slice %167 {offsets = [0, 32], sizes = [2, 32], strides = [1, 1]} : vector<2x128xf32> to vector<2x32xf32>
    %175 = arith.negf %174 : vector<2x32xf32>
    %176 = math.exp %175 : vector<2x32xf32>
    %cst_39 = arith.constant 1.000000e+00 : f32
    %177 = vector.broadcast %cst_39 : f32 to vector<2x32xf32>
    %178 = arith.addf %177, %176 : vector<2x32xf32>
    %179 = arith.divf %177, %178 : vector<2x32xf32>
    %180 = vector.extract_strided_slice %167 {offsets = [0, 64], sizes = [2, 32], strides = [1, 1]} : vector<2x128xf32> to vector<2x32xf32>
    %181 = math.tanh %180 : vector<2x32xf32>
    %182 = vector.extract_strided_slice %167 {offsets = [0, 96], sizes = [2, 32], strides = [1, 1]} : vector<2x128xf32> to vector<2x32xf32>
    %183 = arith.negf %182 : vector<2x32xf32>
    %184 = math.exp %183 : vector<2x32xf32>
    %cst_40 = arith.constant 1.000000e+00 : f32
    %185 = vector.broadcast %cst_40 : f32 to vector<2x32xf32>
    %186 = arith.addf %185, %184 : vector<2x32xf32>
    %187 = arith.divf %185, %186 : vector<2x32xf32>
    %188 = arith.mulf %179, %161 : vector<2x32xf32>
    %189 = arith.mulf %173, %181 : vector<2x32xf32>
    %190 = arith.addf %188, %189 : vector<2x32xf32>
    %191 = math.tanh %190 : vector<2x32xf32>
    %192 = arith.mulf %187, %191 : vector<2x32xf32>
    %193 = vector.extract_strided_slice %12 {offsets = [10, 0], sizes = [2, 128], strides = [1, 1]} : vector<16x256xf32> to vector<2x128xf32>
    %194 = arith.truncf %192 : vector<2x32xf32> to vector<2x32xbf16>
    %cst_41 = arith.constant dense<0.000000e+00> : vector<2x128xf32>
    %195 = tpu.matmul %194, %13, %cst_41 {dimension_numbers = #tpu.dot_dimension_numbers<[1], [0], [0], [1], [0, 0, 1, 1], [], []>} : vector<2x32xbf16>, vector<32x128xbf16>, vector<2x128xf32> -> vector<2x128xf32>
    %196 = arith.addf %193, %195 : vector<2x128xf32>
    %197 = vector.extract_strided_slice %196 {offsets = [0, 0], sizes = [2, 32], strides = [1, 1]} : vector<2x128xf32> to vector<2x32xf32>
    %198 = arith.negf %197 : vector<2x32xf32>
    %199 = math.exp %198 : vector<2x32xf32>
    %cst_42 = arith.constant 1.000000e+00 : f32
    %200 = vector.broadcast %cst_42 : f32 to vector<2x32xf32>
    %201 = arith.addf %200, %199 : vector<2x32xf32>
    %202 = arith.divf %200, %201 : vector<2x32xf32>
    %203 = vector.extract_strided_slice %196 {offsets = [0, 32], sizes = [2, 32], strides = [1, 1]} : vector<2x128xf32> to vector<2x32xf32>
    %204 = arith.negf %203 : vector<2x32xf32>
    %205 = math.exp %204 : vector<2x32xf32>
    %cst_43 = arith.constant 1.000000e+00 : f32
    %206 = vector.broadcast %cst_43 : f32 to vector<2x32xf32>
    %207 = arith.addf %206, %205 : vector<2x32xf32>
    %208 = arith.divf %206, %207 : vector<2x32xf32>
    %209 = vector.extract_strided_slice %196 {offsets = [0, 64], sizes = [2, 32], strides = [1, 1]} : vector<2x128xf32> to vector<2x32xf32>
    %210 = math.tanh %209 : vector<2x32xf32>
    %211 = vector.extract_strided_slice %196 {offsets = [0, 96], sizes = [2, 32], strides = [1, 1]} : vector<2x128xf32> to vector<2x32xf32>
    %212 = arith.negf %211 : vector<2x32xf32>
    %213 = math.exp %212 : vector<2x32xf32>
    %cst_44 = arith.constant 1.000000e+00 : f32
    %214 = vector.broadcast %cst_44 : f32 to vector<2x32xf32>
    %215 = arith.addf %214, %213 : vector<2x32xf32>
    %216 = arith.divf %214, %215 : vector<2x32xf32>
    %217 = arith.mulf %208, %190 : vector<2x32xf32>
    %218 = arith.mulf %202, %210 : vector<2x32xf32>
    %219 = arith.addf %217, %218 : vector<2x32xf32>
    %220 = math.tanh %219 : vector<2x32xf32>
    %221 = arith.mulf %216, %220 : vector<2x32xf32>
    %222 = vector.extract_strided_slice %12 {offsets = [12, 0], sizes = [2, 128], strides = [1, 1]} : vector<16x256xf32> to vector<2x128xf32>
    %223 = arith.truncf %221 : vector<2x32xf32> to vector<2x32xbf16>
    %cst_45 = arith.constant dense<0.000000e+00> : vector<2x128xf32>
    %224 = tpu.matmul %223, %13, %cst_45 {dimension_numbers = #tpu.dot_dimension_numbers<[1], [0], [0], [1], [0, 0, 1, 1], [], []>} : vector<2x32xbf16>, vector<32x128xbf16>, vector<2x128xf32> -> vector<2x128xf32>
    %225 = arith.addf %222, %224 : vector<2x128xf32>
    %226 = vector.extract_strided_slice %225 {offsets = [0, 0], sizes = [2, 32], strides = [1, 1]} : vector<2x128xf32> to vector<2x32xf32>
    %227 = arith.negf %226 : vector<2x32xf32>
    %228 = math.exp %227 : vector<2x32xf32>
    %cst_46 = arith.constant 1.000000e+00 : f32
    %229 = vector.broadcast %cst_46 : f32 to vector<2x32xf32>
    %230 = arith.addf %229, %228 : vector<2x32xf32>
    %231 = arith.divf %229, %230 : vector<2x32xf32>
    %232 = vector.extract_strided_slice %225 {offsets = [0, 32], sizes = [2, 32], strides = [1, 1]} : vector<2x128xf32> to vector<2x32xf32>
    %233 = arith.negf %232 : vector<2x32xf32>
    %234 = math.exp %233 : vector<2x32xf32>
    %cst_47 = arith.constant 1.000000e+00 : f32
    %235 = vector.broadcast %cst_47 : f32 to vector<2x32xf32>
    %236 = arith.addf %235, %234 : vector<2x32xf32>
    %237 = arith.divf %235, %236 : vector<2x32xf32>
    %238 = vector.extract_strided_slice %225 {offsets = [0, 64], sizes = [2, 32], strides = [1, 1]} : vector<2x128xf32> to vector<2x32xf32>
    %239 = math.tanh %238 : vector<2x32xf32>
    %240 = vector.extract_strided_slice %225 {offsets = [0, 96], sizes = [2, 32], strides = [1, 1]} : vector<2x128xf32> to vector<2x32xf32>
    %241 = arith.negf %240 : vector<2x32xf32>
    %242 = math.exp %241 : vector<2x32xf32>
    %cst_48 = arith.constant 1.000000e+00 : f32
    %243 = vector.broadcast %cst_48 : f32 to vector<2x32xf32>
    %244 = arith.addf %243, %242 : vector<2x32xf32>
    %245 = arith.divf %243, %244 : vector<2x32xf32>
    %246 = arith.mulf %237, %219 : vector<2x32xf32>
    %247 = arith.mulf %231, %239 : vector<2x32xf32>
    %248 = arith.addf %246, %247 : vector<2x32xf32>
    %249 = math.tanh %248 : vector<2x32xf32>
    %250 = arith.mulf %245, %249 : vector<2x32xf32>
    %251 = vector.extract_strided_slice %12 {offsets = [14, 0], sizes = [2, 128], strides = [1, 1]} : vector<16x256xf32> to vector<2x128xf32>
    %252 = arith.truncf %250 : vector<2x32xf32> to vector<2x32xbf16>
    %cst_49 = arith.constant dense<0.000000e+00> : vector<2x128xf32>
    %253 = tpu.matmul %252, %13, %cst_49 {dimension_numbers = #tpu.dot_dimension_numbers<[1], [0], [0], [1], [0, 0, 1, 1], [], []>} : vector<2x32xbf16>, vector<32x128xbf16>, vector<2x128xf32> -> vector<2x128xf32>
    %254 = arith.addf %251, %253 : vector<2x128xf32>
    %255 = vector.extract_strided_slice %254 {offsets = [0, 0], sizes = [2, 32], strides = [1, 1]} : vector<2x128xf32> to vector<2x32xf32>
    %256 = arith.negf %255 : vector<2x32xf32>
    %257 = math.exp %256 : vector<2x32xf32>
    %cst_50 = arith.constant 1.000000e+00 : f32
    %258 = vector.broadcast %cst_50 : f32 to vector<2x32xf32>
    %259 = arith.addf %258, %257 : vector<2x32xf32>
    %260 = arith.divf %258, %259 : vector<2x32xf32>
    %261 = vector.extract_strided_slice %254 {offsets = [0, 32], sizes = [2, 32], strides = [1, 1]} : vector<2x128xf32> to vector<2x32xf32>
    %262 = arith.negf %261 : vector<2x32xf32>
    %263 = math.exp %262 : vector<2x32xf32>
    %cst_51 = arith.constant 1.000000e+00 : f32
    %264 = vector.broadcast %cst_51 : f32 to vector<2x32xf32>
    %265 = arith.addf %264, %263 : vector<2x32xf32>
    %266 = arith.divf %264, %265 : vector<2x32xf32>
    %267 = vector.extract_strided_slice %254 {offsets = [0, 64], sizes = [2, 32], strides = [1, 1]} : vector<2x128xf32> to vector<2x32xf32>
    %268 = math.tanh %267 : vector<2x32xf32>
    %269 = vector.extract_strided_slice %254 {offsets = [0, 96], sizes = [2, 32], strides = [1, 1]} : vector<2x128xf32> to vector<2x32xf32>
    %270 = arith.negf %269 : vector<2x32xf32>
    %271 = math.exp %270 : vector<2x32xf32>
    %cst_52 = arith.constant 1.000000e+00 : f32
    %272 = vector.broadcast %cst_52 : f32 to vector<2x32xf32>
    %273 = arith.addf %272, %271 : vector<2x32xf32>
    %274 = arith.divf %272, %273 : vector<2x32xf32>
    %275 = arith.mulf %266, %248 : vector<2x32xf32>
    %276 = arith.mulf %260, %268 : vector<2x32xf32>
    %277 = arith.addf %275, %276 : vector<2x32xf32>
    %278 = math.tanh %277 : vector<2x32xf32>
    %279 = arith.mulf %274, %278 : vector<2x32xf32>
    %c0_53 = arith.constant 0 : index
    %c0_54 = arith.constant 0 : index
    %280 = vector.load %arg5[%c0_53, %c0_54] : memref<64x4xbf16, #tpu.memory_space<vmem>>, vector<64x4xbf16>
    %281 = arith.truncf %279 : vector<2x32xf32> to vector<2x32xbf16>
    %282 = vector.extract_strided_slice %280 {offsets = [0, 0], sizes = [32, 4], strides = [1, 1]} : vector<64x4xbf16> to vector<32x4xbf16>
    %cst_55 = arith.constant dense<0.000000e+00> : vector<2x4xf32>
    %283 = tpu.matmul %281, %282, %cst_55 {dimension_numbers = #tpu.dot_dimension_numbers<[1], [0], [0], [1], [0, 0, 1, 1], [], []>} : vector<2x32xbf16>, vector<32x4xbf16>, vector<2x4xf32> -> vector<2x4xf32>
    %284 = arith.truncf %76 : vector<2x32xf32> to vector<2x32xbf16>
    %285 = vector.extract_strided_slice %280 {offsets = [32, 0], sizes = [32, 4], strides = [1, 1]} : vector<64x4xbf16> to vector<32x4xbf16>
    %cst_56 = arith.constant dense<0.000000e+00> : vector<2x4xf32>
    %286 = tpu.matmul %284, %285, %cst_56 {dimension_numbers = #tpu.dot_dimension_numbers<[1], [0], [0], [1], [0, 0, 1, 1], [], []>} : vector<2x32xbf16>, vector<32x4xbf16>, vector<2x4xf32> -> vector<2x4xf32>
    %287 = arith.addf %283, %286 : vector<2x4xf32>
    %c0_57 = arith.constant 0 : index
    %c0_58 = arith.constant 0 : index
    %288 = vector.load %arg6[%c0_57, %c0_58] : memref<1x4xf32, #tpu.memory_space<vmem>>, vector<1x4xf32>
    %289 = vector.broadcast %288 : vector<1x4xf32> to vector<2x4xf32>
    %290 = arith.addf %287, %289 : vector<2x4xf32>
    %c0_59 = arith.constant 0 : index
    %c0_60 = arith.constant 0 : index
    %291 = vector.load %arg7[%c0_59, %c0_60] : memref<2x4xf32, #tpu.memory_space<vmem>>, vector<2x4xf32>
    tpu.vector_store %arg7[%c0_59, %c0_60], %290 {strides = array<i32>} : memref<2x4xf32, #tpu.memory_space<vmem>>, vector<2x4xf32>,
    return
  }
}

module attributes {stable_mosaic.version = 11 : i64} {
  func.func @_bilstm_seq_kernel(%arg0: memref<16x16xbf16, #tpu.memory_space<vmem>>, %arg1: memref<16x256xbf16, #tpu.memory_space<vmem>>, %arg2: memref<32x128xbf16, #tpu.memory_space<vmem>>, %arg3: memref<32x128xbf16, #tpu.memory_space<vmem>>, %arg4: memref<1x256xf32, #tpu.memory_space<vmem>>, %arg5: memref<2x16x32xbf16, #tpu.memory_space<vmem>>) attributes {dimension_semantics = [], scalar_prefetch = 0 : i64, scratch_operands = 0 : i64, tpu.core_type = #tpu.core_type<tc>} {
    %c0 = arith.constant 0 : index
    %c0_0 = arith.constant 0 : index
    %0 = vector.load %arg0[%c0, %c0_0] : memref<16x16xbf16, #tpu.memory_space<vmem>>, vector<16x16xbf16>
    %c0_1 = arith.constant 0 : index
    %c0_2 = arith.constant 0 : index
    %1 = vector.load %arg1[%c0_1, %c0_2] : memref<16x256xbf16, #tpu.memory_space<vmem>>, vector<16x256xbf16>
    %cst = arith.constant dense<0.000000e+00> : vector<16x256xf32>
    %2 = tpu.matmul %0, %1, %cst {dimension_numbers = #tpu.dot_dimension_numbers<[1], [0], [0], [1], [0, 0, 1, 1], [], []>} : vector<16x16xbf16>, vector<16x256xbf16>, vector<16x256xf32> -> vector<16x256xf32>
    %c0_3 = arith.constant 0 : index
    %c0_4 = arith.constant 0 : index
    %3 = vector.load %arg4[%c0_3, %c0_4] : memref<1x256xf32, #tpu.memory_space<vmem>>, vector<1x256xf32>
    %4 = vector.broadcast %3 : vector<1x256xf32> to vector<16x256xf32>
    %5 = arith.addf %2, %4 : vector<16x256xf32>
    %c0_5 = arith.constant 0 : index
    %c0_6 = arith.constant 0 : index
    %6 = vector.load %arg2[%c0_5, %c0_6] : memref<32x128xbf16, #tpu.memory_space<vmem>>, vector<32x128xbf16>
    %c0_7 = arith.constant 0 : index
    %c0_8 = arith.constant 0 : index
    %7 = vector.load %arg3[%c0_7, %c0_8] : memref<32x128xbf16, #tpu.memory_space<vmem>>, vector<32x128xbf16>
    %cst_9 = arith.constant 0.000000e+00 : f32
    %8 = vector.broadcast %cst_9 : f32 to vector<2x32xf32>
    %cst_10 = arith.constant 0.000000e+00 : f32
    %9 = vector.broadcast %cst_10 : f32 to vector<2x32xf32>
    %cst_11 = arith.constant 0.000000e+00 : f32
    %10 = vector.broadcast %cst_11 : f32 to vector<2x32xf32>
    %cst_12 = arith.constant 0.000000e+00 : f32
    %11 = vector.broadcast %cst_12 : f32 to vector<2x32xf32>
    %12 = vector.extract_strided_slice %5 {offsets = [0, 0], sizes = [2, 128], strides = [1, 1]} : vector<16x256xf32> to vector<2x128xf32>
    %13 = vector.extract_strided_slice %5 {offsets = [14, 128], sizes = [2, 128], strides = [1, 1]} : vector<16x256xf32> to vector<2x128xf32>
    %14 = arith.truncf %8 : vector<2x32xf32> to vector<2x32xbf16>
    %cst_13 = arith.constant dense<0.000000e+00> : vector<2x128xf32>
    %15 = tpu.matmul %14, %6, %cst_13 {dimension_numbers = #tpu.dot_dimension_numbers<[1], [0], [0], [1], [0, 0, 1, 1], [], []>} : vector<2x32xbf16>, vector<32x128xbf16>, vector<2x128xf32> -> vector<2x128xf32>
    %16 = arith.addf %12, %15 : vector<2x128xf32>
    %17 = vector.extract_strided_slice %16 {offsets = [0, 0], sizes = [2, 32], strides = [1, 1]} : vector<2x128xf32> to vector<2x32xf32>
    %18 = arith.negf %17 : vector<2x32xf32>
    %19 = math.exp %18 : vector<2x32xf32>
    %cst_14 = arith.constant 1.000000e+00 : f32
    %20 = vector.broadcast %cst_14 : f32 to vector<2x32xf32>
    %21 = arith.addf %20, %19 : vector<2x32xf32>
    %22 = arith.divf %20, %21 : vector<2x32xf32>
    %23 = vector.extract_strided_slice %16 {offsets = [0, 32], sizes = [2, 32], strides = [1, 1]} : vector<2x128xf32> to vector<2x32xf32>
    %24 = arith.negf %23 : vector<2x32xf32>
    %25 = math.exp %24 : vector<2x32xf32>
    %cst_15 = arith.constant 1.000000e+00 : f32
    %26 = vector.broadcast %cst_15 : f32 to vector<2x32xf32>
    %27 = arith.addf %26, %25 : vector<2x32xf32>
    %28 = arith.divf %26, %27 : vector<2x32xf32>
    %29 = vector.extract_strided_slice %16 {offsets = [0, 64], sizes = [2, 32], strides = [1, 1]} : vector<2x128xf32> to vector<2x32xf32>
    %30 = math.tanh %29 : vector<2x32xf32>
    %31 = vector.extract_strided_slice %16 {offsets = [0, 96], sizes = [2, 32], strides = [1, 1]} : vector<2x128xf32> to vector<2x32xf32>
    %32 = arith.negf %31 : vector<2x32xf32>
    %33 = math.exp %32 : vector<2x32xf32>
    %cst_16 = arith.constant 1.000000e+00 : f32
    %34 = vector.broadcast %cst_16 : f32 to vector<2x32xf32>
    %35 = arith.addf %34, %33 : vector<2x32xf32>
    %36 = arith.divf %34, %35 : vector<2x32xf32>
    %37 = arith.mulf %28, %9 : vector<2x32xf32>
    %38 = arith.mulf %22, %30 : vector<2x32xf32>
    %39 = arith.addf %37, %38 : vector<2x32xf32>
    %40 = math.tanh %39 : vector<2x32xf32>
    %41 = arith.mulf %36, %40 : vector<2x32xf32>
    %42 = arith.truncf %10 : vector<2x32xf32> to vector<2x32xbf16>
    %cst_17 = arith.constant dense<0.000000e+00> : vector<2x128xf32>
    %43 = tpu.matmul %42, %7, %cst_17 {dimension_numbers = #tpu.dot_dimension_numbers<[1], [0], [0], [1], [0, 0, 1, 1], [], []>} : vector<2x32xbf16>, vector<32x128xbf16>, vector<2x128xf32> -> vector<2x128xf32>
    %44 = arith.addf %13, %43 : vector<2x128xf32>
    %45 = vector.extract_strided_slice %44 {offsets = [0, 0], sizes = [2, 32], strides = [1, 1]} : vector<2x128xf32> to vector<2x32xf32>
    %46 = arith.negf %45 : vector<2x32xf32>
    %47 = math.exp %46 : vector<2x32xf32>
    %cst_18 = arith.constant 1.000000e+00 : f32
    %48 = vector.broadcast %cst_18 : f32 to vector<2x32xf32>
    %49 = arith.addf %48, %47 : vector<2x32xf32>
    %50 = arith.divf %48, %49 : vector<2x32xf32>
    %51 = vector.extract_strided_slice %44 {offsets = [0, 32], sizes = [2, 32], strides = [1, 1]} : vector<2x128xf32> to vector<2x32xf32>
    %52 = arith.negf %51 : vector<2x32xf32>
    %53 = math.exp %52 : vector<2x32xf32>
    %cst_19 = arith.constant 1.000000e+00 : f32
    %54 = vector.broadcast %cst_19 : f32 to vector<2x32xf32>
    %55 = arith.addf %54, %53 : vector<2x32xf32>
    %56 = arith.divf %54, %55 : vector<2x32xf32>
    %57 = vector.extract_strided_slice %44 {offsets = [0, 64], sizes = [2, 32], strides = [1, 1]} : vector<2x128xf32> to vector<2x32xf32>
    %58 = math.tanh %57 : vector<2x32xf32>
    %59 = vector.extract_strided_slice %44 {offsets = [0, 96], sizes = [2, 32], strides = [1, 1]} : vector<2x128xf32> to vector<2x32xf32>
    %60 = arith.negf %59 : vector<2x32xf32>
    %61 = math.exp %60 : vector<2x32xf32>
    %cst_20 = arith.constant 1.000000e+00 : f32
    %62 = vector.broadcast %cst_20 : f32 to vector<2x32xf32>
    %63 = arith.addf %62, %61 : vector<2x32xf32>
    %64 = arith.divf %62, %63 : vector<2x32xf32>
    %65 = arith.mulf %56, %11 : vector<2x32xf32>
    %66 = arith.mulf %50, %58 : vector<2x32xf32>
    %67 = arith.addf %65, %66 : vector<2x32xf32>
    %68 = math.tanh %67 : vector<2x32xf32>
    %69 = arith.mulf %64, %68 : vector<2x32xf32>
    %70 = arith.truncf %41 : vector<2x32xf32> to vector<2x32xbf16>
    %c0_21 = arith.constant 0 : index
    %c0_22 = arith.constant 0 : index
    %c0_23 = arith.constant 0 : index
    %71 = vector.load %arg5[%c0_21, %c0_22, %c0_23] : memref<2x16x32xbf16, #tpu.memory_space<vmem>>, vector<1x2x32xbf16>
    %72 = vector.shape_cast %71 : vector<1x2x32xbf16> to vector<2x32xbf16>
    %73 = vector.shape_cast %70 : vector<2x32xbf16> to vector<1x2x32xbf16>
    tpu.vector_store %arg5[%c0_21, %c0_22, %c0_23], %73 {strides = array<i32>} : memref<2x16x32xbf16, #tpu.memory_space<vmem>>, vector<1x2x32xbf16>,
    %74 = arith.truncf %69 : vector<2x32xf32> to vector<2x32xbf16>
    %c1 = arith.constant 1 : index
    %c14 = arith.constant 14 : index
    %c0_24 = arith.constant 0 : index
    %75 = vector.load %arg5[%c1, %c14, %c0_24] : memref<2x16x32xbf16, #tpu.memory_space<vmem>>, vector<1x2x32xbf16>
    %76 = vector.shape_cast %75 : vector<1x2x32xbf16> to vector<2x32xbf16>
    %77 = vector.shape_cast %74 : vector<2x32xbf16> to vector<1x2x32xbf16>
    tpu.vector_store %arg5[%c1, %c14, %c0_24], %77 {strides = array<i32>} : memref<2x16x32xbf16, #tpu.memory_space<vmem>>, vector<1x2x32xbf16>,
    %78 = vector.extract_strided_slice %5 {offsets = [2, 0], sizes = [2, 128], strides = [1, 1]} : vector<16x256xf32> to vector<2x128xf32>
    %79 = vector.extract_strided_slice %5 {offsets = [12, 128], sizes = [2, 128], strides = [1, 1]} : vector<16x256xf32> to vector<2x128xf32>
    %80 = arith.truncf %41 : vector<2x32xf32> to vector<2x32xbf16>
    %cst_25 = arith.constant dense<0.000000e+00> : vector<2x128xf32>
    %81 = tpu.matmul %80, %6, %cst_25 {dimension_numbers = #tpu.dot_dimension_numbers<[1], [0], [0], [1], [0, 0, 1, 1], [], []>} : vector<2x32xbf16>, vector<32x128xbf16>, vector<2x128xf32> -> vector<2x128xf32>
    %82 = arith.addf %78, %81 : vector<2x128xf32>
    %83 = vector.extract_strided_slice %82 {offsets = [0, 0], sizes = [2, 32], strides = [1, 1]} : vector<2x128xf32> to vector<2x32xf32>
    %84 = arith.negf %83 : vector<2x32xf32>
    %85 = math.exp %84 : vector<2x32xf32>
    %cst_26 = arith.constant 1.000000e+00 : f32
    %86 = vector.broadcast %cst_26 : f32 to vector<2x32xf32>
    %87 = arith.addf %86, %85 : vector<2x32xf32>
    %88 = arith.divf %86, %87 : vector<2x32xf32>
    %89 = vector.extract_strided_slice %82 {offsets = [0, 32], sizes = [2, 32], strides = [1, 1]} : vector<2x128xf32> to vector<2x32xf32>
    %90 = arith.negf %89 : vector<2x32xf32>
    %91 = math.exp %90 : vector<2x32xf32>
    %cst_27 = arith.constant 1.000000e+00 : f32
    %92 = vector.broadcast %cst_27 : f32 to vector<2x32xf32>
    %93 = arith.addf %92, %91 : vector<2x32xf32>
    %94 = arith.divf %92, %93 : vector<2x32xf32>
    %95 = vector.extract_strided_slice %82 {offsets = [0, 64], sizes = [2, 32], strides = [1, 1]} : vector<2x128xf32> to vector<2x32xf32>
    %96 = math.tanh %95 : vector<2x32xf32>
    %97 = vector.extract_strided_slice %82 {offsets = [0, 96], sizes = [2, 32], strides = [1, 1]} : vector<2x128xf32> to vector<2x32xf32>
    %98 = arith.negf %97 : vector<2x32xf32>
    %99 = math.exp %98 : vector<2x32xf32>
    %cst_28 = arith.constant 1.000000e+00 : f32
    %100 = vector.broadcast %cst_28 : f32 to vector<2x32xf32>
    %101 = arith.addf %100, %99 : vector<2x32xf32>
    %102 = arith.divf %100, %101 : vector<2x32xf32>
    %103 = arith.mulf %94, %39 : vector<2x32xf32>
    %104 = arith.mulf %88, %96 : vector<2x32xf32>
    %105 = arith.addf %103, %104 : vector<2x32xf32>
    %106 = math.tanh %105 : vector<2x32xf32>
    %107 = arith.mulf %102, %106 : vector<2x32xf32>
    %108 = arith.truncf %69 : vector<2x32xf32> to vector<2x32xbf16>
    %cst_29 = arith.constant dense<0.000000e+00> : vector<2x128xf32>
    %109 = tpu.matmul %108, %7, %cst_29 {dimension_numbers = #tpu.dot_dimension_numbers<[1], [0], [0], [1], [0, 0, 1, 1], [], []>} : vector<2x32xbf16>, vector<32x128xbf16>, vector<2x128xf32> -> vector<2x128xf32>
    %110 = arith.addf %79, %109 : vector<2x128xf32>
    %111 = vector.extract_strided_slice %110 {offsets = [0, 0], sizes = [2, 32], strides = [1, 1]} : vector<2x128xf32> to vector<2x32xf32>
    %112 = arith.negf %111 : vector<2x32xf32>
    %113 = math.exp %112 : vector<2x32xf32>
    %cst_30 = arith.constant 1.000000e+00 : f32
    %114 = vector.broadcast %cst_30 : f32 to vector<2x32xf32>
    %115 = arith.addf %114, %113 : vector<2x32xf32>
    %116 = arith.divf %114, %115 : vector<2x32xf32>
    %117 = vector.extract_strided_slice %110 {offsets = [0, 32], sizes = [2, 32], strides = [1, 1]} : vector<2x128xf32> to vector<2x32xf32>
    %118 = arith.negf %117 : vector<2x32xf32>
    %119 = math.exp %118 : vector<2x32xf32>
    %cst_31 = arith.constant 1.000000e+00 : f32
    %120 = vector.broadcast %cst_31 : f32 to vector<2x32xf32>
    %121 = arith.addf %120, %119 : vector<2x32xf32>
    %122 = arith.divf %120, %121 : vector<2x32xf32>
    %123 = vector.extract_strided_slice %110 {offsets = [0, 64], sizes = [2, 32], strides = [1, 1]} : vector<2x128xf32> to vector<2x32xf32>
    %124 = math.tanh %123 : vector<2x32xf32>
    %125 = vector.extract_strided_slice %110 {offsets = [0, 96], sizes = [2, 32], strides = [1, 1]} : vector<2x128xf32> to vector<2x32xf32>
    %126 = arith.negf %125 : vector<2x32xf32>
    %127 = math.exp %126 : vector<2x32xf32>
    %cst_32 = arith.constant 1.000000e+00 : f32
    %128 = vector.broadcast %cst_32 : f32 to vector<2x32xf32>
    %129 = arith.addf %128, %127 : vector<2x32xf32>
    %130 = arith.divf %128, %129 : vector<2x32xf32>
    %131 = arith.mulf %122, %67 : vector<2x32xf32>
    %132 = arith.mulf %116, %124 : vector<2x32xf32>
    %133 = arith.addf %131, %132 : vector<2x32xf32>
    %134 = math.tanh %133 : vector<2x32xf32>
    %135 = arith.mulf %130, %134 : vector<2x32xf32>
    %136 = arith.truncf %107 : vector<2x32xf32> to vector<2x32xbf16>
    %c0_33 = arith.constant 0 : index
    %c2 = arith.constant 2 : index
    %c0_34 = arith.constant 0 : index
    %137 = vector.load %arg5[%c0_33, %c2, %c0_34] : memref<2x16x32xbf16, #tpu.memory_space<vmem>>, vector<1x2x32xbf16>
    %138 = vector.shape_cast %137 : vector<1x2x32xbf16> to vector<2x32xbf16>
    %139 = vector.shape_cast %136 : vector<2x32xbf16> to vector<1x2x32xbf16>
    tpu.vector_store %arg5[%c0_33, %c2, %c0_34], %139 {strides = array<i32>} : memref<2x16x32xbf16, #tpu.memory_space<vmem>>, vector<1x2x32xbf16>,
    %140 = arith.truncf %135 : vector<2x32xf32> to vector<2x32xbf16>
    %c1_35 = arith.constant 1 : index
    %c12 = arith.constant 12 : index
    %c0_36 = arith.constant 0 : index
    %141 = vector.load %arg5[%c1_35, %c12, %c0_36] : memref<2x16x32xbf16, #tpu.memory_space<vmem>>, vector<1x2x32xbf16>
    %142 = vector.shape_cast %141 : vector<1x2x32xbf16> to vector<2x32xbf16>
    %143 = vector.shape_cast %140 : vector<2x32xbf16> to vector<1x2x32xbf16>
    tpu.vector_store %arg5[%c1_35, %c12, %c0_36], %143 {strides = array<i32>} : memref<2x16x32xbf16, #tpu.memory_space<vmem>>, vector<1x2x32xbf16>,
    %144 = vector.extract_strided_slice %5 {offsets = [4, 0], sizes = [2, 128], strides = [1, 1]} : vector<16x256xf32> to vector<2x128xf32>
    %145 = vector.extract_strided_slice %5 {offsets = [10, 128], sizes = [2, 128], strides = [1, 1]} : vector<16x256xf32> to vector<2x128xf32>
    %146 = arith.truncf %107 : vector<2x32xf32> to vector<2x32xbf16>
    %cst_37 = arith.constant dense<0.000000e+00> : vector<2x128xf32>
    %147 = tpu.matmul %146, %6, %cst_37 {dimension_numbers = #tpu.dot_dimension_numbers<[1], [0], [0], [1], [0, 0, 1, 1], [], []>} : vector<2x32xbf16>, vector<32x128xbf16>, vector<2x128xf32> -> vector<2x128xf32>
    %148 = arith.addf %144, %147 : vector<2x128xf32>
    %149 = vector.extract_strided_slice %148 {offsets = [0, 0], sizes = [2, 32], strides = [1, 1]} : vector<2x128xf32> to vector<2x32xf32>
    %150 = arith.negf %149 : vector<2x32xf32>
    %151 = math.exp %150 : vector<2x32xf32>
    %cst_38 = arith.constant 1.000000e+00 : f32
    %152 = vector.broadcast %cst_38 : f32 to vector<2x32xf32>
    %153 = arith.addf %152, %151 : vector<2x32xf32>
    %154 = arith.divf %152, %153 : vector<2x32xf32>
    %155 = vector.extract_strided_slice %148 {offsets = [0, 32], sizes = [2, 32], strides = [1, 1]} : vector<2x128xf32> to vector<2x32xf32>
    %156 = arith.negf %155 : vector<2x32xf32>
    %157 = math.exp %156 : vector<2x32xf32>
    %cst_39 = arith.constant 1.000000e+00 : f32
    %158 = vector.broadcast %cst_39 : f32 to vector<2x32xf32>
    %159 = arith.addf %158, %157 : vector<2x32xf32>
    %160 = arith.divf %158, %159 : vector<2x32xf32>
    %161 = vector.extract_strided_slice %148 {offsets = [0, 64], sizes = [2, 32], strides = [1, 1]} : vector<2x128xf32> to vector<2x32xf32>
    %162 = math.tanh %161 : vector<2x32xf32>
    %163 = vector.extract_strided_slice %148 {offsets = [0, 96], sizes = [2, 32], strides = [1, 1]} : vector<2x128xf32> to vector<2x32xf32>
    %164 = arith.negf %163 : vector<2x32xf32>
    %165 = math.exp %164 : vector<2x32xf32>
    %cst_40 = arith.constant 1.000000e+00 : f32
    %166 = vector.broadcast %cst_40 : f32 to vector<2x32xf32>
    %167 = arith.addf %166, %165 : vector<2x32xf32>
    %168 = arith.divf %166, %167 : vector<2x32xf32>
    %169 = arith.mulf %160, %105 : vector<2x32xf32>
    %170 = arith.mulf %154, %162 : vector<2x32xf32>
    %171 = arith.addf %169, %170 : vector<2x32xf32>
    %172 = math.tanh %171 : vector<2x32xf32>
    %173 = arith.mulf %168, %172 : vector<2x32xf32>
    %174 = arith.truncf %135 : vector<2x32xf32> to vector<2x32xbf16>
    %cst_41 = arith.constant dense<0.000000e+00> : vector<2x128xf32>
    %175 = tpu.matmul %174, %7, %cst_41 {dimension_numbers = #tpu.dot_dimension_numbers<[1], [0], [0], [1], [0, 0, 1, 1], [], []>} : vector<2x32xbf16>, vector<32x128xbf16>, vector<2x128xf32> -> vector<2x128xf32>
    %176 = arith.addf %145, %175 : vector<2x128xf32>
    %177 = vector.extract_strided_slice %176 {offsets = [0, 0], sizes = [2, 32], strides = [1, 1]} : vector<2x128xf32> to vector<2x32xf32>
    %178 = arith.negf %177 : vector<2x32xf32>
    %179 = math.exp %178 : vector<2x32xf32>
    %cst_42 = arith.constant 1.000000e+00 : f32
    %180 = vector.broadcast %cst_42 : f32 to vector<2x32xf32>
    %181 = arith.addf %180, %179 : vector<2x32xf32>
    %182 = arith.divf %180, %181 : vector<2x32xf32>
    %183 = vector.extract_strided_slice %176 {offsets = [0, 32], sizes = [2, 32], strides = [1, 1]} : vector<2x128xf32> to vector<2x32xf32>
    %184 = arith.negf %183 : vector<2x32xf32>
    %185 = math.exp %184 : vector<2x32xf32>
    %cst_43 = arith.constant 1.000000e+00 : f32
    %186 = vector.broadcast %cst_43 : f32 to vector<2x32xf32>
    %187 = arith.addf %186, %185 : vector<2x32xf32>
    %188 = arith.divf %186, %187 : vector<2x32xf32>
    %189 = vector.extract_strided_slice %176 {offsets = [0, 64], sizes = [2, 32], strides = [1, 1]} : vector<2x128xf32> to vector<2x32xf32>
    %190 = math.tanh %189 : vector<2x32xf32>
    %191 = vector.extract_strided_slice %176 {offsets = [0, 96], sizes = [2, 32], strides = [1, 1]} : vector<2x128xf32> to vector<2x32xf32>
    %192 = arith.negf %191 : vector<2x32xf32>
    %193 = math.exp %192 : vector<2x32xf32>
    %cst_44 = arith.constant 1.000000e+00 : f32
    %194 = vector.broadcast %cst_44 : f32 to vector<2x32xf32>
    %195 = arith.addf %194, %193 : vector<2x32xf32>
    %196 = arith.divf %194, %195 : vector<2x32xf32>
    %197 = arith.mulf %188, %133 : vector<2x32xf32>
    %198 = arith.mulf %182, %190 : vector<2x32xf32>
    %199 = arith.addf %197, %198 : vector<2x32xf32>
    %200 = math.tanh %199 : vector<2x32xf32>
    %201 = arith.mulf %196, %200 : vector<2x32xf32>
    %202 = arith.truncf %173 : vector<2x32xf32> to vector<2x32xbf16>
    %c0_45 = arith.constant 0 : index
    %c4 = arith.constant 4 : index
    %c0_46 = arith.constant 0 : index
    %203 = vector.load %arg5[%c0_45, %c4, %c0_46] : memref<2x16x32xbf16, #tpu.memory_space<vmem>>, vector<1x2x32xbf16>
    %204 = vector.shape_cast %203 : vector<1x2x32xbf16> to vector<2x32xbf16>
    %205 = vector.shape_cast %202 : vector<2x32xbf16> to vector<1x2x32xbf16>
    tpu.vector_store %arg5[%c0_45, %c4, %c0_46], %205 {strides = array<i32>} : memref<2x16x32xbf16, #tpu.memory_space<vmem>>, vector<1x2x32xbf16>,
    %206 = arith.truncf %201 : vector<2x32xf32> to vector<2x32xbf16>
    %c1_47 = arith.constant 1 : index
    %c10 = arith.constant 10 : index
    %c0_48 = arith.constant 0 : index
    %207 = vector.load %arg5[%c1_47, %c10, %c0_48] : memref<2x16x32xbf16, #tpu.memory_space<vmem>>, vector<1x2x32xbf16>
    %208 = vector.shape_cast %207 : vector<1x2x32xbf16> to vector<2x32xbf16>
    %209 = vector.shape_cast %206 : vector<2x32xbf16> to vector<1x2x32xbf16>
    tpu.vector_store %arg5[%c1_47, %c10, %c0_48], %209 {strides = array<i32>} : memref<2x16x32xbf16, #tpu.memory_space<vmem>>, vector<1x2x32xbf16>,
    %210 = vector.extract_strided_slice %5 {offsets = [6, 0], sizes = [2, 128], strides = [1, 1]} : vector<16x256xf32> to vector<2x128xf32>
    %211 = vector.extract_strided_slice %5 {offsets = [8, 128], sizes = [2, 128], strides = [1, 1]} : vector<16x256xf32> to vector<2x128xf32>
    %212 = arith.truncf %173 : vector<2x32xf32> to vector<2x32xbf16>
    %cst_49 = arith.constant dense<0.000000e+00> : vector<2x128xf32>
    %213 = tpu.matmul %212, %6, %cst_49 {dimension_numbers = #tpu.dot_dimension_numbers<[1], [0], [0], [1], [0, 0, 1, 1], [], []>} : vector<2x32xbf16>, vector<32x128xbf16>, vector<2x128xf32> -> vector<2x128xf32>
    %214 = arith.addf %210, %213 : vector<2x128xf32>
    %215 = vector.extract_strided_slice %214 {offsets = [0, 0], sizes = [2, 32], strides = [1, 1]} : vector<2x128xf32> to vector<2x32xf32>
    %216 = arith.negf %215 : vector<2x32xf32>
    %217 = math.exp %216 : vector<2x32xf32>
    %cst_50 = arith.constant 1.000000e+00 : f32
    %218 = vector.broadcast %cst_50 : f32 to vector<2x32xf32>
    %219 = arith.addf %218, %217 : vector<2x32xf32>
    %220 = arith.divf %218, %219 : vector<2x32xf32>
    %221 = vector.extract_strided_slice %214 {offsets = [0, 32], sizes = [2, 32], strides = [1, 1]} : vector<2x128xf32> to vector<2x32xf32>
    %222 = arith.negf %221 : vector<2x32xf32>
    %223 = math.exp %222 : vector<2x32xf32>
    %cst_51 = arith.constant 1.000000e+00 : f32
    %224 = vector.broadcast %cst_51 : f32 to vector<2x32xf32>
    %225 = arith.addf %224, %223 : vector<2x32xf32>
    %226 = arith.divf %224, %225 : vector<2x32xf32>
    %227 = vector.extract_strided_slice %214 {offsets = [0, 64], sizes = [2, 32], strides = [1, 1]} : vector<2x128xf32> to vector<2x32xf32>
    %228 = math.tanh %227 : vector<2x32xf32>
    %229 = vector.extract_strided_slice %214 {offsets = [0, 96], sizes = [2, 32], strides = [1, 1]} : vector<2x128xf32> to vector<2x32xf32>
    %230 = arith.negf %229 : vector<2x32xf32>
    %231 = math.exp %230 : vector<2x32xf32>
    %cst_52 = arith.constant 1.000000e+00 : f32
    %232 = vector.broadcast %cst_52 : f32 to vector<2x32xf32>
    %233 = arith.addf %232, %231 : vector<2x32xf32>
    %234 = arith.divf %232, %233 : vector<2x32xf32>
    %235 = arith.mulf %226, %171 : vector<2x32xf32>
    %236 = arith.mulf %220, %228 : vector<2x32xf32>
    %237 = arith.addf %235, %236 : vector<2x32xf32>
    %238 = math.tanh %237 : vector<2x32xf32>
    %239 = arith.mulf %234, %238 : vector<2x32xf32>
    %240 = arith.truncf %201 : vector<2x32xf32> to vector<2x32xbf16>
    %cst_53 = arith.constant dense<0.000000e+00> : vector<2x128xf32>
    %241 = tpu.matmul %240, %7, %cst_53 {dimension_numbers = #tpu.dot_dimension_numbers<[1], [0], [0], [1], [0, 0, 1, 1], [], []>} : vector<2x32xbf16>, vector<32x128xbf16>, vector<2x128xf32> -> vector<2x128xf32>
    %242 = arith.addf %211, %241 : vector<2x128xf32>
    %243 = vector.extract_strided_slice %242 {offsets = [0, 0], sizes = [2, 32], strides = [1, 1]} : vector<2x128xf32> to vector<2x32xf32>
    %244 = arith.negf %243 : vector<2x32xf32>
    %245 = math.exp %244 : vector<2x32xf32>
    %cst_54 = arith.constant 1.000000e+00 : f32
    %246 = vector.broadcast %cst_54 : f32 to vector<2x32xf32>
    %247 = arith.addf %246, %245 : vector<2x32xf32>
    %248 = arith.divf %246, %247 : vector<2x32xf32>
    %249 = vector.extract_strided_slice %242 {offsets = [0, 32], sizes = [2, 32], strides = [1, 1]} : vector<2x128xf32> to vector<2x32xf32>
    %250 = arith.negf %249 : vector<2x32xf32>
    %251 = math.exp %250 : vector<2x32xf32>
    %cst_55 = arith.constant 1.000000e+00 : f32
    %252 = vector.broadcast %cst_55 : f32 to vector<2x32xf32>
    %253 = arith.addf %252, %251 : vector<2x32xf32>
    %254 = arith.divf %252, %253 : vector<2x32xf32>
    %255 = vector.extract_strided_slice %242 {offsets = [0, 64], sizes = [2, 32], strides = [1, 1]} : vector<2x128xf32> to vector<2x32xf32>
    %256 = math.tanh %255 : vector<2x32xf32>
    %257 = vector.extract_strided_slice %242 {offsets = [0, 96], sizes = [2, 32], strides = [1, 1]} : vector<2x128xf32> to vector<2x32xf32>
    %258 = arith.negf %257 : vector<2x32xf32>
    %259 = math.exp %258 : vector<2x32xf32>
    %cst_56 = arith.constant 1.000000e+00 : f32
    %260 = vector.broadcast %cst_56 : f32 to vector<2x32xf32>
    %261 = arith.addf %260, %259 : vector<2x32xf32>
    %262 = arith.divf %260, %261 : vector<2x32xf32>
    %263 = arith.mulf %254, %199 : vector<2x32xf32>
    %264 = arith.mulf %248, %256 : vector<2x32xf32>
    %265 = arith.addf %263, %264 : vector<2x32xf32>
    %266 = math.tanh %265 : vector<2x32xf32>
    %267 = arith.mulf %262, %266 : vector<2x32xf32>
    %268 = arith.truncf %239 : vector<2x32xf32> to vector<2x32xbf16>
    %c0_57 = arith.constant 0 : index
    %c6 = arith.constant 6 : index
    %c0_58 = arith.constant 0 : index
    %269 = vector.load %arg5[%c0_57, %c6, %c0_58] : memref<2x16x32xbf16, #tpu.memory_space<vmem>>, vector<1x2x32xbf16>
    %270 = vector.shape_cast %269 : vector<1x2x32xbf16> to vector<2x32xbf16>
    %271 = vector.shape_cast %268 : vector<2x32xbf16> to vector<1x2x32xbf16>
    tpu.vector_store %arg5[%c0_57, %c6, %c0_58], %271 {strides = array<i32>} : memref<2x16x32xbf16, #tpu.memory_space<vmem>>, vector<1x2x32xbf16>,
    %272 = arith.truncf %267 : vector<2x32xf32> to vector<2x32xbf16>
    %c1_59 = arith.constant 1 : index
    %c8 = arith.constant 8 : index
    %c0_60 = arith.constant 0 : index
    %273 = vector.load %arg5[%c1_59, %c8, %c0_60] : memref<2x16x32xbf16, #tpu.memory_space<vmem>>, vector<1x2x32xbf16>
    %274 = vector.shape_cast %273 : vector<1x2x32xbf16> to vector<2x32xbf16>
    %275 = vector.shape_cast %272 : vector<2x32xbf16> to vector<1x2x32xbf16>
    tpu.vector_store %arg5[%c1_59, %c8, %c0_60], %275 {strides = array<i32>} : memref<2x16x32xbf16, #tpu.memory_space<vmem>>, vector<1x2x32xbf16>,
    %276 = vector.extract_strided_slice %5 {offsets = [8, 0], sizes = [2, 128], strides = [1, 1]} : vector<16x256xf32> to vector<2x128xf32>
    %277 = vector.extract_strided_slice %5 {offsets = [6, 128], sizes = [2, 128], strides = [1, 1]} : vector<16x256xf32> to vector<2x128xf32>
    %278 = arith.truncf %239 : vector<2x32xf32> to vector<2x32xbf16>
    %cst_61 = arith.constant dense<0.000000e+00> : vector<2x128xf32>
    %279 = tpu.matmul %278, %6, %cst_61 {dimension_numbers = #tpu.dot_dimension_numbers<[1], [0], [0], [1], [0, 0, 1, 1], [], []>} : vector<2x32xbf16>, vector<32x128xbf16>, vector<2x128xf32> -> vector<2x128xf32>
    %280 = arith.addf %276, %279 : vector<2x128xf32>
    %281 = vector.extract_strided_slice %280 {offsets = [0, 0], sizes = [2, 32], strides = [1, 1]} : vector<2x128xf32> to vector<2x32xf32>
    %282 = arith.negf %281 : vector<2x32xf32>
    %283 = math.exp %282 : vector<2x32xf32>
    %cst_62 = arith.constant 1.000000e+00 : f32
    %284 = vector.broadcast %cst_62 : f32 to vector<2x32xf32>
    %285 = arith.addf %284, %283 : vector<2x32xf32>
    %286 = arith.divf %284, %285 : vector<2x32xf32>
    %287 = vector.extract_strided_slice %280 {offsets = [0, 32], sizes = [2, 32], strides = [1, 1]} : vector<2x128xf32> to vector<2x32xf32>
    %288 = arith.negf %287 : vector<2x32xf32>
    %289 = math.exp %288 : vector<2x32xf32>
    %cst_63 = arith.constant 1.000000e+00 : f32
    %290 = vector.broadcast %cst_63 : f32 to vector<2x32xf32>
    %291 = arith.addf %290, %289 : vector<2x32xf32>
    %292 = arith.divf %290, %291 : vector<2x32xf32>
    %293 = vector.extract_strided_slice %280 {offsets = [0, 64], sizes = [2, 32], strides = [1, 1]} : vector<2x128xf32> to vector<2x32xf32>
    %294 = math.tanh %293 : vector<2x32xf32>
    %295 = vector.extract_strided_slice %280 {offsets = [0, 96], sizes = [2, 32], strides = [1, 1]} : vector<2x128xf32> to vector<2x32xf32>
    %296 = arith.negf %295 : vector<2x32xf32>
    %297 = math.exp %296 : vector<2x32xf32>
    %cst_64 = arith.constant 1.000000e+00 : f32
    %298 = vector.broadcast %cst_64 : f32 to vector<2x32xf32>
    %299 = arith.addf %298, %297 : vector<2x32xf32>
    %300 = arith.divf %298, %299 : vector<2x32xf32>
    %301 = arith.mulf %292, %237 : vector<2x32xf32>
    %302 = arith.mulf %286, %294 : vector<2x32xf32>
    %303 = arith.addf %301, %302 : vector<2x32xf32>
    %304 = math.tanh %303 : vector<2x32xf32>
    %305 = arith.mulf %300, %304 : vector<2x32xf32>
    %306 = arith.truncf %267 : vector<2x32xf32> to vector<2x32xbf16>
    %cst_65 = arith.constant dense<0.000000e+00> : vector<2x128xf32>
    %307 = tpu.matmul %306, %7, %cst_65 {dimension_numbers = #tpu.dot_dimension_numbers<[1], [0], [0], [1], [0, 0, 1, 1], [], []>} : vector<2x32xbf16>, vector<32x128xbf16>, vector<2x128xf32> -> vector<2x128xf32>
    %308 = arith.addf %277, %307 : vector<2x128xf32>
    %309 = vector.extract_strided_slice %308 {offsets = [0, 0], sizes = [2, 32], strides = [1, 1]} : vector<2x128xf32> to vector<2x32xf32>
    %310 = arith.negf %309 : vector<2x32xf32>
    %311 = math.exp %310 : vector<2x32xf32>
    %cst_66 = arith.constant 1.000000e+00 : f32
    %312 = vector.broadcast %cst_66 : f32 to vector<2x32xf32>
    %313 = arith.addf %312, %311 : vector<2x32xf32>
    %314 = arith.divf %312, %313 : vector<2x32xf32>
    %315 = vector.extract_strided_slice %308 {offsets = [0, 32], sizes = [2, 32], strides = [1, 1]} : vector<2x128xf32> to vector<2x32xf32>
    %316 = arith.negf %315 : vector<2x32xf32>
    %317 = math.exp %316 : vector<2x32xf32>
    %cst_67 = arith.constant 1.000000e+00 : f32
    %318 = vector.broadcast %cst_67 : f32 to vector<2x32xf32>
    %319 = arith.addf %318, %317 : vector<2x32xf32>
    %320 = arith.divf %318, %319 : vector<2x32xf32>
    %321 = vector.extract_strided_slice %308 {offsets = [0, 64], sizes = [2, 32], strides = [1, 1]} : vector<2x128xf32> to vector<2x32xf32>
    %322 = math.tanh %321 : vector<2x32xf32>
    %323 = vector.extract_strided_slice %308 {offsets = [0, 96], sizes = [2, 32], strides = [1, 1]} : vector<2x128xf32> to vector<2x32xf32>
    %324 = arith.negf %323 : vector<2x32xf32>
    %325 = math.exp %324 : vector<2x32xf32>
    %cst_68 = arith.constant 1.000000e+00 : f32
    %326 = vector.broadcast %cst_68 : f32 to vector<2x32xf32>
    %327 = arith.addf %326, %325 : vector<2x32xf32>
    %328 = arith.divf %326, %327 : vector<2x32xf32>
    %329 = arith.mulf %320, %265 : vector<2x32xf32>
    %330 = arith.mulf %314, %322 : vector<2x32xf32>
    %331 = arith.addf %329, %330 : vector<2x32xf32>
    %332 = math.tanh %331 : vector<2x32xf32>
    %333 = arith.mulf %328, %332 : vector<2x32xf32>
    %334 = arith.truncf %305 : vector<2x32xf32> to vector<2x32xbf16>
    %c0_69 = arith.constant 0 : index
    %c8_70 = arith.constant 8 : index
    %c0_71 = arith.constant 0 : index
    %335 = vector.load %arg5[%c0_69, %c8_70, %c0_71] : memref<2x16x32xbf16, #tpu.memory_space<vmem>>, vector<1x2x32xbf16>
    %336 = vector.shape_cast %335 : vector<1x2x32xbf16> to vector<2x32xbf16>
    %337 = vector.shape_cast %334 : vector<2x32xbf16> to vector<1x2x32xbf16>
    tpu.vector_store %arg5[%c0_69, %c8_70, %c0_71], %337 {strides = array<i32>} : memref<2x16x32xbf16, #tpu.memory_space<vmem>>, vector<1x2x32xbf16>,
    %338 = arith.truncf %333 : vector<2x32xf32> to vector<2x32xbf16>
    %c1_72 = arith.constant 1 : index
    %c6_73 = arith.constant 6 : index
    %c0_74 = arith.constant 0 : index
    %339 = vector.load %arg5[%c1_72, %c6_73, %c0_74] : memref<2x16x32xbf16, #tpu.memory_space<vmem>>, vector<1x2x32xbf16>
    %340 = vector.shape_cast %339 : vector<1x2x32xbf16> to vector<2x32xbf16>
    %341 = vector.shape_cast %338 : vector<2x32xbf16> to vector<1x2x32xbf16>
    tpu.vector_store %arg5[%c1_72, %c6_73, %c0_74], %341 {strides = array<i32>} : memref<2x16x32xbf16, #tpu.memory_space<vmem>>, vector<1x2x32xbf16>,
    %342 = vector.extract_strided_slice %5 {offsets = [10, 0], sizes = [2, 128], strides = [1, 1]} : vector<16x256xf32> to vector<2x128xf32>
    %343 = vector.extract_strided_slice %5 {offsets = [4, 128], sizes = [2, 128], strides = [1, 1]} : vector<16x256xf32> to vector<2x128xf32>
    %344 = arith.truncf %305 : vector<2x32xf32> to vector<2x32xbf16>
    %cst_75 = arith.constant dense<0.000000e+00> : vector<2x128xf32>
    %345 = tpu.matmul %344, %6, %cst_75 {dimension_numbers = #tpu.dot_dimension_numbers<[1], [0], [0], [1], [0, 0, 1, 1], [], []>} : vector<2x32xbf16>, vector<32x128xbf16>, vector<2x128xf32> -> vector<2x128xf32>
    %346 = arith.addf %342, %345 : vector<2x128xf32>
    %347 = vector.extract_strided_slice %346 {offsets = [0, 0], sizes = [2, 32], strides = [1, 1]} : vector<2x128xf32> to vector<2x32xf32>
    %348 = arith.negf %347 : vector<2x32xf32>
    %349 = math.exp %348 : vector<2x32xf32>
    %cst_76 = arith.constant 1.000000e+00 : f32
    %350 = vector.broadcast %cst_76 : f32 to vector<2x32xf32>
    %351 = arith.addf %350, %349 : vector<2x32xf32>
    %352 = arith.divf %350, %351 : vector<2x32xf32>
    %353 = vector.extract_strided_slice %346 {offsets = [0, 32], sizes = [2, 32], strides = [1, 1]} : vector<2x128xf32> to vector<2x32xf32>
    %354 = arith.negf %353 : vector<2x32xf32>
    %355 = math.exp %354 : vector<2x32xf32>
    %cst_77 = arith.constant 1.000000e+00 : f32
    %356 = vector.broadcast %cst_77 : f32 to vector<2x32xf32>
    %357 = arith.addf %356, %355 : vector<2x32xf32>
    %358 = arith.divf %356, %357 : vector<2x32xf32>
    %359 = vector.extract_strided_slice %346 {offsets = [0, 64], sizes = [2, 32], strides = [1, 1]} : vector<2x128xf32> to vector<2x32xf32>
    %360 = math.tanh %359 : vector<2x32xf32>
    %361 = vector.extract_strided_slice %346 {offsets = [0, 96], sizes = [2, 32], strides = [1, 1]} : vector<2x128xf32> to vector<2x32xf32>
    %362 = arith.negf %361 : vector<2x32xf32>
    %363 = math.exp %362 : vector<2x32xf32>
    %cst_78 = arith.constant 1.000000e+00 : f32
    %364 = vector.broadcast %cst_78 : f32 to vector<2x32xf32>
    %365 = arith.addf %364, %363 : vector<2x32xf32>
    %366 = arith.divf %364, %365 : vector<2x32xf32>
    %367 = arith.mulf %358, %303 : vector<2x32xf32>
    %368 = arith.mulf %352, %360 : vector<2x32xf32>
    %369 = arith.addf %367, %368 : vector<2x32xf32>
    %370 = math.tanh %369 : vector<2x32xf32>
    %371 = arith.mulf %366, %370 : vector<2x32xf32>
    %372 = arith.truncf %333 : vector<2x32xf32> to vector<2x32xbf16>
    %cst_79 = arith.constant dense<0.000000e+00> : vector<2x128xf32>
    %373 = tpu.matmul %372, %7, %cst_79 {dimension_numbers = #tpu.dot_dimension_numbers<[1], [0], [0], [1], [0, 0, 1, 1], [], []>} : vector<2x32xbf16>, vector<32x128xbf16>, vector<2x128xf32> -> vector<2x128xf32>
    %374 = arith.addf %343, %373 : vector<2x128xf32>
    %375 = vector.extract_strided_slice %374 {offsets = [0, 0], sizes = [2, 32], strides = [1, 1]} : vector<2x128xf32> to vector<2x32xf32>
    %376 = arith.negf %375 : vector<2x32xf32>
    %377 = math.exp %376 : vector<2x32xf32>
    %cst_80 = arith.constant 1.000000e+00 : f32
    %378 = vector.broadcast %cst_80 : f32 to vector<2x32xf32>
    %379 = arith.addf %378, %377 : vector<2x32xf32>
    %380 = arith.divf %378, %379 : vector<2x32xf32>
    %381 = vector.extract_strided_slice %374 {offsets = [0, 32], sizes = [2, 32], strides = [1, 1]} : vector<2x128xf32> to vector<2x32xf32>
    %382 = arith.negf %381 : vector<2x32xf32>
    %383 = math.exp %382 : vector<2x32xf32>
    %cst_81 = arith.constant 1.000000e+00 : f32
    %384 = vector.broadcast %cst_81 : f32 to vector<2x32xf32>
    %385 = arith.addf %384, %383 : vector<2x32xf32>
    %386 = arith.divf %384, %385 : vector<2x32xf32>
    %387 = vector.extract_strided_slice %374 {offsets = [0, 64], sizes = [2, 32], strides = [1, 1]} : vector<2x128xf32> to vector<2x32xf32>
    %388 = math.tanh %387 : vector<2x32xf32>
    %389 = vector.extract_strided_slice %374 {offsets = [0, 96], sizes = [2, 32], strides = [1, 1]} : vector<2x128xf32> to vector<2x32xf32>
    %390 = arith.negf %389 : vector<2x32xf32>
    %391 = math.exp %390 : vector<2x32xf32>
    %cst_82 = arith.constant 1.000000e+00 : f32
    %392 = vector.broadcast %cst_82 : f32 to vector<2x32xf32>
    %393 = arith.addf %392, %391 : vector<2x32xf32>
    %394 = arith.divf %392, %393 : vector<2x32xf32>
    %395 = arith.mulf %386, %331 : vector<2x32xf32>
    %396 = arith.mulf %380, %388 : vector<2x32xf32>
    %397 = arith.addf %395, %396 : vector<2x32xf32>
    %398 = math.tanh %397 : vector<2x32xf32>
    %399 = arith.mulf %394, %398 : vector<2x32xf32>
    %400 = arith.truncf %371 : vector<2x32xf32> to vector<2x32xbf16>
    %c0_83 = arith.constant 0 : index
    %c10_84 = arith.constant 10 : index
    %c0_85 = arith.constant 0 : index
    %401 = vector.load %arg5[%c0_83, %c10_84, %c0_85] : memref<2x16x32xbf16, #tpu.memory_space<vmem>>, vector<1x2x32xbf16>
    %402 = vector.shape_cast %401 : vector<1x2x32xbf16> to vector<2x32xbf16>
    %403 = vector.shape_cast %400 : vector<2x32xbf16> to vector<1x2x32xbf16>
    tpu.vector_store %arg5[%c0_83, %c10_84, %c0_85], %403 {strides = array<i32>} : memref<2x16x32xbf16, #tpu.memory_space<vmem>>, vector<1x2x32xbf16>,
    %404 = arith.truncf %399 : vector<2x32xf32> to vector<2x32xbf16>
    %c1_86 = arith.constant 1 : index
    %c4_87 = arith.constant 4 : index
    %c0_88 = arith.constant 0 : index
    %405 = vector.load %arg5[%c1_86, %c4_87, %c0_88] : memref<2x16x32xbf16, #tpu.memory_space<vmem>>, vector<1x2x32xbf16>
    %406 = vector.shape_cast %405 : vector<1x2x32xbf16> to vector<2x32xbf16>
    %407 = vector.shape_cast %404 : vector<2x32xbf16> to vector<1x2x32xbf16>
    tpu.vector_store %arg5[%c1_86, %c4_87, %c0_88], %407 {strides = array<i32>} : memref<2x16x32xbf16, #tpu.memory_space<vmem>>, vector<1x2x32xbf16>,
    %408 = vector.extract_strided_slice %5 {offsets = [12, 0], sizes = [2, 128], strides = [1, 1]} : vector<16x256xf32> to vector<2x128xf32>
    %409 = vector.extract_strided_slice %5 {offsets = [2, 128], sizes = [2, 128], strides = [1, 1]} : vector<16x256xf32> to vector<2x128xf32>
    %410 = arith.truncf %371 : vector<2x32xf32> to vector<2x32xbf16>
    %cst_89 = arith.constant dense<0.000000e+00> : vector<2x128xf32>
    %411 = tpu.matmul %410, %6, %cst_89 {dimension_numbers = #tpu.dot_dimension_numbers<[1], [0], [0], [1], [0, 0, 1, 1], [], []>} : vector<2x32xbf16>, vector<32x128xbf16>, vector<2x128xf32> -> vector<2x128xf32>
    %412 = arith.addf %408, %411 : vector<2x128xf32>
    %413 = vector.extract_strided_slice %412 {offsets = [0, 0], sizes = [2, 32], strides = [1, 1]} : vector<2x128xf32> to vector<2x32xf32>
    %414 = arith.negf %413 : vector<2x32xf32>
    %415 = math.exp %414 : vector<2x32xf32>
    %cst_90 = arith.constant 1.000000e+00 : f32
    %416 = vector.broadcast %cst_90 : f32 to vector<2x32xf32>
    %417 = arith.addf %416, %415 : vector<2x32xf32>
    %418 = arith.divf %416, %417 : vector<2x32xf32>
    %419 = vector.extract_strided_slice %412 {offsets = [0, 32], sizes = [2, 32], strides = [1, 1]} : vector<2x128xf32> to vector<2x32xf32>
    %420 = arith.negf %419 : vector<2x32xf32>
    %421 = math.exp %420 : vector<2x32xf32>
    %cst_91 = arith.constant 1.000000e+00 : f32
    %422 = vector.broadcast %cst_91 : f32 to vector<2x32xf32>
    %423 = arith.addf %422, %421 : vector<2x32xf32>
    %424 = arith.divf %422, %423 : vector<2x32xf32>
    %425 = vector.extract_strided_slice %412 {offsets = [0, 64], sizes = [2, 32], strides = [1, 1]} : vector<2x128xf32> to vector<2x32xf32>
    %426 = math.tanh %425 : vector<2x32xf32>
    %427 = vector.extract_strided_slice %412 {offsets = [0, 96], sizes = [2, 32], strides = [1, 1]} : vector<2x128xf32> to vector<2x32xf32>
    %428 = arith.negf %427 : vector<2x32xf32>
    %429 = math.exp %428 : vector<2x32xf32>
    %cst_92 = arith.constant 1.000000e+00 : f32
    %430 = vector.broadcast %cst_92 : f32 to vector<2x32xf32>
    %431 = arith.addf %430, %429 : vector<2x32xf32>
    %432 = arith.divf %430, %431 : vector<2x32xf32>
    %433 = arith.mulf %424, %369 : vector<2x32xf32>
    %434 = arith.mulf %418, %426 : vector<2x32xf32>
    %435 = arith.addf %433, %434 : vector<2x32xf32>
    %436 = math.tanh %435 : vector<2x32xf32>
    %437 = arith.mulf %432, %436 : vector<2x32xf32>
    %438 = arith.truncf %399 : vector<2x32xf32> to vector<2x32xbf16>
    %cst_93 = arith.constant dense<0.000000e+00> : vector<2x128xf32>
    %439 = tpu.matmul %438, %7, %cst_93 {dimension_numbers = #tpu.dot_dimension_numbers<[1], [0], [0], [1], [0, 0, 1, 1], [], []>} : vector<2x32xbf16>, vector<32x128xbf16>, vector<2x128xf32> -> vector<2x128xf32>
    %440 = arith.addf %409, %439 : vector<2x128xf32>
    %441 = vector.extract_strided_slice %440 {offsets = [0, 0], sizes = [2, 32], strides = [1, 1]} : vector<2x128xf32> to vector<2x32xf32>
    %442 = arith.negf %441 : vector<2x32xf32>
    %443 = math.exp %442 : vector<2x32xf32>
    %cst_94 = arith.constant 1.000000e+00 : f32
    %444 = vector.broadcast %cst_94 : f32 to vector<2x32xf32>
    %445 = arith.addf %444, %443 : vector<2x32xf32>
    %446 = arith.divf %444, %445 : vector<2x32xf32>
    %447 = vector.extract_strided_slice %440 {offsets = [0, 32], sizes = [2, 32], strides = [1, 1]} : vector<2x128xf32> to vector<2x32xf32>
    %448 = arith.negf %447 : vector<2x32xf32>
    %449 = math.exp %448 : vector<2x32xf32>
    %cst_95 = arith.constant 1.000000e+00 : f32
    %450 = vector.broadcast %cst_95 : f32 to vector<2x32xf32>
    %451 = arith.addf %450, %449 : vector<2x32xf32>
    %452 = arith.divf %450, %451 : vector<2x32xf32>
    %453 = vector.extract_strided_slice %440 {offsets = [0, 64], sizes = [2, 32], strides = [1, 1]} : vector<2x128xf32> to vector<2x32xf32>
    %454 = math.tanh %453 : vector<2x32xf32>
    %455 = vector.extract_strided_slice %440 {offsets = [0, 96], sizes = [2, 32], strides = [1, 1]} : vector<2x128xf32> to vector<2x32xf32>
    %456 = arith.negf %455 : vector<2x32xf32>
    %457 = math.exp %456 : vector<2x32xf32>
    %cst_96 = arith.constant 1.000000e+00 : f32
    %458 = vector.broadcast %cst_96 : f32 to vector<2x32xf32>
    %459 = arith.addf %458, %457 : vector<2x32xf32>
    %460 = arith.divf %458, %459 : vector<2x32xf32>
    %461 = arith.mulf %452, %397 : vector<2x32xf32>
    %462 = arith.mulf %446, %454 : vector<2x32xf32>
    %463 = arith.addf %461, %462 : vector<2x32xf32>
    %464 = math.tanh %463 : vector<2x32xf32>
    %465 = arith.mulf %460, %464 : vector<2x32xf32>
    %466 = arith.truncf %437 : vector<2x32xf32> to vector<2x32xbf16>
    %c0_97 = arith.constant 0 : index
    %c12_98 = arith.constant 12 : index
    %c0_99 = arith.constant 0 : index
    %467 = vector.load %arg5[%c0_97, %c12_98, %c0_99] : memref<2x16x32xbf16, #tpu.memory_space<vmem>>, vector<1x2x32xbf16>
    %468 = vector.shape_cast %467 : vector<1x2x32xbf16> to vector<2x32xbf16>
    %469 = vector.shape_cast %466 : vector<2x32xbf16> to vector<1x2x32xbf16>
    tpu.vector_store %arg5[%c0_97, %c12_98, %c0_99], %469 {strides = array<i32>} : memref<2x16x32xbf16, #tpu.memory_space<vmem>>, vector<1x2x32xbf16>,
    %470 = arith.truncf %465 : vector<2x32xf32> to vector<2x32xbf16>
    %c1_100 = arith.constant 1 : index
    %c2_101 = arith.constant 2 : index
    %c0_102 = arith.constant 0 : index
    %471 = vector.load %arg5[%c1_100, %c2_101, %c0_102] : memref<2x16x32xbf16, #tpu.memory_space<vmem>>, vector<1x2x32xbf16>
    %472 = vector.shape_cast %471 : vector<1x2x32xbf16> to vector<2x32xbf16>
    %473 = vector.shape_cast %470 : vector<2x32xbf16> to vector<1x2x32xbf16>
    tpu.vector_store %arg5[%c1_100, %c2_101, %c0_102], %473 {strides = array<i32>} : memref<2x16x32xbf16, #tpu.memory_space<vmem>>, vector<1x2x32xbf16>,
    %474 = vector.extract_strided_slice %5 {offsets = [14, 0], sizes = [2, 128], strides = [1, 1]} : vector<16x256xf32> to vector<2x128xf32>
    %475 = vector.extract_strided_slice %5 {offsets = [0, 128], sizes = [2, 128], strides = [1, 1]} : vector<16x256xf32> to vector<2x128xf32>
    %476 = arith.truncf %437 : vector<2x32xf32> to vector<2x32xbf16>
    %cst_103 = arith.constant dense<0.000000e+00> : vector<2x128xf32>
    %477 = tpu.matmul %476, %6, %cst_103 {dimension_numbers = #tpu.dot_dimension_numbers<[1], [0], [0], [1], [0, 0, 1, 1], [], []>} : vector<2x32xbf16>, vector<32x128xbf16>, vector<2x128xf32> -> vector<2x128xf32>
    %478 = arith.addf %474, %477 : vector<2x128xf32>
    %479 = vector.extract_strided_slice %478 {offsets = [0, 0], sizes = [2, 32], strides = [1, 1]} : vector<2x128xf32> to vector<2x32xf32>
    %480 = arith.negf %479 : vector<2x32xf32>
    %481 = math.exp %480 : vector<2x32xf32>
    %cst_104 = arith.constant 1.000000e+00 : f32
    %482 = vector.broadcast %cst_104 : f32 to vector<2x32xf32>
    %483 = arith.addf %482, %481 : vector<2x32xf32>
    %484 = arith.divf %482, %483 : vector<2x32xf32>
    %485 = vector.extract_strided_slice %478 {offsets = [0, 32], sizes = [2, 32], strides = [1, 1]} : vector<2x128xf32> to vector<2x32xf32>
    %486 = arith.negf %485 : vector<2x32xf32>
    %487 = math.exp %486 : vector<2x32xf32>
    %cst_105 = arith.constant 1.000000e+00 : f32
    %488 = vector.broadcast %cst_105 : f32 to vector<2x32xf32>
    %489 = arith.addf %488, %487 : vector<2x32xf32>
    %490 = arith.divf %488, %489 : vector<2x32xf32>
    %491 = vector.extract_strided_slice %478 {offsets = [0, 64], sizes = [2, 32], strides = [1, 1]} : vector<2x128xf32> to vector<2x32xf32>
    %492 = math.tanh %491 : vector<2x32xf32>
    %493 = vector.extract_strided_slice %478 {offsets = [0, 96], sizes = [2, 32], strides = [1, 1]} : vector<2x128xf32> to vector<2x32xf32>
    %494 = arith.negf %493 : vector<2x32xf32>
    %495 = math.exp %494 : vector<2x32xf32>
    %cst_106 = arith.constant 1.000000e+00 : f32
    %496 = vector.broadcast %cst_106 : f32 to vector<2x32xf32>
    %497 = arith.addf %496, %495 : vector<2x32xf32>
    %498 = arith.divf %496, %497 : vector<2x32xf32>
    %499 = arith.mulf %490, %435 : vector<2x32xf32>
    %500 = arith.mulf %484, %492 : vector<2x32xf32>
    %501 = arith.addf %499, %500 : vector<2x32xf32>
    %502 = math.tanh %501 : vector<2x32xf32>
    %503 = arith.mulf %498, %502 : vector<2x32xf32>
    %504 = arith.truncf %465 : vector<2x32xf32> to vector<2x32xbf16>
    %cst_107 = arith.constant dense<0.000000e+00> : vector<2x128xf32>
    %505 = tpu.matmul %504, %7, %cst_107 {dimension_numbers = #tpu.dot_dimension_numbers<[1], [0], [0], [1], [0, 0, 1, 1], [], []>} : vector<2x32xbf16>, vector<32x128xbf16>, vector<2x128xf32> -> vector<2x128xf32>
    %506 = arith.addf %475, %505 : vector<2x128xf32>
    %507 = vector.extract_strided_slice %506 {offsets = [0, 0], sizes = [2, 32], strides = [1, 1]} : vector<2x128xf32> to vector<2x32xf32>
    %508 = arith.negf %507 : vector<2x32xf32>
    %509 = math.exp %508 : vector<2x32xf32>
    %cst_108 = arith.constant 1.000000e+00 : f32
    %510 = vector.broadcast %cst_108 : f32 to vector<2x32xf32>
    %511 = arith.addf %510, %509 : vector<2x32xf32>
    %512 = arith.divf %510, %511 : vector<2x32xf32>
    %513 = vector.extract_strided_slice %506 {offsets = [0, 32], sizes = [2, 32], strides = [1, 1]} : vector<2x128xf32> to vector<2x32xf32>
    %514 = arith.negf %513 : vector<2x32xf32>
    %515 = math.exp %514 : vector<2x32xf32>
    %cst_109 = arith.constant 1.000000e+00 : f32
    %516 = vector.broadcast %cst_109 : f32 to vector<2x32xf32>
    %517 = arith.addf %516, %515 : vector<2x32xf32>
    %518 = arith.divf %516, %517 : vector<2x32xf32>
    %519 = vector.extract_strided_slice %506 {offsets = [0, 64], sizes = [2, 32], strides = [1, 1]} : vector<2x128xf32> to vector<2x32xf32>
    %520 = math.tanh %519 : vector<2x32xf32>
    %521 = vector.extract_strided_slice %506 {offsets = [0, 96], sizes = [2, 32], strides = [1, 1]} : vector<2x128xf32> to vector<2x32xf32>
    %522 = arith.negf %521 : vector<2x32xf32>
    %523 = math.exp %522 : vector<2x32xf32>
    %cst_110 = arith.constant 1.000000e+00 : f32
    %524 = vector.broadcast %cst_110 : f32 to vector<2x32xf32>
    %525 = arith.addf %524, %523 : vector<2x32xf32>
    %526 = arith.divf %524, %525 : vector<2x32xf32>
    %527 = arith.mulf %518, %463 : vector<2x32xf32>
    %528 = arith.mulf %512, %520 : vector<2x32xf32>
    %529 = arith.addf %527, %528 : vector<2x32xf32>
    %530 = math.tanh %529 : vector<2x32xf32>
    %531 = arith.mulf %526, %530 : vector<2x32xf32>
    %532 = arith.truncf %503 : vector<2x32xf32> to vector<2x32xbf16>
    %c0_111 = arith.constant 0 : index
    %c14_112 = arith.constant 14 : index
    %c0_113 = arith.constant 0 : index
    %533 = vector.load %arg5[%c0_111, %c14_112, %c0_113] : memref<2x16x32xbf16, #tpu.memory_space<vmem>>, vector<1x2x32xbf16>
    %534 = vector.shape_cast %533 : vector<1x2x32xbf16> to vector<2x32xbf16>
    %535 = vector.shape_cast %532 : vector<2x32xbf16> to vector<1x2x32xbf16>
    tpu.vector_store %arg5[%c0_111, %c14_112, %c0_113], %535 {strides = array<i32>} : memref<2x16x32xbf16, #tpu.memory_space<vmem>>, vector<1x2x32xbf16>,
    %536 = arith.truncf %531 : vector<2x32xf32> to vector<2x32xbf16>
    %c1_114 = arith.constant 1 : index
    %c0_115 = arith.constant 0 : index
    %c0_116 = arith.constant 0 : index
    %537 = vector.load %arg5[%c1_114, %c0_115, %c0_116] : memref<2x16x32xbf16, #tpu.memory_space<vmem>>, vector<1x2x32xbf16>
    %538 = vector.shape_cast %537 : vector<1x2x32xbf16> to vector<2x32xbf16>
    %539 = vector.shape_cast %536 : vector<2x32xbf16> to vector<1x2x32xbf16>
    tpu.vector_store %arg5[%c1_114, %c0_115, %c0_116], %539 {strides = array<i32>} : memref<2x16x32xbf16, #tpu.memory_space<vmem>>, vector<1x2x32xbf16>,
    return
  }
}

</mosaic_0001>

<bundles_post_ra>
// kernel: bidirectional_lstm_forward.3
= control target key start
LH: loop header
LB: loop body
LE: loop exit
PB: predicated region body
PF: predicated region fallthrough
CT: control target
= control target key end

     0   :  { %v1351_v2 = vmov 0   ;;  %vm66_vm0 = vcmask 261120   ;;  %v1352_v12 = vmov 0.0   ;;  %vm1353_vm1 = vmmov 0   ;;  %s1596_s0 = inlined_call_operand.vmem [shape: bf16[2,16,32], index: 0, kind: input, shape index: {}]   ;;  %s1597_s1 = inlined_call_operand.vmem [shape: bf16[64,256], index: 1, kind: input, shape index: {}]   ;;  %s1598_s2 = inlined_call_operand.vmem [shape: bf16[32,128], index: 2, kind: input, shape index: {}]   ;;  %s1599_s3 = inlined_call_operand.vmem [shape: bf16[32,128], index: 3, kind: input, shape index: {}]   ;;  %s1600_s4 = inlined_call_operand.vmem [shape: f32[1,256], index: 4, kind: input, shape index: {}]   ;;  %s1601_s5 = inlined_call_operand.vmem [shape: bf16[64,4], index: 5, kind: input, shape index: {}]   ;;  %s1602_s6 = inlined_call_operand.vmem [shape: f32[1,4], index: 6, kind: input, shape index: {}]   ;;  %s1603_s7 = inlined_call_operand.hbm [shape: f32[2,4], index: 7, kind: output, shape index: {}]  }
   0x1   :  { %v1233_v0 = vld [vmem:[%s1597_s1 + $0x24] ss:$8 sps:$4 sm:$0xff]   ;;  %102 = vmatprep.mubr.bf16.mxu0 %v1351_v2  ;;  %172 = vmatprep.mubr.bf16.mxu1 %v1351_v2  ;;  %v1237_v3 = vld [vmem:[%s1597_s1 + $0x20] ss:$8 sps:$4 sm:$0xff]   ;;  %v1239_v5 = vld [vmem:[%s1597_s1 + $0x34] ss:$8 sps:$4 sm:$0xff]  }
   0x2   :  { %v1235_v1 = vld [vmem:[%s1597_s1 + $0x4] ss:$8 sps:$4 sm:$0xff]   ;;  %70 = vmatprep.subr.bf16.mxu0 %v1233_v0  ;;  %v1238_v4 = vld [vmem:[%s1597_s1] ss:$8 sps:$4 sm:$0xff]   ;;  %v1241_v6 = vld [vmem:[%s1597_s1 + $0x14] ss:$8 sps:$4 sm:$0xff]  }
   0x3   :  { %140 = vmatprep.subr.bf16.mxu1 %v1235_v1  ;;  %71 = vmatpush1.bf16.msra.mxu0 %v1237_v3  ;;  %v1243_v7 = vld [vmem:[%s1597_s1 + $0x30] ss:$8 sps:$4 sm:$0xff]   ;;  %v1245_v9 = vld [vmem:[%s1596_s0 + $0x8] sm:$0xff]   ;;  %v1246_v10 = vld [vmem:[%s1596_s0] sm:$0xff]  }
   0x4   :  { %141 = vmatpush1.bf16.msra.mxu1 %v1238_v4  ;;  %72 = vmatprep.subr.bf16.mxu0 %v1239_v5  ;;  %v1244_v8 = vld [vmem:[%s1597_s1 + $0x10] ss:$8 sps:$4 sm:$0xff]   ;;  %v1430_v11 = vld [vmem:[%s1598_s2] sm:$0xff]   ;;  %v1440_v14 = vld [vmem:[%s1598_s2 + $0x8] sm:$0xff]  }
   0x5   :  { %142 = vmatprep.subr.bf16.mxu1 %v1241_v6  ;;  %v1248_v13 = vld [vmem:[%s1599_s3] sm:$0xff]   ;;  %v1250_v15 = vld [vmem:[%s1599_s3 + $0x8] sm:$0xff]  }
   0x7   :  { %73 = vmatpush1.bf16.msra.mxu0 %v1243_v7 }
   0x8   :  { %143 = vmatpush1.bf16.msra.mxu1 %v1244_v8  ;;  %1139 = vmatprep.subr.bf16.mxu0 %v1352_v12 }
   0x9   :  { %1147 = vmatprep.subr.bf16.mxu1 %v1352_v12 }
   0xa   :  { %1072 = vmatmul.mubr.msk.bf16.vlgmr.msra.gmra.mrb[0].mxu0 %vm66_vm0, %v1245_v9 }
   0xb   :  { %1078 = vmatmul.mubr.msk.bf16.vlgmr.msra.gmra.mrb[0].mxu1 %vm66_vm0, %v1246_v10  ;;  %1140 = vmatpush3.bf16.msra.mxu0 %v1430_v11 }
   0xc   :  { %1148 = vmatpush3.bf16.msra.mxu1 %v1248_v13  ;;  %1141 = vmatprep.subr.bf16.mxu0 %v1352_v12 }
   0xd   :  { %1149 = vmatprep.subr.bf16.mxu1 %v1352_v12  ;;  %1143 = vmatprep.mubr.msk.bf16.mxu0 %vm1353_vm1, %v1352_v12 }
   0xe   :  { %1151 = vmatprep.mubr.msk.bf16.mxu1 %vm1353_vm1, %v1352_v12 }
   0xf   :  { %12 = vsyncpa [#allocation3], 0  ;;  %1142 = vmatpush3.bf16.msra.mxu0 %v1440_v14  ;;  %v184_v16 = vlaneseq  ;;  %v182_v19 = vld [vmem:[%s1600_s4] sm:$0x3]  ;;  %s1354_s4 = smov 64   ;;  %s1355_s27 = smov 32  }
  0x10   :  { %1150 = vmatpush3.bf16.msra.mxu1 %v1250_v15  ;;  %1155 = vmatprep.subr.bf16.mxu0 %v1352_v12  ;;  %vm1049_vm2 = vcmask 25600  }
  0x11   :  { %1163 = vmatprep.subr.bf16.mxu1 %v1352_v12  ;;  %v185_v17 = vshrl.u32 %v184_v16, 7 }
  0x12   :  { %1144 = vmatmul.mubr.bf16.vlgmr.msra.gmra.mrb[4].mxu0 %v1351_v2 }
  0x13   :  { %1152 = vmatmul.mubr.bf16.vlgmr.msra.gmra.mrb[4].mxu1 %v1351_v2  ;;  %1156 = vmatpush3.bf16.msra.mxu0 %v1430_v11  ;;  %v190_v18 = vsub.s32 1, %v185_v17  ;;  %v186_v21 = vsub.s32 0, %v185_v17 }
  0x14   :  { %1159 = vmatprep.mubr.msk.bf16.mxu0 %vm1353_vm1, %v1352_v12  ;;  %1157 = vmatprep.subr.bf16.mxu0 %v1352_v12 }
  0x15   :  { %1164 = vmatpush3.bf16.msra.mxu1 %v1430_v11  ;;  %1167 = vmatprep.mubr.msk.bf16.mxu1 %vm1353_vm1, %v1352_v12  ;;  %v191_v20 = vrot.slane %v182_v19, %v190_v18  ;;  %v187_v29 = vrot.slane %v182_v19, %v186_v21 }
  0x16   :  { %1165 = vmatprep.subr.bf16.mxu1 %v1352_v12 }
  0x17   :  { %1158 = vmatpush3.bf16.msra.mxu0 %v1440_v14 }
  0x18   :  { %1171 = vmatprep.subr.bf16.mxu0 %v1352_v12 }
  0x19   :  { %1166 = vmatpush3.bf16.msra.mxu1 %v1440_v14 }
  0x1a   :  { %1179 = vmatprep.subr.bf16.mxu1 %v1352_v12 }
  0xdd   :  { %v104_v22 = vpop.f32.mrb[0].mxu0 }
  0xde   :  { %v174_v23 = vpop.f32.mrb[0].mxu1  ;;  %v106_v25 = vpop.f32.mrb[1].mxu0 }
  0xdf   :  { %v175_v24 = vadd.f32 %v174_v23, %v104_v22  ;;  %v176_v26 = vpop.f32.mrb[1].mxu1  ;;  %v107_v27 = vpop.f32.mrb[2].mxu0 }
  0xe0   :  { %v177_v28 = vpop.f32.mrb[2].mxu1  ;;  %v109_v31 = vpop.f32.mrb[3].mxu0 }
  0xe1   :  { %v178_v30 = vadd.f32 %v177_v28, %v107_v27  ;;  %v179_v32 = vpop.f32.mrb[3].mxu1  ;;  %v1474_v36 = vadd.f32 %v187_v29, %v175_v24 }
  0xe2   :  { %v180_v33 = vadd.f32 %v179_v32, %v109_v31 }
  0xe3   :  { %v1472_v34 = vadd.f32 %v187_v29, %v178_v30 }
  0xe4   :  { %v196_v35 = vadd.f32 %v191_v20, %v180_v33 }
  0xe5   :  { %v254_v37 = vpop.f32.mrb[4].mxu0 }
  0xe6   :  { %v331_v38 = vpop.f32.mrb[4].mxu1  ;;  %v260_v39 = vadd.f32 %v254_v37, %v1474_v36  ;;  %v1145_v41 = vpop.f32.mrb[5].mxu0 }
  0xe7   :  { %v338_v40 = vrot.slane %v331_v38, 2  ;;  %v1153_v42 = vpop.f32.mrb[5].mxu1  ;;  %v257_v43 = vpop.f32.mrb[6].mxu0 }
  0xe8   :  { %v334_v44 = vpop.f32.mrb[6].mxu1  ;;  %1255 = vtanh.f32 %v260_v39  ;;  %v1146_v46 = vpop.f32.mrb[7].mxu0  ;;  %v1081_v49 = vmul.f32 -1.442695, %v260_v39 }
  0xe9   :  { %v1477_v45 = vadd.f32 %v338_v40, %v196_v35  ;;  %v1154_v47 = vpop.f32.mrb[7].mxu1 }
  0xea   :  { %1257 = vpow2.f32 %v1081_v49 }
  0xf2   :  { %v1256_v48 = vpop.eup %1255 }
  0xf3   :  { %270 = vrot.lane.b32.xlu0 %v1256_v48, %s1354_s4 }
  0xf4   :  { %v1258_v50 = vpop.eup %1257 }
  0xf5   :  { %v264_v51 = vadd.f32 1.0, %v1258_v50 }
  0xf7   :  { %1259 = vrcp.f32 %v264_v51 }
 0x101   :  { %v1260_v52 = vpop.eup %1259 }
 0x102   :  { %v268_v55 = vmul.f32 0.0, %v1260_v52 }
 0x165   :  { %v271_v53 = vpop.permute.xlu0 %270 }
 0x166   :  { %v273_v54 = vmul.f32 %v1260_v52, %v271_v53 }
 0x168   :  { %275 = vrot.lane.b32.xlu0 %v273_v54, %s1355_s27 }
 0x1da   :  { %v276_v56 = vpop.permute.xlu0 %275 }
 0x1db   :  { %v278_v57 = vadd.f32 %v276_v56, %v268_v55 }
 0x1dd   :  { %1261 = vtanh.f32 %v278_v57  ;;  %v424_v15 = vrot.slane %v278_v57, 6 }
 0x1e7   :  { %v1262_v58 = vpop.eup %1261 }
 0x1e8   :  { %281 = vrot.lane.b32.xlu1 %v1262_v58, %s1354_s4 }
 0x25a   :  { %v282_v59 = vpop.permute.xlu1 %281 }
 0x25b   :  { %v284_v60 = vmul.f32 %v1260_v52, %v282_v59 }
 0x25d   :  { %v365_v61 = vpack.c.bf16 %v284_v60, %v284_v60 }
 0x25f   :  { %367 = vrot.lane.b32.xlu1 %v365_v61, %s1355_s27 }
 0x2d1   :  { %v368_v62 = vpop.permute.xlu1 %367 }
 0x2d2   :  { %1160 = vmatmul.mubr.msk.bf16.vlgmr.msra.gmra.mrb[8].mxu0 %vm66_vm0, %v368_v62 }
 0x2d3   :  { %1172 = vmatpush3.bf16.msra.mxu0 %v1430_v11  ;;  %1175 = vmatprep.mubr.msk.bf16.mxu0 %vm1353_vm1, %v1352_v12 }
 0x2d4   :  { %1173 = vmatprep.subr.bf16.mxu0 %v1352_v12 }
 0x2d7   :  { %1174 = vmatpush3.bf16.msra.mxu0 %v1440_v14 }
 0x2d8   :  { %1187 = vmatprep.subr.bf16.mxu0 %v1352_v12 }
 0x3a5   :  { %v406_v63 = vpop.f32.mrb[8].mxu0 }
 0x3a6   :  { %v413_v0 = vrot.slane %v406_v63, 6  ;;  %v1161_v1 = vpop.f32.mrb[9].mxu0 }
 0x3a7   :  { %v409_v2 = vpop.f32.mrb[10].mxu0 }
 0x3a8   :  { %v415_v3 = vadd.f32 %v413_v0, %v1474_v36  ;;  %v1162_v4 = vpop.f32.mrb[11].mxu0 }
 0x3aa   :  { %1263 = vtanh.f32 %v415_v3  ;;  %v1086_v6 = vmul.f32 -1.442695, %v415_v3 }
 0x3ac   :  { %1265 = vpow2.f32 %v1086_v6 }
 0x3b4   :  { %v1264_v5 = vpop.eup %1263 }
 0x3b5   :  { %428 = vrot.lane.b32.xlu0 %v1264_v5, %s1354_s4 }
 0x3b6   :  { %v1266_v7 = vpop.eup %1265 }
 0x3b7   :  { %v419_v8 = vadd.f32 1.0, %v1266_v7 }
 0x3b9   :  { %1267 = vrcp.f32 %v419_v8 }
 0x3c3   :  { %v1268_v9 = vpop.eup %1267 }
 0x3c4   :  { %v426_v16 = vmul.f32 %v1268_v9, %v424_v15 }
 0x427   :  { %v429_v10 = vpop.permute.xlu0 %428 }
 0x428   :  { %v431_v13 = vmul.f32 %v1268_v9, %v429_v10 }
 0x42a   :  { %433 = vrot.lane.b32.xlu1 %v431_v13, %s1355_s27 }
 0x49c   :  { %v434_v17 = vpop.permute.xlu1 %433 }
 0x49d   :  { %v436_v18 = vadd.f32 %v434_v17, %v426_v16 }
 0x49f   :  { %1269 = vtanh.f32 %v436_v18  ;;  %v503_v40 = vrot.slane %v436_v18, 6 }
 0x4a9   :  { %v1270_v19 = vpop.eup %1269 }
 0x4aa   :  { %439 = vrot.lane.b32.xlu0 %v1270_v19, %s1354_s4 }
 0x51c   :  { %v440_v20 = vpop.permute.xlu0 %439 }
 0x51d   :  { %v442_v21 = vmul.f32 %v1268_v9, %v440_v20 }
 0x51f   :  { %v443_v22 = vpack.c.bf16 %v442_v21, %v442_v21 }
 0x521   :  { %v445_v23 = vrot.slane %v443_v22, 1 }
 0x523   :  { %446 = vrot.lane.b32.xlu1 %v445_v23, %s1355_s27 }
 0x595   :  { %v447_v24 = vpop.permute.xlu1 %446 }
 0x596   :  { %1168 = vmatmul.mubr.msk.bf16.vlgmr.msra.gmra.mrb[8].mxu1 %vm66_vm0, %v447_v24 }
 0x597   :  { %1180 = vmatpush3.bf16.msra.mxu1 %v1430_v11  ;;  %1183 = vmatprep.mubr.msk.bf16.mxu1 %vm1353_vm1, %v1352_v12 }
 0x598   :  { %1181 = vmatprep.subr.bf16.mxu1 %v1352_v12 }
 0x59b   :  { %1182 = vmatpush3.bf16.msra.mxu1 %v1440_v14 }
 0x59c   :  { %1195 = vmatprep.subr.bf16.mxu1 %v1352_v12 }
 0x669   :  { %v485_v25 = vpop.f32.mrb[8].mxu1 }
 0x66a   :  { %v492_v26 = vrot.slane %v485_v25, 4  ;;  %v1169_v27 = vpop.f32.mrb[9].mxu1 }
 0x66b   :  { %v488_v28 = vpop.f32.mrb[10].mxu1 }
 0x66c   :  { %v494_v29 = vadd.f32 %v492_v26, %v1474_v36  ;;  %v1170_v30 = vpop.f32.mrb[11].mxu1 }
 0x66e   :  { %1271 = vtanh.f32 %v494_v29  ;;  %v1088_v32 = vmul.f32 -1.442695, %v494_v29 }
 0x670   :  { %1273 = vpow2.f32 %v1088_v32 }
 0x678   :  { %v1272_v31 = vpop.eup %1271 }
 0x679   :  { %507 = vrot.lane.b32.xlu0 %v1272_v31, %s1354_s4 }
 0x67a   :  { %v1274_v33 = vpop.eup %1273 }
 0x67b   :  { %v498_v35 = vadd.f32 1.0, %v1274_v33 }
 0x67d   :  { %1275 = vrcp.f32 %v498_v35 }
 0x687   :  { %v1276_v37 = vpop.eup %1275 }
 0x688   :  { %v505_v41 = vmul.f32 %v1276_v37, %v503_v40 }
 0x6eb   :  { %v508_v38 = vpop.permute.xlu0 %507 }
 0x6ec   :  { %v510_v39 = vmul.f32 %v1276_v37, %v508_v38 }
 0x6ee   :  { %512 = vrot.lane.b32.xlu1 %v510_v39, %s1355_s27 }
 0x760   :  { %v513_v42 = vpop.permute.xlu1 %512 }
 0x761   :  { %v515_v43 = vadd.f32 %v513_v42, %v505_v41 }
 0x763   :  { %1277 = vtanh.f32 %v515_v43  ;;  %v582_v0 = vrot.slane %v515_v43, 6 }
 0x76d   :  { %v1278_v44 = vpop.eup %1277 }
 0x76e   :  { %518 = vrot.lane.b32.xlu0 %v1278_v44, %s1354_s4 }
 0x7e0   :  { %v519_v46 = vpop.permute.xlu0 %518 }
 0x7e1   :  { %v521_v47 = vmul.f32 %v1276_v37, %v519_v46 }
 0x7e3   :  { %v522_v48 = vpack.c.bf16 %v521_v47, %v521_v47 }
 0x7e5   :  { %v524_v49 = vrot.slane %v522_v48, 2 }
 0x7e7   :  { %525 = vrot.lane.b32.xlu1 %v524_v49, %s1355_s27 }
 0x859   :  { %v526_v50 = vpop.permute.xlu1 %525 }
 0x85a   :  { %1176 = vmatmul.mubr.msk.bf16.vlgmr.msra.gmra.mrb[12].mxu0 %vm66_vm0, %v526_v50 }
 0x85b   :  { %1188 = vmatpush3.bf16.msra.mxu0 %v1430_v11  ;;  %1191 = vmatprep.mubr.msk.bf16.mxu0 %vm1353_vm1, %v1352_v12 }
 0x85c   :  { %1189 = vmatprep.subr.bf16.mxu0 %v1352_v12 }
 0x85f   :  { %1190 = vmatpush3.bf16.msra.mxu0 %v1440_v14 }
 0x860   :  { %1203 = vmatprep.subr.bf16.mxu0 %v1352_v12 }
 0x92d   :  { %v564_v51 = vpop.f32.mrb[12].mxu0 }
 0x92e   :  { %v571_v52 = vrot.slane %v564_v51, 2  ;;  %v1177_v53 = vpop.f32.mrb[13].mxu0 }
 0x92f   :  { %v567_v54 = vpop.f32.mrb[14].mxu0 }
 0x930   :  { %v573_v55 = vadd.f32 %v571_v52, %v1474_v36  ;;  %v1178_v56 = vpop.f32.mrb[15].mxu0 }
 0x932   :  { %1279 = vtanh.f32 %v573_v55  ;;  %v1090_v58 = vmul.f32 -1.442695, %v573_v55 }
 0x934   :  { %1281 = vpow2.f32 %v1090_v58 }
 0x93c   :  { %v1280_v57 = vpop.eup %1279 }
 0x93d   :  { %586 = vrot.lane.b32.xlu0 %v1280_v57, %s1354_s4 }
 0x93e   :  { %v1282_v59 = vpop.eup %1281 }
 0x93f   :  { %v577_v60 = vadd.f32 1.0, %v1282_v59 }
 0x941   :  { %1283 = vrcp.f32 %v577_v60 }
 0x94b   :  { %v1284_v61 = vpop.eup %1283 }
 0x94c   :  { %v584_v1 = vmul.f32 %v1284_v61, %v582_v0 }
 0x9af   :  { %v587_v62 = vpop.permute.xlu0 %586 }
 0x9b0   :  { %v589_v63 = vmul.f32 %v1284_v61, %v587_v62 }
 0x9b2   :  { %591 = vrot.lane.b32.xlu1 %v589_v63, %s1355_s27 }
 0xa24   :  { %v592_v2 = vpop.permute.xlu1 %591 }
 0xa25   :  { %v594_v3 = vadd.f32 %v592_v2, %v584_v1 }
 0xa27   :  { %1285 = vtanh.f32 %v594_v3  ;;  %v658_v24 = vrot.slane %v594_v3, 6 }
 0xa31   :  { %v1286_v36 = vpop.eup %1285 }
 0xa32   :  { %597 = vrot.lane.b32.xlu0 %v1286_v36, %s1354_s4 }
 0xaa4   :  { %v598_v4 = vpop.permute.xlu0 %597 }
 0xaa5   :  { %v600_v5 = vmul.f32 %v1284_v61, %v598_v4 }
 0xaa7   :  { %v601_v6 = vpack.c.bf16 %v600_v5, %v600_v5 }
 0xaa9   :  { %v603_v7 = vrot.slane %v601_v6, 3 }
 0xaab   :  { %604 = vrot.lane.b32.xlu1 %v603_v7, %s1355_s27 }
 0xb1d   :  { %v605_v8 = vpop.permute.xlu1 %604 }
 0xb1e   :  { %1184 = vmatmul.mubr.msk.bf16.vlgmr.msra.gmra.mrb[12].mxu1 %vm66_vm0, %v605_v8 }
 0xb1f   :  { %1196 = vmatpush3.bf16.msra.mxu1 %v1430_v11  ;;  %1199 = vmatprep.mubr.msk.bf16.mxu1 %vm1353_vm1, %v1352_v12 }
 0xb20   :  { %1197 = vmatprep.subr.bf16.mxu1 %v1352_v12 }
 0xb23   :  { %1198 = vmatpush3.bf16.msra.mxu1 %v1440_v14 }
 0xb24   :  { %1211 = vmatprep.subr.bf16.mxu1 %v1352_v12 }
 0xbf1   :  { %v643_v9 = vpop.f32.mrb[12].mxu1 }
 0xbf2   :  { %v649_v10 = vadd.f32 %v643_v9, %v1472_v34  ;;  %v1185_v13 = vpop.f32.mrb[13].mxu1 }
 0xbf3   :  { %v646_v15 = vpop.f32.mrb[14].mxu1  ;;  %v1084_v13 = vmul.f32 -1.442695, %v1477_v45 }
 0xbf4   :  { %1287 = vtanh.f32 %v649_v10  ;;  %v1186_v16 = vpop.f32.mrb[15].mxu1  ;;  %v1092_v18 = vmul.f32 -1.442695, %v649_v10 }
 0xbf6   :  { %1289 = vpow2.f32 %v1092_v18 }
 0xbfe   :  { %v1288_v17 = vpop.eup %1287 }
 0xbff   :  { %662 = vrot.lane.b32.xlu0 %v1288_v17, %s1354_s4 }
 0xc00   :  { %v1290_v19 = vpop.eup %1289 }
 0xc01   :  { %v653_v20 = vadd.f32 1.0, %v1290_v19 }
 0xc03   :  { %1291 = vrcp.f32 %v653_v20 }
 0xc0d   :  { %v1292_v21 = vpop.eup %1291 }
 0xc0e   :  { %v660_v25 = vmul.f32 %v1292_v21, %v658_v24 }
 0xc71   :  { %v663_v22 = vpop.permute.xlu0 %662 }
 0xc72   :  { %v665_v23 = vmul.f32 %v1292_v21, %v663_v22 }
 0xc74   :  { %667 = vrot.lane.b32.xlu1 %v665_v23, %s1355_s27 }
 0xce6   :  { %v668_v26 = vpop.permute.xlu1 %667 }
 0xce7   :  { %v670_v27 = vadd.f32 %v668_v26, %v660_v25 }
 0xce9   :  { %1293 = vtanh.f32 %v670_v27  ;;  %v736_v47 = vrot.slane %v670_v27, 6 }
 0xcf3   :  { %v1294_v28 = vpop.eup %1293 }
 0xcf4   :  { %673 = vrot.lane.b32.xlu0 %v1294_v28, %s1354_s4  ;;  %v1251_v28 = vld [vmem:[%s1601_s5 + $0x10] sm:$0xff]  }
 0xd66   :  { %v674_v29 = vpop.permute.xlu0 %673 }
 0xd67   :  { %v676_v30 = vmul.f32 %v1292_v21, %v674_v29  ;;  %v1252_v29 = vld [vmem:[%s1601_s5 + $0x18] sm:$0xff]  }
 0xd69   :  { %v677_v31 = vpack.c.bf16 %v676_v30, %v676_v30 }
 0xd6b   :  { %679 = vrot.lane.b32.xlu1 %v677_v31, %s1355_s27 }
 0xddd   :  { %v680_v32 = vpop.permute.xlu1 %679 }
 0xdde   :  { %1192 = vmatmul.mubr.msk.bf16.vlgmr.msra.gmra.mrb[16].mxu0 %vm66_vm0, %v680_v32 }
 0xddf   :  { %1204 = vmatpush3.bf16.msra.mxu0 %v1430_v11  ;;  %1207 = vmatprep.mubr.msk.bf16.mxu0 %vm1353_vm1, %v1352_v12 }
 0xde0   :  { %1205 = vmatprep.subr.bf16.mxu0 %v1352_v12 }
 0xde3   :  { %1206 = vmatpush3.bf16.msra.mxu0 %v1440_v14 }
 0xde4   :  { %1219 = vmatprep.subr.bf16.mxu0 %v1352_v12 }
 0xeb1   :  { %v718_v33 = vpop.f32.mrb[16].mxu0 }
 0xeb2   :  { %v725_v35 = vrot.slane %v718_v33, 6  ;;  %v1193_v37 = vpop.f32.mrb[17].mxu0 }
 0xeb3   :  { %v721_v38 = vpop.f32.mrb[18].mxu0 }
 0xeb4   :  { %v727_v39 = vadd.f32 %v725_v35, %v1472_v34  ;;  %v1194_v40 = vpop.f32.mrb[19].mxu0 }
 0xeb6   :  { %1295 = vtanh.f32 %v727_v39  ;;  %v1094_v11 = vmul.f32 -1.442695, %v727_v39 }
 0xeb8   :  { %1297 = vpow2.f32 %v1094_v11 }
 0xec0   :  { %v1296_v41 = vpop.eup %1295 }
 0xec1   :  { %740 = vrot.lane.b32.xlu0 %v1296_v41, %s1354_s4 }
 0xec2   :  { %v1298_v42 = vpop.eup %1297 }
 0xec3   :  { %v731_v43 = vadd.f32 1.0, %v1298_v42 }
 0xec5   :  { %1299 = vrcp.f32 %v731_v43 }
 0xecf   :  { %v1300_v44 = vpop.eup %1299 }
 0xed0   :  { %v738_v48 = vmul.f32 %v1300_v44, %v736_v47 }
 0xf33   :  { %v741_v14 = vpop.permute.xlu0 %740 }
 0xf34   :  { %v743_v46 = vmul.f32 %v1300_v44, %v741_v14 }
 0xf36   :  { %745 = vrot.lane.b32.xlu1 %v743_v46, %s1355_s27 }
 0xfa8   :  { %v746_v49 = vpop.permute.xlu1 %745 }
 0xfa9   :  { %v748_v50 = vadd.f32 %v746_v49, %v738_v48 }
 0xfab   :  { %1301 = vtanh.f32 %v748_v50  ;;  %v815_v5 = vrot.slane %v748_v50, 6 }
 0xfb5   :  { %v1302_v51 = vpop.eup %1301 }
 0xfb6   :  { %751 = vrot.lane.b32.xlu0 %v1302_v51, %s1354_s4 }
0x1028   :  { %v752_v52 = vpop.permute.xlu0 %751 }
0x1029   :  { %v754_v53 = vmul.f32 %v1300_v44, %v752_v52 }
0x102b   :  { %v755_v54 = vpack.c.bf16 %v754_v53, %v754_v53 }
0x102d   :  { %v757_v55 = vrot.slane %v755_v54, 1 }
0x102f   :  { %758 = vrot.lane.b32.xlu1 %v757_v55, %s1355_s27 }
0x10a1   :  { %v759_v56 = vpop.permute.xlu1 %758 }
0x10a2   :  { %1200 = vmatmul.mubr.msk.bf16.vlgmr.msra.gmra.mrb[16].mxu1 %vm66_vm0, %v759_v56  ;;  %v1253_v56 = vld [vmem:[%s1601_s5] sm:$0xff]  }
0x10a3   :  { %1215 = vmatprep.mubr.msk.bf16.mxu1 %vm1353_vm1, %v1352_v12  ;;  %1212 = vmatpush3.bf16.msra.mxu1 %v1251_v28 }
0x10a4   :  { %1213 = vmatprep.subr.bf16.mxu1 %v1352_v12 }
0x10a7   :  { %1214 = vmatpush3.bf16.msra.mxu1 %v1252_v29 }
0x1175   :  { %v797_v57 = vpop.f32.mrb[16].mxu1 }
0x1176   :  { %v804_v58 = vrot.slane %v797_v57, 4  ;;  %v1201_v59 = vpop.f32.mrb[17].mxu1  ;;  %v1254_v57 = vld [vmem:[%s1601_s5 + $0x8] sm:$0xff]   ;;  %s1356_s5 = smov [#allocation2]  }
0x1177   :  { %v800_v60 = vpop.f32.mrb[18].mxu1  ;;  %s1057_s15 = sshll.u32 %s1356_s5, 4  ;;  %s1058_s15 = int_to_ptr.vmem [resolvable:$true] %s1057_s15 }
0x1178   :  { %v806_v61 = vadd.f32 %v804_v58, %v1472_v34  ;;  %v1202_v62 = vpop.f32.mrb[19].mxu1  ;;  %s1327_s16 = scalar_lea.vmem %s1058_s15, 32  ;;  %p1332_p1 = scmp.lt.s32.totalorder %s1058_s15, %s1058_s15 }
0x1179   :  { %p1328_p0 = scmp.ne.s32.totalorder %s1058_s15, %s1327_s16  ;;  %p1333_p2 = scmp.lt.s32.totalorder %s1327_s16, %s1327_s16 }
0x117a   :  { %1303 = vtanh.f32 %v806_v61  ;;  %v1096_v0 = vmul.f32 -1.442695, %v806_v61 }
0x117b   :  { %p1334_p3 = por %p1333_p2, %p1332_p1 }
0x117c   :  { %1305 = vpow2.f32 %v1096_v0 }
0x117d   :  { %p1335_p4 = pnand %p1334_p3, %p1328_p0 }
0x1184   :  { %v1304_v63 = vpop.eup %1303 }
0x1185   :  { %819 = vrot.lane.b32.xlu0 %v1304_v63, %s1354_s4 }
0x1186   :  { %v1306_v1 = vpop.eup %1305 }
0x1187   :  { %v810_v2 = vadd.f32 1.0, %v1306_v1  ;;  %v1105_v1 = vld [vmem:[%s1602_s6] ss:$0 sm:$0xff] }
0x1189   :  { %1307 = vrcp.f32 %v810_v2 }
0x1193   :  { %v1308_v3 = vpop.eup %1307 }
0x1194   :  { %v817_v6 = vmul.f32 %v1308_v3, %v815_v5 }
0x11f7   :  { %v820_v36 = vpop.permute.xlu0 %819 }
0x11f8   :  { %v822_v4 = vmul.f32 %v1308_v3, %v820_v36 }
0x11fa   :  { %824 = vrot.lane.b32.xlu1 %v822_v4, %s1355_s27 }
0x126c   :  { %v825_v7 = vpop.permute.xlu1 %824 }
0x126d   :  { %v827_v8 = vadd.f32 %v825_v7, %v817_v6 }
0x126f   :  { %1309 = vtanh.f32 %v827_v8  ;;  %v894_v49 = vrot.slane %v827_v8, 6 }
0x1270   :  { %1311 = vtanh.f32 %v1477_v45 }
0x1271   :  { %1313 = vpow2.f32 %v1084_v13 }
0x1279   :  { %v1310_v9 = vpop.eup %1309 }
0x127a   :  { %830 = vrot.lane.b32.xlu0 %v1310_v9, %s1354_s4  ;;  %v1312_v10 = vpop.eup %1311 }
0x127b   :  { %v1314_v15 = vpop.eup %1313 }
0x127c   :  { %v344_v16 = vadd.f32 1.0, %v1314_v15 }
0x127e   :  { %350 = vrot.lane.b32.xlu0 %v1312_v10, %s1354_s4  ;;  %1315 = vrcp.f32 %v344_v16 }
0x1288   :  { %v1316_v20 = vpop.eup %1315 }
0x1289   :  { %v348_v24 = vmul.f32 0.0, %v1316_v20 }
0x12ec   :  { %v831_v17 = vpop.permute.xlu0 %830 }
0x12ed   :  { %v833_v18 = vmul.f32 %v1308_v3, %v831_v17 }
0x12ef   :  { %v834_v19 = vpack.c.bf16 %v833_v18, %v833_v18 }
0x12f0   :  { %v351_v21 = vpop.permute.xlu0 %350 }
0x12f1   :  { %v836_v22 = vrot.slane %v834_v19, 2  ;;  %v353_v23 = vmul.f32 %v1316_v20, %v351_v21 }
0x12f3   :  { %837 = vrot.lane.b32.xlu1 %v836_v22, %s1355_s27  ;;  %355 = vrot.lane.b32.xlu0 %v353_v23, %s1355_s27 }
0x1365   :  { %v838_v25 = vpop.permute.xlu1 %837  ;;  %v356_v26 = vpop.permute.xlu0 %355 }
0x1366   :  { %v358_v27 = vadd.f32 %v356_v26, %v348_v24  ;;  %1208 = vmatmul.mubr.msk.bf16.vlgmr.msra.gmra.mrb[20].mxu0 %vm66_vm0, %v838_v25 }
0x1367   :  { %1223 = vmatprep.mubr.msk.bf16.mxu0 %vm1353_vm1, %v1352_v12  ;;  %1220 = vmatpush3.bf16.msra.mxu0 %v1253_v56 }
0x1368   :  { %1317 = vtanh.f32 %v358_v27  ;;  %1221 = vmatprep.subr.bf16.mxu0 %v1352_v12 }
0x136b   :  { %1222 = vmatpush3.bf16.msra.mxu0 %v1254_v57 }
0x1372   :  { %v1318_v45 = vpop.eup %1317 }
0x1373   :  { %361 = vrot.lane.b32.xlu0 %v1318_v45, %s1354_s4 }
0x13e5   :  { %v362_v30 = vpop.permute.xlu0 %361 }
0x13e6   :  { %v364_v31 = vmul.f32 %v1316_v20, %v362_v30 }
0x13e8   :  { %v922_v32 = vpack.c.bf16 %v364_v31, %v364_v31 }
0x13ea   :  { %v924_v33 = vrot.slane %v922_v32, 3 }
0x13ec   :  { %925 = vrot.lane.b32.xlu0 %v924_v33, %s1355_s27 }
0x1439   :  { %v876_v35 = vpop.f32.mrb[20].mxu0 }
0x143a   :  { %v883_v37 = vrot.slane %v876_v35, 2  ;;  %v1209_v38 = vpop.f32.mrb[21].mxu0 }
0x143b   :  { %v879_v39 = vpop.f32.mrb[22].mxu0 }
0x143c   :  { %v885_v40 = vadd.f32 %v883_v37, %v1472_v34  ;;  %v1210_v41 = vpop.f32.mrb[23].mxu0 }
0x143e   :  { %1319 = vtanh.f32 %v885_v40  ;;  %v1098_v43 = vmul.f32 -1.442695, %v885_v40 }
0x1440   :  { %1321 = vpow2.f32 %v1098_v43 }
0x1448   :  { %v1320_v11 = vpop.eup %1319 }
0x1449   :  { %898 = vrot.lane.b32.xlu1 %v1320_v11, %s1354_s4 }
0x144a   :  { %v1322_v44 = vpop.eup %1321 }
0x144b   :  { %v889_v14 = vadd.f32 1.0, %v1322_v44 }
0x144d   :  { %1323 = vrcp.f32 %v889_v14 }
0x1457   :  { %v1324_v46 = vpop.eup %1323 }
0x1458   :  { %v896_v34 = vmul.f32 %v1324_v46, %v894_v49 }
0x145e   :  { %v926_v42 = vpop.permute.xlu0 %925 }
0x145f   :  { %1216 = vmatmul.mubr.msk.bf16.vlgmr.msra.gmra.mrb[20].mxu1 %vm66_vm0, %v926_v42 }
0x14bb   :  { %v899_v47 = vpop.permute.xlu1 %898 }
0x14bc   :  { %v901_v48 = vmul.f32 %v1324_v46, %v899_v47 }
0x14be   :  { %903 = vrot.lane.b32.xlu1 %v901_v48, %s1355_s27 }
0x1530   :  { %v904_v50 = vpop.permute.xlu1 %903 }
0x1531   :  { %v906_v51 = vadd.f32 %v904_v50, %v896_v34 }
0x1532   :  { %v976_v52 = vpop.f32.mrb[20].mxu1 }
0x1533   :  { %1325 = vtanh.f32 %v906_v51  ;;  %v1217_v53 = vpop.f32.mrb[21].mxu1 }
0x1534   :  { %v979_v54 = vpop.f32.mrb[22].mxu1 }
0x1535   :  { %v1218_v55 = vpop.f32.mrb[23].mxu1 }
0x153d   :  { %v1326_v58 = vpop.eup %1325 }
0x153e   :  { %909 = vrot.lane.b32.xlu1 %v1326_v58, %s1354_s4 }
0x15b0   :  { %v910_v59 = vpop.permute.xlu1 %909 }
0x15b1   :  { %v912_v60 = vmul.f32 %v1324_v46, %v910_v59 }
0x15b3   :  { %v921_v61 = vpack.c.bf16 %v912_v60, %v912_v60 }
0x15b5   :  { %v983_v62 = vrot.slane %v921_v61, 3 }
0x15b7   :  { %984 = vrot.lane.b32.xlu1 %v983_v62, %s1355_s27 }
0x1629   :  { %v985_v63 = vpop.permute.xlu1 %984 }
0x162a   :  { %1224 = vmatmul.mubr.msk.bf16.vlgmr.msra.gmra.mrb[24].mxu0 %vm66_vm0, %v985_v63 }
0x16fd   :  { %v1035_v0 = vpop.f32.mrb[24].mxu0 }
0x16fe   :  { %v1036_v12 = vadd.f32 %v1035_v0, %v976_v52  ;;  %v1225_v2 = vpop.f32.mrb[25].mxu0 }
0x16ff   :  { %v1038_v3 = vpop.f32.mrb[26].mxu0 }
0x1700   :  { %v1048_v36 = vadd.f32 %v1105_v1, %v1036_v12  ;;  %v1226_v4 = vpop.f32.mrb[27].mxu0 }
0x1702   :  { %1050 = vst.msk [vmem:[#allocation2] sm:$0x3] %vm1049_vm2, %v1048_v36 }
0x1703   :  { %1338 = shalt.err (!%p1335_p4)
}
0x1704   :  { %s1339_s6 = scalar_lea.hbm %s1603_s7, 32 }
0x1705   :  { %p1340_p5 = scmp.ne.s32.totalorder %s1603_s7, %s1339_s6  ;;  %p1343_p6 = scmp.lt.u32.totalorder %s1339_s6, %s1603_s7 }
0x1707   :  { %p1345_p7 = pnand %p1343_p6, %p1340_p5 }
0x1709   :  { %1348 = shalt.err (!%p1345_p7)
}
0x170a   :  { %1060 = dma.vmem_to_hbm [thread:$0]  %s1058_s15, 32, %s1603_s7, [#allocation3]  }
0x170b   :  { %1349 = dma.done.wait [#allocation3], 32  }
0x170c   :  { %1350 = vsyncadd [#allocation3], 4294967264 }
0x170d   :  { %1064 = vsyncpa [#allocation3], 1 }

// kernel: bidirectional_lstm_forward.2
= control target key start
LH: loop header
LB: loop body
LE: loop exit
PB: predicated region body
PF: predicated region fallthrough
CT: control target
= control target key end

     0   :  { %v1866_v0 = vmov 0.0   ;;  %v1867_v2 = vmov 0   ;;  %vm1868_vm0 = vmmov 0   ;;  %vm52_vm1 = vcmask 130048   ;;  %s1870_s30 = smov 32   ;;  %s2313_s1 = inlined_call_operand.vmem [shape: bf16[16,256], index: 1, kind: input, shape index: {}]   ;;  %s2314_s2 = inlined_call_operand.vmem [shape: bf16[32,128], index: 2, kind: input, shape index: {}]   ;;  %s2315_s0 = inlined_call_operand.vmem [shape: bf16[16,16], index: 0, kind: input, shape index: {}]   ;;  %s2316_s3 = inlined_call_operand.vmem [shape: bf16[32,128], index: 3, kind: input, shape index: {}]   ;;  %s2317_s4 = inlined_call_operand.vmem [shape: f32[1,256], index: 4, kind: input, shape index: {}]   ;;  %s2318_s5 = inlined_call_operand.vmem [shape: bf16[2,16,32], index: 5, kind: output, shape index: {}]  }
   0x1   :  { %1597 = vmatprep.subr.bf16.mxu1 %v1866_v0  ;;  %v1730_v1 = vld [vmem:[%s2313_s1 + $0x4] ss:$8 sps:$4 sm:$0xff]   ;;  %88 = vmatprep.mubr.bf16.mxu0 %v1867_v2  ;;  %v1733_v4 = vld [vmem:[%s2313_s1] ss:$8 sps:$4 sm:$0xff]   ;;  %v27_v9 = vlaneseq  ;;  %vm119_vm2 = vcmask 261120   ;;  %vm275_vm3 = vcmask 253952  }
   0x2   :  { %v1908_v3 = vld [vmem:[%s2314_s2] sm:$0xff]   ;;  %1601 = vmatprep.mubr.msk.bf16.mxu1 %vm1868_vm0, %v1866_v0  ;;  %56 = vmatprep.subr.bf16.mxu0 %v1730_v1  ;;  %v1923_v6 = vld [vmem:[%s2314_s2 + $0x8] sm:$0xff]   ;;  %vm447_vm4 = vcmask 254977   ;;  %vm285_vm5 = vcmask 257027   ;;  %vm456_vm6 = vcmask 256002  }
   0x3   :  { %1598 = vmatpush3.bf16.msra.mxu1 %v1908_v3  ;;  %v1734_v5 = vld [vmem:[%s2315_s0] sm:$0xff]   ;;  %57 = vmatpush1.bf16.msra.mxu0 %v1733_v4  ;;  %v1936_v8 = vld [vmem:[%s2316_s3 + $0x8] sm:$0xff]   ;;  %v28_v10 = vshrl.u32 %v27_v9, 7 }
   0x4   :  { %1599 = vmatprep.subr.bf16.mxu1 %v1866_v0  ;;  %1605 = vmatprep.subr.bf16.mxu0 %v1866_v0  ;;  %v1929_v7 = vld [vmem:[%s2316_s3] sm:$0xff]  }
   0x5   :  { %v29_v11 = vsub.s32 0, %v28_v10  ;;  %v25_v12 = vld [vmem:[%s2317_s4] sm:$0x3]  ;;  %v33_v13 = vsub.s32 1, %v28_v10  ;;  %s1869_s4 = smov 64  }
   0x6   :  { %1474 = vmatmul.mubr.msk.bf16.vlgmr.msra.gmra.mrb[0].mxu0 %vm52_vm1, %v1734_v5 }
   0x7   :  { %1600 = vmatpush3.bf16.msra.mxu1 %v1923_v6  ;;  %1606 = vmatpush3.bf16.msra.mxu0 %v1929_v7  ;;  %v30_v14 = vrot.slane %v25_v12, %v29_v11  ;;  %v34_v15 = vrot.slane %v25_v12, %v33_v13 }
   0x8   :  { %1609 = vmatprep.mubr.msk.bf16.mxu0 %vm1868_vm0, %v1866_v0  ;;  %1607 = vmatprep.subr.bf16.mxu0 %v1866_v0 }
   0x9   :  { %1613 = vmatprep.subr.bf16.mxu1 %v1866_v0 }
   0xa   :  { %1602 = vmatmul.mubr.bf16.vlgmr.msra.gmra.mrb[0].mxu1 %v1867_v2 }
   0xb   :  { %1614 = vmatpush3.bf16.msra.mxu1 %v1908_v3  ;;  %1617 = vmatprep.mubr.msk.bf16.mxu1 %vm1868_vm0, %v1866_v0 }
   0xc   :  { %1608 = vmatpush3.bf16.msra.mxu0 %v1936_v8  ;;  %1615 = vmatprep.subr.bf16.mxu1 %v1866_v0 }
   0xd   :  { %1621 = vmatprep.subr.bf16.mxu0 %v1866_v0 }
   0xf   :  { %1610 = vmatmul.mubr.bf16.vlgmr.msra.gmra.mrb[4].mxu0 %v1867_v2  ;;  %1616 = vmatpush3.bf16.msra.mxu1 %v1923_v6 }
  0x10   :  { %1622 = vmatpush3.bf16.msra.mxu0 %v1929_v7  ;;  %1625 = vmatprep.mubr.msk.bf16.mxu0 %vm1868_vm0, %v1866_v0 }
  0x11   :  { %1623 = vmatprep.subr.bf16.mxu0 %v1866_v0  ;;  %1629 = vmatprep.subr.bf16.mxu1 %v1866_v0 }
  0x14   :  { %1624 = vmatpush3.bf16.msra.mxu0 %v1936_v8 }
  0x15   :  { %1637 = vmatprep.subr.bf16.mxu0 %v1866_v0 }
  0xd9   :  { %v90_v16 = vpop.f32.mrb[0].mxu0 }
  0xda   :  { %v1959_v17 = vadd.f32 %v90_v16, %v30_v14  ;;  %v92_v18 = vpop.f32.mrb[1].mxu0 }
  0xdb   :  { %v1961_v19 = vadd.f32 %v92_v18, %v34_v15  ;;  %v94_v20 = vpop.f32.mrb[2].mxu0 }
  0xdc   :  { %v1963_v21 = vadd.f32 %v94_v20, %v30_v14  ;;  %v96_v22 = vpop.f32.mrb[3].mxu0 }
  0xdd   :  { %v157_v23 = vpop.f32.mrb[0].mxu1  ;;  %v1966_v29 = vadd.f32 %v96_v22, %v34_v15 }
  0xde   :  { %v163_v24 = vadd.f32 %v157_v23, %v1959_v17  ;;  %v1603_v25 = vpop.f32.mrb[1].mxu1 }
  0xdf   :  { %v160_v26 = vpop.f32.mrb[2].mxu1 }
  0xe0   :  { %1738 = vtanh.f32 %v163_v24  ;;  %v1604_v27 = vpop.f32.mrb[3].mxu1  ;;  %v1477_v37 = vmul.f32 -1.442695, %v163_v24 }
  0xe2   :  { %v234_v28 = vpop.f32.mrb[4].mxu0 }
  0xe3   :  { %v241_v30 = vrot.slane %v234_v28, 2  ;;  %v1611_v31 = vpop.f32.mrb[5].mxu0 }
  0xe4   :  { %v237_v32 = vpop.f32.mrb[6].mxu0 }
  0xe5   :  { %v243_v33 = vadd.f32 %v241_v30, %v1966_v29  ;;  %v1612_v34 = vpop.f32.mrb[7].mxu0 }
  0xe7   :  { %1740 = vtanh.f32 %v243_v33  ;;  %v1480_v38 = vmul.f32 -1.442695, %v243_v33 }
  0xe8   :  { %1742 = vpow2.f32 %v1477_v37 }
  0xe9   :  { %1744 = vpow2.f32 %v1480_v38 }
  0xea   :  { %v1739_v35 = vpop.eup %1738 }
  0xeb   :  { %173 = vrot.lane.b32.xlu0 %v1739_v35, %s1869_s4 }
  0xf1   :  { %v1741_v36 = vpop.eup %1740 }
  0xf2   :  { %253 = vrot.lane.b32.xlu0 %v1741_v36, %s1869_s4  ;;  %v1743_v39 = vpop.eup %1742 }
  0xf3   :  { %v167_v40 = vadd.f32 1.0, %v1743_v39  ;;  %v1745_v41 = vpop.eup %1744 }
  0xf4   :  { %v247_v42 = vadd.f32 1.0, %v1745_v41 }
  0xf5   :  { %1746 = vrcp.f32 %v167_v40 }
  0xf6   :  { %1748 = vrcp.f32 %v247_v42 }
  0xff   :  { %v1747_v43 = vpop.eup %1746 }
 0x100   :  { %v1749_v46 = vpop.eup %1748  ;;  %v171_v49 = vmul.f32 0.0, %v1747_v43 }
 0x101   :  { %v251_v52 = vmul.f32 0.0, %v1749_v46 }
 0x15d   :  { %v174_v44 = vpop.permute.xlu0 %173 }
 0x15e   :  { %v176_v45 = vmul.f32 %v1747_v43, %v174_v44 }
 0x160   :  { %178 = vrot.lane.b32.xlu1 %v176_v45, %s1870_s30 }
 0x164   :  { %v254_v47 = vpop.permute.xlu0 %253 }
 0x165   :  { %v256_v48 = vmul.f32 %v1749_v46, %v254_v47 }
 0x167   :  { %258 = vrot.lane.b32.xlu1 %v256_v48, %s1870_s30 }
 0x1d2   :  { %v179_v50 = vpop.permute.xlu1 %178 }
 0x1d3   :  { %v1973_v51 = vadd.f32 %v179_v50, %v171_v49 }
 0x1d5   :  { %1750 = vtanh.f32 %v1973_v51  ;;  %v344_v37 = vrot.slane %v1973_v51, 6 }
 0x1d9   :  { %v259_v53 = vpop.permute.xlu1 %258 }
 0x1da   :  { %v1976_v54 = vadd.f32 %v259_v53, %v251_v52 }
 0x1dc   :  { %1752 = vtanh.f32 %v1976_v54  ;;  %v421_v41 = vrot.slane %v1976_v54, 2 }
 0x1df   :  { %v1751_v55 = vpop.eup %1750 }
 0x1e0   :  { %184 = vrot.lane.b32.xlu0 %v1751_v55, %s1869_s4 }
 0x1e6   :  { %v1753_v56 = vpop.eup %1752 }
 0x1e7   :  { %264 = vrot.lane.b32.xlu1 %v1753_v56, %s1869_s4 }
 0x252   :  { %v185_v57 = vpop.permute.xlu0 %184 }
 0x253   :  { %v187_v58 = vmul.f32 %v1747_v43, %v185_v57 }
 0x255   :  { %v1981_v59 = vpack.c.bf16 %v187_v58, %v187_v58 }
 0x257   :  { %287 = vrot.lane.b32.xlu0 %v1981_v59, %s1870_s30 }
 0x259   :  { %v265_v60 = vpop.permute.xlu1 %264 }
 0x25a   :  { %v267_v61 = vmul.f32 %v1749_v46, %v265_v60 }
 0x25c   :  { %v1985_v62 = vpack.c.bf16 %v267_v61, %v267_v61 }
 0x25e   :  { %v363_v63 = vrot.slane %v1985_v62, 3 }
 0x260   :  { %364 = vrot.lane.b32.xlu1 %v363_v63, %s1870_s30 }
 0x2c9   :  { %v288_v1 = vpop.permute.xlu0 %287 }
 0x2ca   :  { %1618 = vmatmul.mubr.msk.bf16.vlgmr.msra.gmra.mrb[4].mxu1 %vm119_vm2, %v288_v1 }
 0x2cb   :  { %1630 = vmatpush3.bf16.msra.mxu1 %v1908_v3  ;;  %1633 = vmatprep.mubr.msk.bf16.mxu1 %vm1868_vm0, %v1866_v0 }
 0x2cc   :  { %1631 = vmatprep.subr.bf16.mxu1 %v1866_v0 }
 0x2cf   :  { %1632 = vmatpush3.bf16.msra.mxu1 %v1923_v6 }
 0x2d0   :  { %1645 = vmatprep.subr.bf16.mxu1 %v1866_v0 }
 0x2d2   :  { %v365_v2 = vpop.permute.xlu1 %364 }
 0x2d3   :  { %1626 = vmatmul.mubr.msk.bf16.vlgmr.msra.gmra.mrb[8].mxu0 %vm119_vm2, %v365_v2 }
 0x2d4   :  { %1638 = vmatpush3.bf16.msra.mxu0 %v1929_v7  ;;  %1641 = vmatprep.mubr.msk.bf16.mxu0 %vm1868_vm0, %v1866_v0 }
 0x2d5   :  { %1639 = vmatprep.subr.bf16.mxu0 %v1866_v0 }
 0x2d8   :  { %1640 = vmatpush3.bf16.msra.mxu0 %v1936_v8 }
 0x2d9   :  { %1653 = vmatprep.subr.bf16.mxu0 %v1866_v0 }
 0x39d   :  { %v326_v4 = vpop.f32.mrb[4].mxu1 }
 0x39e   :  { %v333_v5 = vrot.slane %v326_v4, 6  ;;  %v1619_v9 = vpop.f32.mrb[5].mxu1 }
 0x39f   :  { %v329_v10 = vpop.f32.mrb[6].mxu1 }
 0x3a0   :  { %v335_v11 = vadd.f32 %v333_v5, %v1959_v17  ;;  %v1620_v12 = vpop.f32.mrb[7].mxu1 }
 0x3a2   :  { %1754 = vtanh.f32 %v335_v11  ;;  %v1485_v24 = vmul.f32 -1.442695, %v335_v11 }
 0x3a6   :  { %v403_v13 = vpop.f32.mrb[8].mxu0 }
 0x3a7   :  { %v410_v14 = vrot.slane %v403_v13, 4  ;;  %v1627_v15 = vpop.f32.mrb[9].mxu0 }
 0x3a8   :  { %v406_v16 = vpop.f32.mrb[10].mxu0 }
 0x3a9   :  { %v412_v18 = vadd.f32 %v410_v14, %v1966_v29  ;;  %v1628_v20 = vpop.f32.mrb[11].mxu0 }
 0x3ab   :  { %1756 = vtanh.f32 %v412_v18  ;;  %v1487_v25 = vmul.f32 -1.442695, %v412_v18 }
 0x3ac   :  { %v1755_v22 = vpop.eup %1754  ;;  %1758 = vpow2.f32 %v1485_v24 }
 0x3ad   :  { %348 = vrot.lane.b32.xlu0 %v1755_v22, %s1869_s4  ;;  %1760 = vpow2.f32 %v1487_v25 }
 0x3b5   :  { %v1757_v23 = vpop.eup %1756 }
 0x3b6   :  { %425 = vrot.lane.b32.xlu1 %v1757_v23, %s1869_s4  ;;  %v1759_v26 = vpop.eup %1758 }
 0x3b7   :  { %v339_v27 = vadd.f32 1.0, %v1759_v26  ;;  %v1761_v28 = vpop.eup %1760 }
 0x3b8   :  { %v416_v30 = vadd.f32 1.0, %v1761_v28 }
 0x3b9   :  { %1762 = vrcp.f32 %v339_v27 }
 0x3ba   :  { %1764 = vrcp.f32 %v416_v30 }
 0x3c3   :  { %v1763_v31 = vpop.eup %1762 }
 0x3c4   :  { %v1765_v34 = vpop.eup %1764  ;;  %v346_v38 = vmul.f32 %v1763_v31, %v344_v37 }
 0x3c5   :  { %v423_v42 = vmul.f32 %v1765_v34, %v421_v41 }
 0x41f   :  { %v349_v32 = vpop.permute.xlu0 %348 }
 0x420   :  { %v351_v33 = vmul.f32 %v1763_v31, %v349_v32 }
 0x422   :  { %353 = vrot.lane.b32.xlu0 %v351_v33, %s1870_s30 }
 0x428   :  { %v426_v35 = vpop.permute.xlu1 %425 }
 0x429   :  { %v428_v36 = vmul.f32 %v1765_v34, %v426_v35 }
 0x42b   :  { %430 = vrot.lane.b32.xlu1 %v428_v36, %s1870_s30 }
 0x494   :  { %v354_v39 = vpop.permute.xlu0 %353 }
 0x495   :  { %v2010_v40 = vadd.f32 %v354_v39, %v346_v38 }
 0x497   :  { %1766 = vtanh.f32 %v2010_v40  ;;  %v516_v30 = vrot.slane %v2010_v40, 6 }
 0x49d   :  { %v431_v43 = vpop.permute.xlu1 %430 }
 0x49e   :  { %v2014_v44 = vadd.f32 %v431_v43, %v423_v42 }
 0x4a0   :  { %1768 = vtanh.f32 %v2014_v44 }
 0x4a1   :  { %v1767_v45 = vpop.eup %1766 }
 0x4a2   :  { %359 = vrot.lane.b32.xlu0 %v1767_v45, %s1869_s4 }
 0x4aa   :  { %v1769_v46 = vpop.eup %1768 }
 0x4ab   :  { %436 = vrot.lane.b32.xlu1 %v1769_v46, %s1869_s4 }
 0x514   :  { %v360_v47 = vpop.permute.xlu0 %359 }
 0x515   :  { %v362_v48 = vmul.f32 %v1763_v31, %v360_v47 }
 0x517   :  { %v2019_v49 = vpack.c.bf16 %v362_v48, %v362_v48 }
 0x519   :  { %v458_v50 = vrot.slane %v2019_v49, 1 }
 0x51b   :  { %459 = vrot.lane.b32.xlu0 %v458_v50, %s1870_s30 }
 0x51d   :  { %v437_v51 = vpop.permute.xlu1 %436 }
 0x51e   :  { %v439_v52 = vmul.f32 %v1765_v34, %v437_v51  ;;  %v593_v34 = vrot.slane %v2014_v44, 2 }
 0x520   :  { %v2023_v53 = vpack.c.bf16 %v439_v52, %v439_v52 }
 0x522   :  { %v535_v54 = vrot.slane %v2023_v53, 2 }
 0x524   :  { %536 = vrot.lane.b32.xlu1 %v535_v54, %s1870_s30 }
 0x58d   :  { %v460_v55 = vpop.permute.xlu0 %459 }
 0x58e   :  { %1634 = vmatmul.mubr.msk.bf16.vlgmr.msra.gmra.mrb[8].mxu1 %vm119_vm2, %v460_v55 }
 0x58f   :  { %1646 = vmatpush3.bf16.msra.mxu1 %v1908_v3  ;;  %1649 = vmatprep.mubr.msk.bf16.mxu1 %vm1868_vm0, %v1866_v0 }
 0x590   :  { %1647 = vmatprep.subr.bf16.mxu1 %v1866_v0 }
 0x593   :  { %1648 = vmatpush3.bf16.msra.mxu1 %v1923_v6 }
 0x594   :  { %1661 = vmatprep.subr.bf16.mxu1 %v1866_v0 }
 0x596   :  { %v537_v56 = vpop.permute.xlu1 %536 }
 0x597   :  { %1642 = vmatmul.mubr.msk.bf16.vlgmr.msra.gmra.mrb[12].mxu0 %vm119_vm2, %v537_v56 }
 0x598   :  { %1654 = vmatpush3.bf16.msra.mxu0 %v1929_v7  ;;  %1657 = vmatprep.mubr.msk.bf16.mxu0 %vm1868_vm0, %v1866_v0 }
 0x599   :  { %1655 = vmatprep.subr.bf16.mxu0 %v1866_v0 }
 0x59c   :  { %1656 = vmatpush3.bf16.msra.mxu0 %v1936_v8 }
 0x59d   :  { %1669 = vmatprep.subr.bf16.mxu0 %v1866_v0 }
 0x661   :  { %v498_v57 = vpop.f32.mrb[8].mxu1 }
 0x662   :  { %v505_v58 = vrot.slane %v498_v57, 4  ;;  %v1635_v60 = vpop.f32.mrb[9].mxu1 }
 0x663   :  { %v501_v61 = vpop.f32.mrb[10].mxu1 }
 0x664   :  { %v507_v63 = vadd.f32 %v505_v58, %v1959_v17  ;;  %v1636_v1 = vpop.f32.mrb[11].mxu1 }
 0x666   :  { %1770 = vtanh.f32 %v507_v63  ;;  %v1492_v14 = vmul.f32 -1.442695, %v507_v63 }
 0x66a   :  { %v575_v2 = vpop.f32.mrb[12].mxu0 }
 0x66b   :  { %v582_v4 = vrot.slane %v575_v2, 6  ;;  %v1643_v5 = vpop.f32.mrb[13].mxu0 }
 0x66c   :  { %v578_v9 = vpop.f32.mrb[14].mxu0 }
 0x66d   :  { %v584_v10 = vadd.f32 %v582_v4, %v1966_v29  ;;  %v1644_v11 = vpop.f32.mrb[15].mxu0 }
 0x66f   :  { %1772 = vtanh.f32 %v584_v10  ;;  %v1494_v15 = vmul.f32 -1.442695, %v584_v10 }
 0x670   :  { %v1771_v12 = vpop.eup %1770  ;;  %1774 = vpow2.f32 %v1492_v14 }
 0x671   :  { %520 = vrot.lane.b32.xlu0 %v1771_v12, %s1869_s4  ;;  %1776 = vpow2.f32 %v1494_v15 }
 0x679   :  { %v1773_v13 = vpop.eup %1772 }
 0x67a   :  { %597 = vrot.lane.b32.xlu1 %v1773_v13, %s1869_s4  ;;  %v1775_v16 = vpop.eup %1774 }
 0x67b   :  { %v511_v18 = vadd.f32 1.0, %v1775_v16  ;;  %v1777_v20 = vpop.eup %1776 }
 0x67c   :  { %v588_v22 = vadd.f32 1.0, %v1777_v20 }
 0x67d   :  { %1778 = vrcp.f32 %v511_v18 }
 0x67e   :  { %1780 = vrcp.f32 %v588_v22 }
 0x687   :  { %v1779_v23 = vpop.eup %1778 }
 0x688   :  { %v1781_v26 = vpop.eup %1780  ;;  %v518_v31 = vmul.f32 %v1779_v23, %v516_v30 }
 0x689   :  { %v595_v35 = vmul.f32 %v1781_v26, %v593_v34 }
 0x6e3   :  { %v521_v24 = vpop.permute.xlu0 %520 }
 0x6e4   :  { %v523_v25 = vmul.f32 %v1779_v23, %v521_v24 }
 0x6e6   :  { %525 = vrot.lane.b32.xlu0 %v523_v25, %s1870_s30 }
 0x6ec   :  { %v598_v27 = vpop.permute.xlu1 %597 }
 0x6ed   :  { %v600_v28 = vmul.f32 %v1781_v26, %v598_v27 }
 0x6ef   :  { %602 = vrot.lane.b32.xlu1 %v600_v28, %s1870_s30 }
 0x758   :  { %v526_v32 = vpop.permute.xlu0 %525 }
 0x759   :  { %v2048_v33 = vadd.f32 %v526_v32, %v518_v31 }
 0x75b   :  { %1782 = vtanh.f32 %v2048_v33  ;;  %v686_v20 = vrot.slane %v2048_v33, 6 }
 0x761   :  { %v603_v36 = vpop.permute.xlu1 %602 }
 0x762   :  { %v2052_v37 = vadd.f32 %v603_v36, %v595_v35 }
 0x764   :  { %1784 = vtanh.f32 %v2052_v37  ;;  %v760_v25 = vrot.slane %v2052_v37, 2 }
 0x765   :  { %v1783_v38 = vpop.eup %1782 }
 0x766   :  { %531 = vrot.lane.b32.xlu0 %v1783_v38, %s1869_s4 }
 0x76e   :  { %v1785_v39 = vpop.eup %1784 }
 0x76f   :  { %608 = vrot.lane.b32.xlu1 %v1785_v39, %s1869_s4 }
 0x7d8   :  { %v532_v40 = vpop.permute.xlu0 %531 }
 0x7d9   :  { %v534_v41 = vmul.f32 %v1779_v23, %v532_v40 }
 0x7db   :  { %v2057_v42 = vpack.c.bf16 %v534_v41, %v534_v41 }
 0x7dd   :  { %v628_v43 = vrot.slane %v2057_v42, 2 }
 0x7df   :  { %629 = vrot.lane.b32.xlu0 %v628_v43, %s1870_s30 }
 0x7e1   :  { %v609_v44 = vpop.permute.xlu1 %608 }
 0x7e2   :  { %v611_v45 = vmul.f32 %v1781_v26, %v609_v44 }
 0x7e4   :  { %v2061_v46 = vpack.c.bf16 %v611_v45, %v611_v45 }
 0x7e6   :  { %v705_v47 = vrot.slane %v2061_v46, 1 }
 0x7e8   :  { %706 = vrot.lane.b32.xlu1 %v705_v47, %s1870_s30 }
 0x851   :  { %v630_v48 = vpop.permute.xlu0 %629 }
 0x852   :  { %1650 = vmatmul.mubr.msk.bf16.vlgmr.msra.gmra.mrb[12].mxu1 %vm119_vm2, %v630_v48 }
 0x853   :  { %1662 = vmatpush3.bf16.msra.mxu1 %v1908_v3  ;;  %1665 = vmatprep.mubr.msk.bf16.mxu1 %vm1868_vm0, %v1866_v0 }
 0x854   :  { %1663 = vmatprep.subr.bf16.mxu1 %v1866_v0 }
 0x857   :  { %1664 = vmatpush3.bf16.msra.mxu1 %v1923_v6 }
 0x858   :  { %1677 = vmatprep.subr.bf16.mxu1 %v1866_v0 }
 0x85a   :  { %v707_v50 = vpop.permute.xlu1 %706 }
 0x85b   :  { %1658 = vmatmul.mubr.msk.bf16.vlgmr.msra.gmra.mrb[16].mxu0 %vm119_vm2, %v707_v50 }
 0x85c   :  { %1670 = vmatpush3.bf16.msra.mxu0 %v1929_v7  ;;  %1673 = vmatprep.mubr.msk.bf16.mxu0 %vm1868_vm0, %v1866_v0 }
 0x85d   :  { %1671 = vmatprep.subr.bf16.mxu0 %v1866_v0 }
 0x860   :  { %1672 = vmatpush3.bf16.msra.mxu0 %v1936_v8 }
 0x861   :  { %1685 = vmatprep.subr.bf16.mxu0 %v1866_v0 }
 0x925   :  { %v668_v51 = vpop.f32.mrb[12].mxu1 }
 0x926   :  { %v675_v52 = vrot.slane %v668_v51, 2  ;;  %v1651_v54 = vpop.f32.mrb[13].mxu1 }
 0x927   :  { %v671_v55 = vpop.f32.mrb[14].mxu1 }
 0x928   :  { %v677_v56 = vadd.f32 %v675_v52, %v1959_v17  ;;  %v1652_v57 = vpop.f32.mrb[15].mxu1 }
 0x92a   :  { %1786 = vtanh.f32 %v677_v56  ;;  %v1499_v5 = vmul.f32 -1.442695, %v677_v56 }
 0x92e   :  { %v745_v58 = vpop.f32.mrb[16].mxu0 }
 0x92f   :  { %v751_v60 = vadd.f32 %v745_v58, %v1966_v29  ;;  %v1659_v61 = vpop.f32.mrb[17].mxu0 }
 0x930   :  { %v748_v63 = vpop.f32.mrb[18].mxu0 }
 0x931   :  { %1788 = vtanh.f32 %v751_v60  ;;  %v1660_v1 = vpop.f32.mrb[19].mxu0  ;;  %v1501_v9 = vmul.f32 -1.442695, %v751_v60 }
 0x932   :  { %1790 = vpow2.f32 %v1499_v5 }
 0x933   :  { %1792 = vpow2.f32 %v1501_v9 }
 0x934   :  { %v1787_v2 = vpop.eup %1786 }
 0x935   :  { %690 = vrot.lane.b32.xlu0 %v1787_v2, %s1869_s4 }
 0x93b   :  { %v1789_v4 = vpop.eup %1788 }
 0x93c   :  { %764 = vrot.lane.b32.xlu1 %v1789_v4, %s1869_s4  ;;  %v1791_v17 = vpop.eup %1790 }
 0x93d   :  { %v681_v10 = vadd.f32 1.0, %v1791_v17  ;;  %v1793_v11 = vpop.eup %1792 }
 0x93e   :  { %v755_v12 = vadd.f32 1.0, %v1793_v11 }
 0x93f   :  { %1794 = vrcp.f32 %v681_v10 }
 0x940   :  { %1796 = vrcp.f32 %v755_v12 }
 0x949   :  { %v1795_v29 = vpop.eup %1794 }
 0x94a   :  { %v1797_v15 = vpop.eup %1796  ;;  %v688_v22 = vmul.f32 %v1795_v29, %v686_v20 }
 0x94b   :  { %v762_v26 = vmul.f32 %v1797_v15, %v760_v25 }
 0x9a7   :  { %v691_v13 = vpop.permute.xlu0 %690 }
 0x9a8   :  { %v693_v14 = vmul.f32 %v1795_v29, %v691_v13 }
 0x9aa   :  { %695 = vrot.lane.b32.xlu0 %v693_v14, %s1870_s30 }
 0x9ae   :  { %v765_v16 = vpop.permute.xlu1 %764 }
 0x9af   :  { %v767_v18 = vmul.f32 %v1797_v15, %v765_v16 }
 0x9b1   :  { %769 = vrot.lane.b32.xlu1 %v767_v18, %s1870_s30 }
 0xa1c   :  { %v696_v23 = vpop.permute.xlu0 %695 }
 0xa1d   :  { %v2086_v24 = vadd.f32 %v696_v23, %v688_v22 }
 0xa1f   :  { %1798 = vtanh.f32 %v2086_v24  ;;  %v850_v12 = vrot.slane %v2086_v24, 6 }
 0xa23   :  { %v770_v27 = vpop.permute.xlu1 %769 }
 0xa24   :  { %v2090_v28 = vadd.f32 %v770_v27, %v762_v26 }
 0xa26   :  { %1800 = vtanh.f32 %v2090_v28 }
 0xa29   :  { %v1799_v30 = vpop.eup %1798 }
 0xa2a   :  { %701 = vrot.lane.b32.xlu0 %v1799_v30, %s1869_s4 }
 0xa30   :  { %v1801_v31 = vpop.eup %1800 }
 0xa31   :  { %775 = vrot.lane.b32.xlu1 %v1801_v31, %s1869_s4 }
 0xa9c   :  { %v702_v32 = vpop.permute.xlu0 %701 }
 0xa9d   :  { %v704_v33 = vmul.f32 %v1795_v29, %v702_v32 }
 0xa9f   :  { %v2095_v34 = vpack.c.bf16 %v704_v33, %v704_v33 }
 0xaa1   :  { %v795_v35 = vrot.slane %v2095_v34, 3 }
 0xaa3   :  { %v776_v36 = vpop.permute.xlu1 %775  ;;  %796 = vrot.lane.b32.xlu1 %v795_v35, %s1870_s30 }
 0xaa4   :  { %v778_v37 = vmul.f32 %v1797_v15, %v776_v36  ;;  %v926_v15 = vrot.slane %v2090_v28, 2 }
 0xaa6   :  { %v2099_v38 = vpack.c.bf16 %v778_v37, %v778_v37 }
 0xaa8   :  { %869 = vrot.lane.b32.xlu0 %v2099_v38, %s1870_s30 }
 0xb15   :  { %v797_v39 = vpop.permute.xlu1 %796 }
 0xb16   :  { %1666 = vmatmul.mubr.msk.bf16.vlgmr.msra.gmra.mrb[16].mxu1 %vm119_vm2, %v797_v39 }
 0xb17   :  { %1678 = vmatpush3.bf16.msra.mxu1 %v1908_v3  ;;  %1681 = vmatprep.mubr.msk.bf16.mxu1 %vm1868_vm0, %v1866_v0 }
 0xb18   :  { %1679 = vmatprep.subr.bf16.mxu1 %v1866_v0 }
 0xb1a   :  { %v870_v40 = vpop.permute.xlu0 %869 }
 0xb1b   :  { %1674 = vmatmul.mubr.msk.bf16.vlgmr.msra.gmra.mrb[20].mxu0 %vm119_vm2, %v870_v40  ;;  %1680 = vmatpush3.bf16.msra.mxu1 %v1923_v6 }
 0xb1c   :  { %1686 = vmatpush3.bf16.msra.mxu0 %v1929_v7  ;;  %1689 = vmatprep.mubr.msk.bf16.mxu0 %vm1868_vm0, %v1866_v0 }
 0xb1d   :  { %1687 = vmatprep.subr.bf16.mxu0 %v1866_v0  ;;  %1693 = vmatprep.subr.bf16.mxu1 %v1866_v0 }
 0xb20   :  { %1688 = vmatpush3.bf16.msra.mxu0 %v1936_v8 }
 0xb21   :  { %1701 = vmatprep.subr.bf16.mxu0 %v1866_v0 }
 0xbe9   :  { %v835_v41 = vpop.f32.mrb[16].mxu1 }
 0xbea   :  { %v841_v43 = vadd.f32 %v835_v41, %v1963_v21  ;;  %v1667_v44 = vpop.f32.mrb[17].mxu1 }
 0xbeb   :  { %v838_v45 = vpop.f32.mrb[18].mxu1 }
 0xbec   :  { %1802 = vtanh.f32 %v841_v43  ;;  %v1668_v47 = vpop.f32.mrb[19].mxu1  ;;  %v1506_v58 = vmul.f32 -1.442695, %v841_v43 }
 0xbee   :  { %v908_v48 = vpop.f32.mrb[20].mxu0 }
 0xbef   :  { %v915_v50 = vrot.slane %v908_v48, 2  ;;  %v1675_v51 = vpop.f32.mrb[21].mxu0 }
 0xbf0   :  { %v911_v52 = vpop.f32.mrb[22].mxu0 }
 0xbf1   :  { %v917_v54 = vadd.f32 %v915_v50, %v1961_v19  ;;  %v1676_v55 = vpop.f32.mrb[23].mxu0 }
 0xbf3   :  { %1804 = vtanh.f32 %v917_v54  ;;  %v1508_v60 = vmul.f32 -1.442695, %v917_v54 }
 0xbf4   :  { %1806 = vpow2.f32 %v1506_v58 }
 0xbf5   :  { %1808 = vpow2.f32 %v1508_v60 }
 0xbf6   :  { %v1803_v56 = vpop.eup %1802 }
 0xbf7   :  { %854 = vrot.lane.b32.xlu0 %v1803_v56, %s1869_s4 }
 0xbfd   :  { %v1805_v57 = vpop.eup %1804 }
 0xbfe   :  { %930 = vrot.lane.b32.xlu1 %v1805_v57, %s1869_s4  ;;  %v1807_v61 = vpop.eup %1806 }
 0xbff   :  { %v845_v63 = vadd.f32 1.0, %v1807_v61  ;;  %v1809_v1 = vpop.eup %1808 }
 0xc00   :  { %v921_v2 = vadd.f32 1.0, %v1809_v1 }
 0xc01   :  { %1810 = vrcp.f32 %v845_v63 }
 0xc02   :  { %1812 = vrcp.f32 %v921_v2 }
 0xc0b   :  { %v1811_v4 = vpop.eup %1810 }
 0xc0c   :  { %v1813_v17 = vpop.eup %1812  ;;  %v852_v29 = vmul.f32 %v1811_v4, %v850_v12 }
 0xc0d   :  { %v928_v16 = vmul.f32 %v1813_v17, %v926_v15 }
 0xc69   :  { %v855_v5 = vpop.permute.xlu0 %854 }
 0xc6a   :  { %v857_v9 = vmul.f32 %v1811_v4, %v855_v5 }
 0xc6c   :  { %859 = vrot.lane.b32.xlu0 %v857_v9, %s1870_s30 }
 0xc70   :  { %v931_v10 = vpop.permute.xlu1 %930 }
 0xc71   :  { %v933_v11 = vmul.f32 %v1813_v17, %v931_v10 }
 0xc73   :  { %935 = vrot.lane.b32.xlu1 %v933_v11, %s1870_s30 }
 0xcde   :  { %v860_v13 = vpop.permute.xlu0 %859 }
 0xcdf   :  { %v2124_v14 = vadd.f32 %v860_v13, %v852_v29 }
 0xce1   :  { %1814 = vtanh.f32 %v2124_v14  ;;  %v1018_v9 = vrot.slane %v2124_v14, 6 }
 0xce5   :  { %v936_v18 = vpop.permute.xlu1 %935 }
 0xce6   :  { %v2128_v20 = vadd.f32 %v936_v18, %v928_v16 }
 0xce8   :  { %1816 = vtanh.f32 %v2128_v20  ;;  %v1095_v12 = vrot.slane %v2128_v20, 2 }
 0xceb   :  { %v1815_v22 = vpop.eup %1814 }
 0xcec   :  { %865 = vrot.lane.b32.xlu0 %v1815_v22, %s1869_s4 }
 0xcf2   :  { %v1817_v23 = vpop.eup %1816 }
 0xcf3   :  { %941 = vrot.lane.b32.xlu1 %v1817_v23, %s1869_s4 }
 0xd5e   :  { %v866_v24 = vpop.permute.xlu0 %865 }
 0xd5f   :  { %v868_v25 = vmul.f32 %v1811_v4, %v866_v24 }
 0xd61   :  { %v2133_v26 = vpack.c.bf16 %v868_v25, %v868_v25 }
 0xd63   :  { %961 = vrot.lane.b32.xlu0 %v2133_v26, %s1870_s30 }
 0xd65   :  { %v942_v27 = vpop.permute.xlu1 %941 }
 0xd66   :  { %v944_v28 = vmul.f32 %v1813_v17, %v942_v27 }
 0xd68   :  { %v2137_v30 = vpack.c.bf16 %v944_v28, %v944_v28 }
 0xd6a   :  { %v1037_v31 = vrot.slane %v2137_v30, 3 }
 0xd6c   :  { %1038 = vrot.lane.b32.xlu1 %v1037_v31, %s1870_s30 }
 0xdd5   :  { %v962_v32 = vpop.permute.xlu0 %961 }
 0xdd6   :  { %1682 = vmatmul.mubr.msk.bf16.vlgmr.msra.gmra.mrb[20].mxu1 %vm119_vm2, %v962_v32 }
 0xdd7   :  { %1694 = vmatpush3.bf16.msra.mxu1 %v1908_v3  ;;  %1697 = vmatprep.mubr.msk.bf16.mxu1 %vm1868_vm0, %v1866_v0 }
 0xdd8   :  { %1695 = vmatprep.subr.bf16.mxu1 %v1866_v0 }
 0xddb   :  { %1696 = vmatpush3.bf16.msra.mxu1 %v1923_v6 }
 0xddc   :  { %1709 = vmatprep.subr.bf16.mxu1 %v1866_v0 }
 0xdde   :  { %v1039_v33 = vpop.permute.xlu1 %1038 }
 0xddf   :  { %1690 = vmatmul.mubr.msk.bf16.vlgmr.msra.gmra.mrb[24].mxu0 %vm119_vm2, %v1039_v33 }
 0xde0   :  { %1702 = vmatpush3.bf16.msra.mxu0 %v1929_v7  ;;  %1705 = vmatprep.mubr.msk.bf16.mxu0 %vm1868_vm0, %v1866_v0 }
 0xde1   :  { %1703 = vmatprep.subr.bf16.mxu0 %v1866_v0 }
 0xde4   :  { %1704 = vmatpush3.bf16.msra.mxu0 %v1936_v8 }
 0xde5   :  { %1717 = vmatprep.subr.bf16.mxu0 %v1866_v0 }
 0xea9   :  { %v1000_v35 = vpop.f32.mrb[20].mxu1 }
 0xeaa   :  { %v1007_v36 = vrot.slane %v1000_v35, 6  ;;  %v1683_v37 = vpop.f32.mrb[21].mxu1 }
 0xeab   :  { %v1003_v39 = vpop.f32.mrb[22].mxu1 }
 0xeac   :  { %v1009_v40 = vadd.f32 %v1007_v36, %v1963_v21  ;;  %v1684_v41 = vpop.f32.mrb[23].mxu1 }
 0xeae   :  { %1818 = vtanh.f32 %v1009_v40  ;;  %v1513_v54 = vmul.f32 -1.442695, %v1009_v40 }
 0xeb2   :  { %v1077_v43 = vpop.f32.mrb[24].mxu0 }
 0xeb3   :  { %v1084_v44 = vrot.slane %v1077_v43, 4  ;;  %v1691_v45 = vpop.f32.mrb[25].mxu0 }
 0xeb4   :  { %v1080_v47 = vpop.f32.mrb[26].mxu0 }
 0xeb5   :  { %v1086_v48 = vadd.f32 %v1084_v44, %v1961_v19  ;;  %v1692_v50 = vpop.f32.mrb[27].mxu0 }
 0xeb7   :  { %1820 = vtanh.f32 %v1086_v48  ;;  %v1515_v55 = vmul.f32 -1.442695, %v1086_v48 }
 0xeb8   :  { %v1819_v51 = vpop.eup %1818  ;;  %1822 = vpow2.f32 %v1513_v54 }
 0xeb9   :  { %1022 = vrot.lane.b32.xlu0 %v1819_v51, %s1869_s4  ;;  %1824 = vpow2.f32 %v1515_v55 }
 0xec1   :  { %v1821_v52 = vpop.eup %1820 }
 0xec2   :  { %1099 = vrot.lane.b32.xlu1 %v1821_v52, %s1869_s4  ;;  %v1823_v56 = vpop.eup %1822 }
 0xec3   :  { %v1013_v57 = vadd.f32 1.0, %v1823_v56  ;;  %v1825_v58 = vpop.eup %1824 }
 0xec4   :  { %v1090_v60 = vadd.f32 1.0, %v1825_v58 }
 0xec5   :  { %1826 = vrcp.f32 %v1013_v57 }
 0xec6   :  { %1828 = vrcp.f32 %v1090_v60 }
 0xecf   :  { %v1827_v61 = vpop.eup %1826 }
 0xed0   :  { %v1829_v2 = vpop.eup %1828  ;;  %v1020_v17 = vmul.f32 %v1827_v61, %v1018_v9 }
 0xed1   :  { %v1097_v29 = vmul.f32 %v1829_v2, %v1095_v12 }
 0xf2b   :  { %v1023_v63 = vpop.permute.xlu0 %1022 }
 0xf2c   :  { %v1025_v1 = vmul.f32 %v1827_v61, %v1023_v63 }
 0xf2e   :  { %1027 = vrot.lane.b32.xlu0 %v1025_v1, %s1870_s30 }
 0xf34   :  { %v1100_v4 = vpop.permute.xlu1 %1099 }
 0xf35   :  { %v1102_v5 = vmul.f32 %v1829_v2, %v1100_v4 }
 0xf37   :  { %1104 = vrot.lane.b32.xlu1 %v1102_v5, %s1870_s30 }
 0xfa0   :  { %v1028_v10 = vpop.permute.xlu0 %1027 }
 0xfa1   :  { %v2162_v11 = vadd.f32 %v1028_v10, %v1020_v17 }
 0xfa3   :  { %1830 = vtanh.f32 %v2162_v11 }
 0xfa9   :  { %v1105_v13 = vpop.permute.xlu1 %1104 }
 0xfaa   :  { %v2166_v15 = vadd.f32 %v1105_v13, %v1097_v29 }
 0xfac   :  { %1832 = vtanh.f32 %v2166_v15  ;;  %v1265_v4 = vrot.slane %v2166_v15, 2 }
 0xfad   :  { %v1831_v16 = vpop.eup %1830 }
 0xfae   :  { %1033 = vrot.lane.b32.xlu0 %v1831_v16, %s1869_s4 }
 0xfb6   :  { %v1833_v18 = vpop.eup %1832 }
 0xfb7   :  { %1110 = vrot.lane.b32.xlu1 %v1833_v18, %s1869_s4 }
0x1020   :  { %v1034_v14 = vpop.permute.xlu0 %1033 }
0x1021   :  { %v1036_v22 = vmul.f32 %v1827_v61, %v1034_v14  ;;  %v1188_v61 = vrot.slane %v2162_v11, 6 }
0x1023   :  { %v2171_v23 = vpack.c.bf16 %v1036_v22, %v1036_v22 }
0x1025   :  { %v1130_v24 = vrot.slane %v2171_v23, 1 }
0x1027   :  { %1131 = vrot.lane.b32.xlu0 %v1130_v24, %s1870_s30 }
0x1029   :  { %v1111_v20 = vpop.permute.xlu1 %1110 }
0x102a   :  { %v1113_v25 = vmul.f32 %v1829_v2, %v1111_v20 }
0x102c   :  { %v2175_v27 = vpack.c.bf16 %v1113_v25, %v1113_v25 }
0x102e   :  { %v1207_v28 = vrot.slane %v2175_v27, 2 }
0x1030   :  { %1208 = vrot.lane.b32.xlu1 %v1207_v28, %s1870_s30 }
0x1099   :  { %v1132_v31 = vpop.permute.xlu0 %1131 }
0x109a   :  { %1698 = vmatmul.mubr.msk.bf16.vlgmr.msra.gmra.mrb[24].mxu1 %vm119_vm2, %v1132_v31 }
0x109b   :  { %1710 = vmatpush3.bf16.msra.mxu1 %v1908_v3  ;;  %1713 = vmatprep.mubr.msk.bf16.mxu1 %vm1868_vm0, %v1866_v0 }
0x109c   :  { %1711 = vmatprep.subr.bf16.mxu1 %v1866_v0 }
0x109f   :  { %1712 = vmatpush3.bf16.msra.mxu1 %v1923_v6 }
0x10a2   :  { %v1209_v32 = vpop.permute.xlu1 %1208 }
0x10a3   :  { %1706 = vmatmul.mubr.msk.bf16.vlgmr.msra.gmra.mrb[28].mxu0 %vm119_vm2, %v1209_v32 }
0x10a4   :  { %1718 = vmatpush3.bf16.msra.mxu0 %v1929_v7  ;;  %1721 = vmatprep.mubr.msk.bf16.mxu0 %vm1868_vm0, %v1866_v0 }
0x10a5   :  { %1719 = vmatprep.subr.bf16.mxu0 %v1866_v0 }
0x10a8   :  { %1720 = vmatpush3.bf16.msra.mxu0 %v1936_v8 }
0x116d   :  { %v1170_v3 = vpop.f32.mrb[24].mxu1 }
0x116e   :  { %v1177_v33 = vrot.slane %v1170_v3, 4  ;;  %v1699_v35 = vpop.f32.mrb[25].mxu1 }
0x116f   :  { %v1173_v36 = vpop.f32.mrb[26].mxu1 }
0x1170   :  { %v1179_v37 = vadd.f32 %v1177_v33, %v1963_v21  ;;  %v1700_v39 = vpop.f32.mrb[27].mxu1 }
0x1172   :  { %1834 = vtanh.f32 %v1179_v37  ;;  %v1520_v8 = vmul.f32 -1.442695, %v1179_v37 }
0x1176   :  { %v1247_v6 = vpop.f32.mrb[28].mxu0 }
0x1177   :  { %v1254_v40 = vrot.slane %v1247_v6, 6  ;;  %v1707_v41 = vpop.f32.mrb[29].mxu0 }
0x1178   :  { %v1250_v43 = vpop.f32.mrb[30].mxu0 }
0x1179   :  { %v1256_v7 = vadd.f32 %v1254_v40, %v1961_v19  ;;  %v1708_v44 = vpop.f32.mrb[31].mxu0 }
0x117b   :  { %1836 = vtanh.f32 %v1256_v7  ;;  %v1522_v47 = vmul.f32 -1.442695, %v1256_v7 }
0x117c   :  { %v1835_v45 = vpop.eup %1834  ;;  %1838 = vpow2.f32 %v1520_v8 }
0x117d   :  { %1192 = vrot.lane.b32.xlu0 %v1835_v45, %s1869_s4  ;;  %1840 = vpow2.f32 %v1522_v47 }
0x1185   :  { %v1837_v0 = vpop.eup %1836 }
0x1186   :  { %1269 = vrot.lane.b32.xlu1 %v1837_v0, %s1869_s4  ;;  %v1839_v48 = vpop.eup %1838 }
0x1187   :  { %v1183_v50 = vadd.f32 1.0, %v1839_v48  ;;  %v1841_v51 = vpop.eup %1840 }
0x1188   :  { %v1260_v52 = vadd.f32 1.0, %v1841_v51 }
0x1189   :  { %1842 = vrcp.f32 %v1183_v50 }
0x118a   :  { %1844 = vrcp.f32 %v1260_v52 }
0x1193   :  { %v1843_v54 = vpop.eup %1842 }
0x1194   :  { %v1845_v57 = vpop.eup %1844  ;;  %v1190_v63 = vmul.f32 %v1843_v54, %v1188_v61 }
0x1195   :  { %v1267_v5 = vmul.f32 %v1845_v57, %v1265_v4 }
0x11ef   :  { %v1193_v55 = vpop.permute.xlu0 %1192 }
0x11f0   :  { %v1195_v56 = vmul.f32 %v1843_v54, %v1193_v55 }
0x11f2   :  { %1197 = vrot.lane.b32.xlu0 %v1195_v56, %s1870_s30 }
0x11f8   :  { %v1270_v58 = vpop.permute.xlu1 %1269 }
0x11f9   :  { %v1272_v60 = vmul.f32 %v1845_v57, %v1270_v58 }
0x11fb   :  { %1274 = vrot.lane.b32.xlu1 %v1272_v60, %s1870_s30 }
0x1264   :  { %v1198_v1 = vpop.permute.xlu0 %1197 }
0x1265   :  { %v1200_v2 = vadd.f32 %v1198_v1, %v1190_v63 }
0x1267   :  { %1846 = vtanh.f32 %v1200_v2  ;;  %v1358_v52 = vrot.slane %v1200_v2, 6 }
0x126d   :  { %v1275_v9 = vpop.permute.xlu1 %1274 }
0x126e   :  { %v1277_v17 = vadd.f32 %v1275_v9, %v1267_v5 }
0x1270   :  { %1848 = vtanh.f32 %v1277_v17 }
0x1271   :  { %v1847_v10 = vpop.eup %1846 }
0x1272   :  { %1203 = vrot.lane.b32.xlu0 %v1847_v10, %s1869_s4 }
0x127a   :  { %v1849_v12 = vpop.eup %1848 }
0x127b   :  { %1280 = vrot.lane.b32.xlu1 %v1849_v12, %s1869_s4 }
0x12e4   :  { %v1204_v29 = vpop.permute.xlu0 %1203 }
0x12e5   :  { %v1206_v13 = vmul.f32 %v1843_v54, %v1204_v29 }
0x12e7   :  { %v2201_v16 = vpack.c.bf16 %v1206_v13, %v1206_v13 }
0x12e9   :  { %v1300_v11 = vrot.slane %v2201_v16, 2 }
0x12eb   :  { %1301 = vrot.lane.b32.xlu0 %v1300_v11, %s1870_s30 }
0x12ed   :  { %v1281_v18 = vpop.permute.xlu1 %1280 }
0x12ee   :  { %v1283_v15 = vmul.f32 %v1845_v57, %v1281_v18  ;;  %v1432_v57 = vrot.slane %v1277_v17, 2 }
0x12f0   :  { %v2205_v14 = vpack.c.bf16 %v1283_v15, %v1283_v15 }
0x12f2   :  { %v1377_v22 = vrot.slane %v2205_v14, 1 }
0x12f4   :  { %1378 = vrot.lane.b32.xlu1 %v1377_v22, %s1870_s30 }
0x135d   :  { %v1302_v24 = vpop.permute.xlu0 %1301 }
0x135e   :  { %1714 = vmatmul.mubr.msk.bf16.vlgmr.msra.gmra.mrb[28].mxu1 %vm119_vm2, %v1302_v24 }
0x1366   :  { %v1379_v20 = vpop.permute.xlu1 %1378 }
0x1367   :  { %1722 = vmatmul.mubr.msk.bf16.vlgmr.msra.gmra.mrb[32].mxu0 %vm119_vm2, %v1379_v20 }
0x1431   :  { %v1340_v25 = vpop.f32.mrb[28].mxu1 }
0x1432   :  { %v1347_v28 = vrot.slane %v1340_v25, 2  ;;  %v1715_v31 = vpop.f32.mrb[29].mxu1 }
0x1433   :  { %v1343_v32 = vpop.f32.mrb[30].mxu1 }
0x1434   :  { %v1349_v3 = vadd.f32 %v1347_v28, %v1963_v21  ;;  %v1716_v33 = vpop.f32.mrb[31].mxu1 }
0x1436   :  { %1850 = vtanh.f32 %v1349_v3  ;;  %v1527_v43 = vmul.f32 -1.442695, %v1349_v3 }
0x143a   :  { %v1417_v35 = vpop.f32.mrb[32].mxu0 }
0x143b   :  { %v1423_v36 = vadd.f32 %v1417_v35, %v1961_v19  ;;  %v1723_v37 = vpop.f32.mrb[33].mxu0 }
0x143c   :  { %v1420_v39 = vpop.f32.mrb[34].mxu0 }
0x143d   :  { %1852 = vtanh.f32 %v1423_v36  ;;  %v1724_v6 = vpop.f32.mrb[35].mxu0  ;;  %v1529_v7 = vmul.f32 -1.442695, %v1423_v36 }
0x143e   :  { %1854 = vpow2.f32 %v1527_v43 }
0x143f   :  { %1856 = vpow2.f32 %v1529_v7 }
0x1440   :  { %v1851_v40 = vpop.eup %1850 }
0x1441   :  { %1362 = vrot.lane.b32.xlu0 %v1851_v40, %s1869_s4 }
0x1447   :  { %v1853_v41 = vpop.eup %1852 }
0x1448   :  { %1436 = vrot.lane.b32.xlu1 %v1853_v41, %s1869_s4  ;;  %v1855_v21 = vpop.eup %1854 }
0x1449   :  { %v1353_v44 = vadd.f32 1.0, %v1855_v21  ;;  %v1857_v45 = vpop.eup %1856 }
0x144a   :  { %v1427_v0 = vadd.f32 1.0, %v1857_v45 }
0x144b   :  { %1858 = vrcp.f32 %v1353_v44 }
0x144c   :  { %1860 = vrcp.f32 %v1427_v0 }
0x1455   :  { %v1859_v19 = vpop.eup %1858 }
0x1456   :  { %v1861_v48 = vpop.eup %1860  ;;  %v1360_v54 = vmul.f32 %v1859_v19, %v1358_v52 }
0x1457   :  { %v1434_v58 = vmul.f32 %v1861_v48, %v1432_v57 }
0x14b3   :  { %v1363_v8 = vpop.permute.xlu0 %1362 }
0x14b4   :  { %v1365_v47 = vmul.f32 %v1859_v19, %v1363_v8 }
0x14b6   :  { %1367 = vrot.lane.b32.xlu0 %v1365_v47, %s1870_s30 }
0x14ba   :  { %v1437_v50 = vpop.permute.xlu1 %1436 }
0x14bb   :  { %v1439_v51 = vmul.f32 %v1861_v48, %v1437_v50 }
0x14bd   :  { %1441 = vrot.lane.b32.xlu1 %v1439_v51, %s1870_s30 }
0x1528   :  { %v1368_v55 = vpop.permute.xlu0 %1367 }
0x1529   :  { %v1370_v56 = vadd.f32 %v1368_v55, %v1360_v54 }
0x152b   :  { %1862 = vtanh.f32 %v1370_v56 }
0x152f   :  { %v1442_v60 = vpop.permute.xlu1 %1441 }
0x1530   :  { %v1444_v61 = vadd.f32 %v1442_v60, %v1434_v58 }
0x1532   :  { %1864 = vtanh.f32 %v1444_v61 }
0x1535   :  { %v1863_v63 = vpop.eup %1862 }
0x1536   :  { %1373 = vrot.lane.b32.xlu0 %v1863_v63, %s1869_s4 }
0x153a   :  { %272 = vrot.lane.b32.xlu0 %v1981_v59, %s1870_s30 }
0x153c   :  { %v1865_v1 = vpop.eup %1864 }
0x153d   :  { %1447 = vrot.lane.b32.xlu1 %v1865_v1, %s1869_s4 }
0x153e   :  { %444 = vrot.lane.b32.xlu0 %v2019_v49, %s1870_s30 }
0x1541   :  { %281 = vrot.lane.b32.xlu1 %v1985_v62, %s1870_s30 }
0x1542   :  { %616 = vrot.lane.b32.xlu0 %v2057_v42, %s1870_s30 }
0x1545   :  { %453 = vrot.lane.b32.xlu1 %v2023_v53, %s1870_s30 }
0x1546   :  { %783 = vrot.lane.b32.xlu0 %v2095_v34, %s1870_s30 }
0x1549   :  { %624 = vrot.lane.b32.xlu1 %v2061_v46, %s1870_s30 }
0x154a   :  { %949 = vrot.lane.b32.xlu0 %v2133_v26, %s1870_s30 }
0x154d   :  { %791 = vrot.lane.b32.xlu1 %v2099_v38, %s1870_s30 }
0x154e   :  { %1118 = vrot.lane.b32.xlu0 %v2171_v23, %s1870_s30 }
0x1551   :  { %957 = vrot.lane.b32.xlu1 %v2137_v30, %s1870_s30 }
0x1552   :  { %1288 = vrot.lane.b32.xlu0 %v2201_v16, %s1870_s30 }
0x1555   :  { %1126 = vrot.lane.b32.xlu1 %v2175_v27, %s1870_s30 }
0x1559   :  { %1296 = vrot.lane.b32.xlu1 %v2205_v14, %s1870_s30 }
0x15a8   :  { %v1374_v59 = vpop.permute.xlu0 %1373 }
0x15a9   :  { %v1376_v62 = vmul.f32 %v1859_v19, %v1374_v59 }
0x15ab   :  { %v1547_v49 = vpack.c.bf16 %v1376_v62, %v1376_v62 }
0x15ac   :  { %v273_v53 = vpop.permute.xlu0 %272 }
0x15ad   :  { %276 = vst.msk [vmem:[%s2318_s5] sm:$0x1] %vm275_vm3, %v273_v53  ;;  %1455 = vrot.lane.b32.xlu0 %v1547_v49, %s1870_s30 }
0x15af   :  { %v1448_v42 = vpop.permute.xlu1 %1447 }
0x15b0   :  { %v1450_v46 = vmul.f32 %v1861_v48, %v1448_v42  ;;  %v445_v34 = vpop.permute.xlu0 %444 }
0x15b1   :  { %448 = vst.msk [vmem:[%s2318_s5] sm:$0x2] %vm447_vm4, %v445_v34 }
0x15b2   :  { %v1548_v38 = vpack.c.bf16 %v1450_v46, %v1450_v46 }
0x15b3   :  { %v282_v26 = vpop.permute.xlu1 %281 }
0x15b4   :  { %1483 = vst.msk [vmem:[%s2318_s5 + $0xc] sm:$0x8] %vm285_vm5, %v282_v26  ;;  %1463 = vrot.lane.b32.xlu1 %v1548_v38, %s1870_s30  ;;  %v617_v30 = vpop.permute.xlu0 %616 }
0x15b5   :  { %619 = vst.msk [vmem:[%s2318_s5] sm:$0x4] %vm456_vm6, %v617_v30 }
0x15b7   :  { %v454_v23 = vpop.permute.xlu1 %453 }
0x15b8   :  { %1490 = vst.msk [vmem:[%s2318_s5 + $0xc] sm:$0x4] %vm456_vm6, %v454_v23  ;;  %v784_v27 = vpop.permute.xlu0 %783 }
0x15b9   :  { %786 = vst.msk [vmem:[%s2318_s5] sm:$0x8] %vm285_vm5, %v784_v27 }
0x15bb   :  { %v625_v2 = vpop.permute.xlu1 %624 }
0x15bc   :  { %1497 = vst.msk [vmem:[%s2318_s5 + $0xc] sm:$0x2] %vm447_vm4, %v625_v2  ;;  %v950_v4 = vpop.permute.xlu0 %949 }
0x15bd   :  { %952 = vst.msk [vmem:[%s2318_s5 + $0x4] sm:$0x1] %vm275_vm3, %v950_v4 }
0x15bf   :  { %v792_v5 = vpop.permute.xlu1 %791 }
0x15c0   :  { %1504 = vst.msk [vmem:[%s2318_s5 + $0xc] sm:$0x1] %vm275_vm3, %v792_v5  ;;  %v1119_v9 = vpop.permute.xlu0 %1118 }
0x15c1   :  { %1121 = vst.msk [vmem:[%s2318_s5 + $0x4] sm:$0x2] %vm447_vm4, %v1119_v9 }
0x15c3   :  { %v958_v17 = vpop.permute.xlu1 %957 }
0x15c4   :  { %1511 = vst.msk [vmem:[%s2318_s5 + $0x8] sm:$0x8] %vm285_vm5, %v958_v17  ;;  %v1289_v10 = vpop.permute.xlu0 %1288 }
0x15c5   :  { %1291 = vst.msk [vmem:[%s2318_s5 + $0x4] sm:$0x4] %vm456_vm6, %v1289_v10 }
0x15c7   :  { %v1127_v12 = vpop.permute.xlu1 %1126 }
0x15c8   :  { %1518 = vst.msk [vmem:[%s2318_s5 + $0x8] sm:$0x4] %vm456_vm6, %v1127_v12 }
0x15cb   :  { %v1297_v29 = vpop.permute.xlu1 %1296 }
0x15cc   :  { %1525 = vst.msk [vmem:[%s2318_s5 + $0x8] sm:$0x2] %vm447_vm4, %v1297_v29 }
0x161f   :  { %v1456_v13 = vpop.permute.xlu0 %1455 }
0x1620   :  { %1458 = vst.msk [vmem:[%s2318_s5 + $0x4] sm:$0x8] %vm285_vm5, %v1456_v13 }
0x1626   :  { %v1464_v16 = vpop.permute.xlu1 %1463 }
0x1627   :  { %1532 = vst.msk [vmem:[%s2318_s5 + $0x8] sm:$0x1] %vm275_vm3, %v1464_v16 }

</bundles_post_ra>
